<compile_context>
chip_gen: v7x
topology: tpu7x:2x2x1
jax: 0.10.0
libtpu: 0.0.40
codegen_flags: <defaults>
</compile_context>

<pallas_src>
import functools

import numpy as np
import jax
import jax.numpy as jnp
from jax import lax
from jax.experimental import pallas as pl
from jax.experimental.pallas import tpu as pltpu


# ---------------------------------------------------------------------------
# In-kernel helpers (traced jnp code, 2-D [C, HW] / [K, Nb*HW] shapes).
# ---------------------------------------------------------------------------
def _gn_silu(x, gmix, gamma, beta, eps):
    """GroupNorm (PyTorch semantics) + SiLU on a (C, HW) f32 tile.

    Statistics are lane reductions to (C, 1) followed by a tiny (C, C) @ (C, 1)
    within-group mixing dot (gmix holds 1/(group_size*HW) at same-group entries),
    instead of two full (C, C) x (C, HW) matmuls.
    """
    s = jnp.sum(x, axis=1, keepdims=True)                               # (C, 1)
    s2 = jnp.sum(x * x, axis=1, keepdims=True)                          # (C, 1)
    mean = jnp.dot(gmix, s, preferred_element_type=jnp.float32)         # group mean
    ex2 = jnp.dot(gmix, s2, preferred_element_type=jnp.float32)         # group E[x^2]
    var = ex2 - mean * mean
    n = (x - mean) * lax.rsqrt(var + eps) * gamma + beta
    # SiLU: sigmoid's divide goes to the otherwise-idle EUP slot.
    return n * pl.reciprocal(1.0 + jnp.exp(-n), approx=True)


def _fill_taps(stk_ref, pad_ref, mask_l, mask_r, c, W, HW, P, lane0):
    """Write the 9 shifted/masked slices of the padded activation into the im2col
    stack scratch (rows t*c:(t+1)*c, lanes lane0:lane0+HW), cast to bf16."""
    for dy in (-1, 0, 1):
        for dx in (-1, 0, 1):
            t = (dy + 1) * 3 + (dx + 1)
            start = P + dy * W + dx                        # static per tap
            sh = pad_ref[0:c, start:start + HW]            # (c, HW) shifted view
            if dx == -1:
                sh = sh * mask_l                           # kill row-wrap columns
            elif dx == 1:
                sh = sh * mask_r
            stk_ref[t * c:(t + 1) * c, lane0:lane0 + HW] = sh.astype(stk_ref.dtype)


# ---------------------------------------------------------------------------
# The fused ResBlock kernel (Nb batch elements per grid step).
# ---------------------------------------------------------------------------
def _resblock_kernel(x_ref, g1_ref, be1_ref, gm1_ref, w1_ref, b1_ref,
                     g2_ref, be2_ref, gm2_ref, w2_ref, b2_ref,
                     ml_ref, mr_ref, o_ref, pad_ref, stk_ref, h_ref,
                     *, cin, cout, W, HW, nb, eps, has_skip):
    P = W + 1                      # left/right pad of the flattened activation
    k1 = 9 * cin
    k2 = 9 * cout + (cin if has_skip else 0)

    # Zero only the pad columns (cheap, megacore-safe). The interior is fully
    # overwritten before each read, and nothing ever writes the pad columns.
    zc = jnp.zeros((pad_ref.shape[0], P), jnp.float32)
    pad_ref[:, 0:P] = zc
    pad_ref[:, P + HW:P + HW + P] = zc

    ml = ml_ref[...]
    mr = mr_ref[...]

    # ---- in_layers: GroupNorm + SiLU, then 3x3 conv as ONE bf16 im2col matmul ----
    for b in range(nb):
        xb = x_ref[b].astype(jnp.float32)                               # (cin, HW)
        h1b = _gn_silu(xb, gm1_ref[...], g1_ref[...], be1_ref[...], eps)
        pad_ref[0:cin, P:P + HW] = h1b
        _fill_taps(stk_ref, pad_ref, ml, mr, cin, W, HW, P, lane0=b * HW)
    h_ref[...] = jnp.dot(w1_ref[...], stk_ref[0:k1],
                         preferred_element_type=jnp.float32) + b1_ref[...]

    # ---- out_layers: GroupNorm + SiLU + Dropout(identity), 3x3 conv (+fused skip) ----
    for b in range(nb):
        h1b = h_ref[:, b * HW:(b + 1) * HW]                             # (cout, HW)
        h2b = _gn_silu(h1b, gm2_ref[...], g2_ref[...], be2_ref[...], eps)
        pad_ref[0:cout, P:P + HW] = h2b
        _fill_taps(stk_ref, pad_ref, ml, mr, cout, W, HW, P, lane0=b * HW)
        if has_skip:
            # 1x1-conv skip fused into conv2's contraction (extra K rows = x).
            stk_ref[9 * cout:k2, b * HW:(b + 1) * HW] = x_ref[b].astype(jnp.bfloat16)
    h_ref[...] = jnp.dot(w2_ref[...], stk_ref[0:k2],
                         preferred_element_type=jnp.float32) + b2_ref[...]

    # ---- residual add + lane-dense stores ----------------------------------
    for b in range(nb):
        res = h_ref[:, b * HW:(b + 1) * HW]
        if not has_skip:
            res = res + x_ref[b].astype(jnp.float32)       # Identity skip
        o_ref[b] = res.astype(o_ref.dtype)


# ---------------------------------------------------------------------------
# Wrapper: layout/weight prep (one-time) + pallas_call.
# ---------------------------------------------------------------------------
def resblock_forward(x, params, *, num_groups=32, eps=1e-5, max_batch_block=4):
    """x: [N, C_in, H, W] -> [N, C_out, H, W].

    params:
      gn1_w, gn1_b : [C_in]        w1 : [C_out, C_in, 3, 3]   b1 : [C_out]
      gn2_w, gn2_b : [C_out]       w2 : [C_out, C_out, 3, 3]  b2 : [C_out]
      optional wskip : [C_out, C_in, 1, 1], bskip : [C_out]   (1x1-conv skip)
    """
    # TODO(synk): up/down (Upsample/Downsample) resampling, dims != 2, training-mode
    # dropout and the use_axis Conv3DAware branch are not implemented.
    N, Cin, H, W = x.shape
    HW = H * W
    Cout = params["w1"].shape[0]
    has_skip = "wskip" in params
    assert Cin % num_groups == 0 and Cout % num_groups == 0

    # Batch block: largest divisor of N not exceeding max_batch_block.
    nb = 1
    for cand in range(min(N, max_batch_block), 0, -1):
        if N % cand == 0:
            nb = cand
            break

    def gmix_mat(c):
        gs = c // num_groups
        g = np.arange(c) // gs
        m = (g[:, None] == g[None, :]).astype(np.float32) / float(gs * HW)
        return jnp.asarray(m)

    def conv_flat(w):  # (co, ci, 3, 3) -> (co, 9*ci), tap-major, bf16 MXU operand
        co, ci = w.shape[0], w.shape[1]
        return jnp.transpose(w, (0, 2, 3, 1)).reshape(co, 9 * ci).astype(jnp.bfloat16)

    col = np.arange(HW) % W
    mask_l = jnp.asarray((col != 0).astype(np.float32).reshape(1, HW))      # dx = -1
    mask_r = jnp.asarray((col != W - 1).astype(np.float32).reshape(1, HW))  # dx = +1

    g1 = params["gn1_w"].reshape(Cin, 1).astype(jnp.float32)
    be1 = params["gn1_b"].reshape(Cin, 1).astype(jnp.float32)
    g2 = params["gn2_w"].reshape(Cout, 1).astype(jnp.float32)
    be2 = params["gn2_b"].reshape(Cout, 1).astype(jnp.float32)
    b1 = params["b1"].reshape(Cout, 1).astype(jnp.float32)
    b2 = params["b2"].reshape(Cout, 1).astype(jnp.float32)

    w1 = conv_flat(params["w1"])
    w2 = conv_flat(params["w2"])
    if has_skip:
        # Fuse the 1x1-conv skip into conv2: extra contraction columns + folded bias.
        w2 = jnp.concatenate(
            [w2, params["wskip"].reshape(Cout, Cin).astype(jnp.bfloat16)], axis=1)
        b2 = b2 + params["bskip"].reshape(Cout, 1).astype(jnp.float32)

    x_flat = x.reshape(N, Cin, HW)  # free metadata reshape, lane-dense layout

    inputs = [x_flat, g1, be1, gmix_mat(Cin), w1, b1,
              g2, be2, gmix_mat(Cout), w2, b2, mask_l, mask_r]

    def const_spec(a):
        # Constant index_map -> DMA'd once, VMEM-resident across the batch grid.
        # (Single-buffering via pipeline_mode=pl.Buffered(1) is a further VMEM
        #  saving when scaling channel width; irrelevant at these sizes.)
        return pl.BlockSpec(a.shape, lambda b, nd=a.ndim: (0,) * nd)

    in_specs = [pl.BlockSpec((nb, Cin, HW), lambda b: (b, 0, 0))]
    in_specs += [const_spec(a) for a in inputs[1:]]

    k2 = 9 * Cout + (Cin if has_skip else 0)
    kmax = max(9 * Cin, k2)
    maxc = max(Cin, Cout)

    kernel = functools.partial(_resblock_kernel, cin=Cin, cout=Cout,
                               W=W, HW=HW, nb=nb, eps=eps, has_skip=has_skip)

    out = pl.pallas_call(
        kernel,
        out_shape=jax.ShapeDtypeStruct((N, Cout, HW), x.dtype),
        grid_spec=pltpu.PrefetchScalarGridSpec(
            num_scalar_prefetch=0,
            grid=(N // nb,),
            in_specs=in_specs,
            out_specs=pl.BlockSpec((nb, Cout, HW), lambda b: (b, 0, 0)),
            scratch_shapes=[
                pltpu.VMEM((maxc, HW + 2 * (W + 1)), jnp.float32),   # padded activation
                pltpu.VMEM((kmax, nb * HW), jnp.bfloat16),           # im2col stack
                pltpu.VMEM((Cout, nb * HW), jnp.float32),            # conv stage output
            ],
        ),
        compiler_params=pltpu.CompilerParams(
            dimension_semantics=("parallel",),
            vmem_limit_bytes=32 * 1024 * 1024),
    )(*inputs)

    return out.reshape(N, Cout, H, W)


# ---------------------------------------------------------------------------
# Pure-JAX reference (matches the PyTorch module's forward, full f32).
# ---------------------------------------------------------------------------
def _reference(x, params, num_groups=32, eps=1e-5):
    def gn_silu(h, gamma, beta):
        n, c, hh, ww = h.shape
        gs = c // num_groups
        hr = h.reshape(n, num_groups, gs, hh, ww)
        mean = hr.mean(axis=(2, 3, 4), keepdims=True)
        var = hr.var(axis=(2, 3, 4), keepdims=True)
        hr = (hr - mean) / jnp.sqrt(var + eps)
        h = hr.reshape(n, c, hh, ww) * gamma[None, :, None, None] + beta[None, :, None, None]
        return h * jax.nn.sigmoid(h)

    def conv(h, w, b):
        y = jax.lax.conv_general_dilated(
            h, w, (1, 1), "SAME", dimension_numbers=("NCHW", "OIHW", "NCHW"))
        return y + b[None, :, None, None]

    h = conv(gn_silu(x, params["gn1_w"], params["gn1_b"]), params["w1"], params["b1"])
    h = conv(gn_silu(h, params["gn2_w"], params["gn2_b"]), params["w2"], params["b2"])
    if "wskip" in params:
        skip = jax.lax.conv_general_dilated(
            x, params["wskip"], (1, 1), "SAME",
            dimension_numbers=("NCHW", "OIHW", "NCHW"))
        skip = skip + params["bskip"][None, :, None, None]
    else:
        skip = x
    return skip + h


if __name__ == "__main__":
    key = jax.random.PRNGKey(0)
    ks = jax.random.split(key, 16)

    N, Cin, H, W = 2, 32, 16, 16
    x = jax.random.normal(ks[0], (N, Cin, H, W), dtype=jnp.float32)

    def make_params(keys, cin, cout, with_skip):
        p = {
            "gn1_w": 1.0 + 0.1 * jax.random.normal(keys[0], (cin,), jnp.float32),
            "gn1_b": 0.1 * jax.random.normal(keys[1], (cin,), jnp.float32),
            "w1": 0.1 * jax.random.normal(keys[2], (cout, cin, 3, 3), jnp.float32),
            "b1": 0.1 * jax.random.normal(keys[3], (cout,), jnp.float32),
            "gn2_w": 1.0 + 0.1 * jax.random.normal(keys[4], (cout,), jnp.float32),
            "gn2_b": 0.1 * jax.random.normal(keys[5], (cout,), jnp.float32),
            # The module zero-initializes the last conv (zero_module); random weights
            # are used here so the compute path is actually exercised and verified.
            "w2": 0.1 * jax.random.normal(keys[6], (cout, cout, 3, 3), jnp.float32),
            "b2": 0.1 * jax.random.normal(keys[7], (cout,), jnp.float32),
        }
        if with_skip:
            p["wskip"] = 0.1 * jax.random.normal(keys[8], (cout, cin, 1, 1), jnp.float32)
            p["bskip"] = 0.1 * jax.random.normal(keys[9], (cout,), jnp.float32)
        return p

    def check(out, ref, name):
        # bf16 MXU operands + approx-reciprocal sigmoid -> relaxed tolerance vs the
        # full-f32 reference (f32 accumulation & f32 GroupNorm statistics kept).
        err = float(jnp.max(jnp.abs(out - ref)))
        rel = float(jnp.linalg.norm(out - ref) / jnp.linalg.norm(ref))
        assert err < 0.2 and rel < 0.04, (name, err, rel)

    # Case 1: out_channels == channels -> Identity skip (default ResBlock config).
    p1 = make_params(ks[1:11], Cin, Cin, with_skip=False)
    out1 = jax.block_until_ready(resblock_forward(x, p1))
    assert out1.shape == (N, Cin, H, W)
    check(out1, _reference(x, p1), "identity_skip")

    # Case 2: out_channels != channels -> 1x1-conv skip fused into conv2's matmul.
    Cout = 64
    p2 = make_params(ks[5:15], Cin, Cout, with_skip=True)
    out2 = jax.block_until_ready(resblock_forward(x, p2))
    assert out2.shape == (N, Cout, H, W)
    check(out2, _reference(x, p2), "conv_skip")

    print("KERNEL_OK")
</pallas_src>

<mosaic_0001>
module attributes {stable_mosaic.version = 11 : i64} {
  func.func @_resblock_kernel(%arg0: i32, %arg1: memref<2x32x256xf32, #tpu.memory_space<vmem>>, %arg2: memref<32x1xf32, #tpu.memory_space<vmem>>, %arg3: memref<32x1xf32, #tpu.memory_space<vmem>>, %arg4: memref<32x32xf32, #tpu.memory_space<vmem>>, %arg5: memref<32x288xbf16, #tpu.memory_space<vmem>>, %arg6: memref<32x1xf32, #tpu.memory_space<vmem>>, %arg7: memref<32x1xf32, #tpu.memory_space<vmem>>, %arg8: memref<32x1xf32, #tpu.memory_space<vmem>>, %arg9: memref<32x32xf32, #tpu.memory_space<vmem>>, %arg10: memref<32x288xbf16, #tpu.memory_space<vmem>>, %arg11: memref<32x1xf32, #tpu.memory_space<vmem>>, %arg12: memref<1x256xf32, #tpu.memory_space<vmem>>, %arg13: memref<1x256xf32, #tpu.memory_space<vmem>>, %arg14: memref<2x32x256xf32, #tpu.memory_space<vmem>>, %arg15: memref<32x290xf32, #tpu.memory_space<vmem>>, %arg16: memref<288x512xbf16, #tpu.memory_space<vmem>>, %arg17: memref<32x512xf32, #tpu.memory_space<vmem>>) attributes {dimension_semantics = [#tpu.dimension_semantics<parallel>], iteration_bounds = array<i64: 1>, scalar_prefetch = 0 : i64, scratch_operands = 3 : i64, tpu.core_type = #tpu.core_type<tc>, window_params = [{transform_indices = @transform_0, window_bounds = array<i64: 2, 32, 256>}, {pipeline_mode = #tpu.pipeline_mode<synchronous>, transform_indices = @transform_1, window_bounds = array<i64: 32, 1>}, {pipeline_mode = #tpu.pipeline_mode<synchronous>, transform_indices = @transform_2, window_bounds = array<i64: 32, 1>}, {pipeline_mode = #tpu.pipeline_mode<synchronous>, transform_indices = @transform_3, window_bounds = array<i64: 32, 32>}, {pipeline_mode = #tpu.pipeline_mode<synchronous>, transform_indices = @transform_4, window_bounds = array<i64: 32, 288>}, {pipeline_mode = #tpu.pipeline_mode<synchronous>, transform_indices = @transform_5, window_bounds = array<i64: 32, 1>}, {pipeline_mode = #tpu.pipeline_mode<synchronous>, transform_indices = @transform_6, window_bounds = array<i64: 32, 1>}, {pipeline_mode = #tpu.pipeline_mode<synchronous>, transform_indices = @transform_7, window_bounds = array<i64: 32, 1>}, {pipeline_mode = #tpu.pipeline_mode<synchronous>, transform_indices = @transform_8, window_bounds = array<i64: 32, 32>}, {pipeline_mode = #tpu.pipeline_mode<synchronous>, transform_indices = @transform_9, window_bounds = array<i64: 32, 288>}, {pipeline_mode = #tpu.pipeline_mode<synchronous>, transform_indices = @transform_10, window_bounds = array<i64: 32, 1>}, {pipeline_mode = #tpu.pipeline_mode<synchronous>, transform_indices = @transform_11, window_bounds = array<i64: 1, 256>}, {pipeline_mode = #tpu.pipeline_mode<synchronous>, transform_indices = @transform_12, window_bounds = array<i64: 1, 256>}, {transform_indices = @transform_13, window_bounds = array<i64: 2, 32, 256>}]} {
    %cst = arith.constant 0.000000e+00 : f32
    %0 = vector.broadcast %cst : f32 to vector<32x17xf32>
    %c0 = arith.constant 0 : index
    %c0_0 = arith.constant 0 : index
    %1 = vector.load %arg15[%c0, %c0_0] : memref<32x290xf32, #tpu.memory_space<vmem>>, vector<32x17xf32>
    tpu.vector_store %arg15[%c0, %c0_0], %0 {strides = array<i32>} : memref<32x290xf32, #tpu.memory_space<vmem>>, vector<32x17xf32>,
    %c0_1 = arith.constant 0 : index
    %c273 = arith.constant 273 : index
    %2 = vector.load %arg15[%c0_1, %c273] : memref<32x290xf32, #tpu.memory_space<vmem>>, vector<32x17xf32>
    tpu.vector_store %arg15[%c0_1, %c273], %0 {strides = array<i32>} : memref<32x290xf32, #tpu.memory_space<vmem>>, vector<32x17xf32>,
    %c0_2 = arith.constant 0 : index
    %c0_3 = arith.constant 0 : index
    %3 = vector.load %arg12[%c0_2, %c0_3] : memref<1x256xf32, #tpu.memory_space<vmem>>, vector<1x256xf32>
    %c0_4 = arith.constant 0 : index
    %c0_5 = arith.constant 0 : index
    %4 = vector.load %arg13[%c0_4, %c0_5] : memref<1x256xf32, #tpu.memory_space<vmem>>, vector<1x256xf32>
    %c0_6 = arith.constant 0 : index
    %c0_7 = arith.constant 0 : index
    %c0_8 = arith.constant 0 : index
    %5 = vector.load %arg1[%c0_6, %c0_7, %c0_8] : memref<2x32x256xf32, #tpu.memory_space<vmem>>, vector<1x32x256xf32>
    %6 = vector.shape_cast %5 : vector<1x32x256xf32> to vector<32x256xf32>
    %c0_9 = arith.constant 0 : index
    %c0_10 = arith.constant 0 : index
    %7 = vector.load %arg4[%c0_9, %c0_10] : memref<32x32xf32, #tpu.memory_space<vmem>>, vector<32x32xf32>
    %c0_11 = arith.constant 0 : index
    %c0_12 = arith.constant 0 : index
    %8 = vector.load %arg2[%c0_11, %c0_12] : memref<32x1xf32, #tpu.memory_space<vmem>>, vector<32x1xf32>
    %c0_13 = arith.constant 0 : index
    %c0_14 = arith.constant 0 : index
    %9 = vector.load %arg3[%c0_13, %c0_14] : memref<32x1xf32, #tpu.memory_space<vmem>>, vector<32x1xf32>
    %cst_15 = arith.constant dense<0.000000e+00> : vector<32xf32>
    %10 = vector.multi_reduction <add>, %6, %cst_15 [1] : vector<32x256xf32> to vector<32xf32>
    %11 = vector.shape_cast %10 : vector<32xf32> to vector<32x1xf32>
    %12 = arith.mulf %6, %6 : vector<32x256xf32>
    %cst_16 = arith.constant dense<0.000000e+00> : vector<32xf32>
    %13 = vector.multi_reduction <add>, %12, %cst_16 [1] : vector<32x256xf32> to vector<32xf32>
    %14 = vector.shape_cast %13 : vector<32xf32> to vector<32x1xf32>
    %cst_17 = arith.constant dense<0.000000e+00> : vector<32x1xf32>
    %15 = tpu.matmul %7, %11, %cst_17 {dimension_numbers = #tpu.dot_dimension_numbers<[1], [0], [0], [1], [0, 0, 1, 1], [], []>} : vector<32x32xf32>, vector<32x1xf32>, vector<32x1xf32> -> vector<32x1xf32>
    %cst_18 = arith.constant dense<0.000000e+00> : vector<32x1xf32>
    %16 = tpu.matmul %7, %14, %cst_18 {dimension_numbers = #tpu.dot_dimension_numbers<[1], [0], [0], [1], [0, 0, 1, 1], [], []>} : vector<32x32xf32>, vector<32x1xf32>, vector<32x1xf32> -> vector<32x1xf32>
    %17 = arith.mulf %15, %15 : vector<32x1xf32>
    %18 = arith.subf %16, %17 : vector<32x1xf32>
    %19 = vector.broadcast %15 : vector<32x1xf32> to vector<32x256xf32>
    %20 = arith.subf %6, %19 : vector<32x256xf32>
    %cst_19 = arith.constant 9.99999974E-6 : f32
    %21 = vector.broadcast %cst_19 : f32 to vector<32x1xf32>
    %22 = arith.addf %18, %21 : vector<32x1xf32>
    %23 = math.rsqrt %22 : vector<32x1xf32>
    %24 = vector.broadcast %23 : vector<32x1xf32> to vector<32x256xf32>
    %25 = arith.mulf %20, %24 : vector<32x256xf32>
    %26 = vector.broadcast %8 : vector<32x1xf32> to vector<32x256xf32>
    %27 = arith.mulf %25, %26 : vector<32x256xf32>
    %28 = vector.broadcast %9 : vector<32x1xf32> to vector<32x256xf32>
    %29 = arith.addf %27, %28 : vector<32x256xf32>
    %cst_20 = arith.constant 0.000000e+00 : f32
    %30 = vector.broadcast %cst_20 : f32 to vector<32x256xf32>
    %31 = arith.subf %30, %29 : vector<32x256xf32>
    %32 = math.exp %31 : vector<32x256xf32>
    %cst_21 = arith.constant 1.000000e+00 : f32
    %33 = vector.broadcast %cst_21 : f32 to vector<32x256xf32>
    %34 = arith.addf %33, %32 : vector<32x256xf32>
    %35 = tpu.reciprocal %34 {approx = true} : vector<32x256xf32> -> vector<32x256xf32>
    %36 = arith.mulf %29, %35 : vector<32x256xf32>
    %c0_22 = arith.constant 0 : index
    %c17 = arith.constant 17 : index
    %37 = vector.load %arg15[%c0_22, %c17] : memref<32x290xf32, #tpu.memory_space<vmem>>, vector<32x256xf32>
    tpu.vector_store %arg15[%c0_22, %c17], %36 {strides = array<i32>} : memref<32x290xf32, #tpu.memory_space<vmem>>, vector<32x256xf32>,
    %c0_23 = arith.constant 0 : index
    %c0_24 = arith.constant 0 : index
    %38 = vector.load %arg15[%c0_23, %c0_24] : memref<32x290xf32, #tpu.memory_space<vmem>>, vector<32x256xf32>
    %39 = vector.broadcast %3 : vector<1x256xf32> to vector<32x256xf32>
    %40 = arith.mulf %38, %39 : vector<32x256xf32>
    %41 = arith.truncf %40 : vector<32x256xf32> to vector<32x256xbf16>
    %c0_25 = arith.constant 0 : index
    %c0_26 = arith.constant 0 : index
    %42 = vector.load %arg16[%c0_25, %c0_26] : memref<288x512xbf16, #tpu.memory_space<vmem>>, vector<32x256xbf16>
    tpu.vector_store %arg16[%c0_25, %c0_26], %41 {strides = array<i32>} : memref<288x512xbf16, #tpu.memory_space<vmem>>, vector<32x256xbf16>,
    %c0_27 = arith.constant 0 : index
    %c1 = arith.constant 1 : index
    %43 = vector.load %arg15[%c0_27, %c1] : memref<32x290xf32, #tpu.memory_space<vmem>>, vector<32x256xf32>
    %44 = arith.truncf %43 : vector<32x256xf32> to vector<32x256xbf16>
    %c32 = arith.constant 32 : index
    %c0_28 = arith.constant 0 : index
    %45 = vector.load %arg16[%c32, %c0_28] : memref<288x512xbf16, #tpu.memory_space<vmem>>, vector<32x256xbf16>
    tpu.vector_store %arg16[%c32, %c0_28], %44 {strides = array<i32>} : memref<288x512xbf16, #tpu.memory_space<vmem>>, vector<32x256xbf16>,
    %c0_29 = arith.constant 0 : index
    %c2 = arith.constant 2 : index
    %46 = vector.load %arg15[%c0_29, %c2] : memref<32x290xf32, #tpu.memory_space<vmem>>, vector<32x256xf32>
    %47 = vector.broadcast %4 : vector<1x256xf32> to vector<32x256xf32>
    %48 = arith.mulf %46, %47 : vector<32x256xf32>
    %49 = arith.truncf %48 : vector<32x256xf32> to vector<32x256xbf16>
    %c64 = arith.constant 64 : index
    %c0_30 = arith.constant 0 : index
    %50 = vector.load %arg16[%c64, %c0_30] : memref<288x512xbf16, #tpu.memory_space<vmem>>, vector<32x256xbf16>
    tpu.vector_store %arg16[%c64, %c0_30], %49 {strides = array<i32>} : memref<288x512xbf16, #tpu.memory_space<vmem>>, vector<32x256xbf16>,
    %c0_31 = arith.constant 0 : index
    %c16 = arith.constant 16 : index
    %51 = vector.load %arg15[%c0_31, %c16] : memref<32x290xf32, #tpu.memory_space<vmem>>, vector<32x256xf32>
    %52 = vector.broadcast %3 : vector<1x256xf32> to vector<32x256xf32>
    %53 = arith.mulf %51, %52 : vector<32x256xf32>
    %54 = arith.truncf %53 : vector<32x256xf32> to vector<32x256xbf16>
    %c96 = arith.constant 96 : index
    %c0_32 = arith.constant 0 : index
    %55 = vector.load %arg16[%c96, %c0_32] : memref<288x512xbf16, #tpu.memory_space<vmem>>, vector<32x256xbf16>
    tpu.vector_store %arg16[%c96, %c0_32], %54 {strides = array<i32>} : memref<288x512xbf16, #tpu.memory_space<vmem>>, vector<32x256xbf16>,
    %c0_33 = arith.constant 0 : index
    %c17_34 = arith.constant 17 : index
    %56 = vector.load %arg15[%c0_33, %c17_34] : memref<32x290xf32, #tpu.memory_space<vmem>>, vector<32x256xf32>
    %57 = arith.truncf %56 : vector<32x256xf32> to vector<32x256xbf16>
    %c128 = arith.constant 128 : index
    %c0_35 = arith.constant 0 : index
    %58 = vector.load %arg16[%c128, %c0_35] : memref<288x512xbf16, #tpu.memory_space<vmem>>, vector<32x256xbf16>
    tpu.vector_store %arg16[%c128, %c0_35], %57 {strides = array<i32>} : memref<288x512xbf16, #tpu.memory_space<vmem>>, vector<32x256xbf16>,
    %c0_36 = arith.constant 0 : index
    %c18 = arith.constant 18 : index
    %59 = vector.load %arg15[%c0_36, %c18] : memref<32x290xf32, #tpu.memory_space<vmem>>, vector<32x256xf32>
    %60 = vector.broadcast %4 : vector<1x256xf32> to vector<32x256xf32>
    %61 = arith.mulf %59, %60 : vector<32x256xf32>
    %62 = arith.truncf %61 : vector<32x256xf32> to vector<32x256xbf16>
    %c160 = arith.constant 160 : index
    %c0_37 = arith.constant 0 : index
    %63 = vector.load %arg16[%c160, %c0_37] : memref<288x512xbf16, #tpu.memory_space<vmem>>, vector<32x256xbf16>
    tpu.vector_store %arg16[%c160, %c0_37], %62 {strides = array<i32>} : memref<288x512xbf16, #tpu.memory_space<vmem>>, vector<32x256xbf16>,
    %c0_38 = arith.constant 0 : index
    %c32_39 = arith.constant 32 : index
    %64 = vector.load %arg15[%c0_38, %c32_39] : memref<32x290xf32, #tpu.memory_space<vmem>>, vector<32x256xf32>
    %65 = vector.broadcast %3 : vector<1x256xf32> to vector<32x256xf32>
    %66 = arith.mulf %64, %65 : vector<32x256xf32>
    %67 = arith.truncf %66 : vector<32x256xf32> to vector<32x256xbf16>
    %c192 = arith.constant 192 : index
    %c0_40 = arith.constant 0 : index
    %68 = vector.load %arg16[%c192, %c0_40] : memref<288x512xbf16, #tpu.memory_space<vmem>>, vector<32x256xbf16>
    tpu.vector_store %arg16[%c192, %c0_40], %67 {strides = array<i32>} : memref<288x512xbf16, #tpu.memory_space<vmem>>, vector<32x256xbf16>,
    %c0_41 = arith.constant 0 : index
    %c33 = arith.constant 33 : index
    %69 = vector.load %arg15[%c0_41, %c33] : memref<32x290xf32, #tpu.memory_space<vmem>>, vector<32x256xf32>
    %70 = arith.truncf %69 : vector<32x256xf32> to vector<32x256xbf16>
    %c224 = arith.constant 224 : index
    %c0_42 = arith.constant 0 : index
    %71 = vector.load %arg16[%c224, %c0_42] : memref<288x512xbf16, #tpu.memory_space<vmem>>, vector<32x256xbf16>
    tpu.vector_store %arg16[%c224, %c0_42], %70 {strides = array<i32>} : memref<288x512xbf16, #tpu.memory_space<vmem>>, vector<32x256xbf16>,
    %c0_43 = arith.constant 0 : index
    %c34 = arith.constant 34 : index
    %72 = vector.load %arg15[%c0_43, %c34] : memref<32x290xf32, #tpu.memory_space<vmem>>, vector<32x256xf32>
    %73 = vector.broadcast %4 : vector<1x256xf32> to vector<32x256xf32>
    %74 = arith.mulf %72, %73 : vector<32x256xf32>
    %75 = arith.truncf %74 : vector<32x256xf32> to vector<32x256xbf16>
    %c256 = arith.constant 256 : index
    %c0_44 = arith.constant 0 : index
    %76 = vector.load %arg16[%c256, %c0_44] : memref<288x512xbf16, #tpu.memory_space<vmem>>, vector<32x256xbf16>
    tpu.vector_store %arg16[%c256, %c0_44], %75 {strides = array<i32>} : memref<288x512xbf16, #tpu.memory_space<vmem>>, vector<32x256xbf16>,
    %c1_45 = arith.constant 1 : index
    %c0_46 = arith.constant 0 : index
    %c0_47 = arith.constant 0 : index
    %77 = vector.load %arg1[%c1_45, %c0_46, %c0_47] : memref<2x32x256xf32, #tpu.memory_space<vmem>>, vector<1x32x256xf32>
    %78 = vector.shape_cast %77 : vector<1x32x256xf32> to vector<32x256xf32>
    %c0_48 = arith.constant 0 : index
    %c0_49 = arith.constant 0 : index
    %79 = vector.load %arg4[%c0_48, %c0_49] : memref<32x32xf32, #tpu.memory_space<vmem>>, vector<32x32xf32>
    %c0_50 = arith.constant 0 : index
    %c0_51 = arith.constant 0 : index
    %80 = vector.load %arg2[%c0_50, %c0_51] : memref<32x1xf32, #tpu.memory_space<vmem>>, vector<32x1xf32>
    %c0_52 = arith.constant 0 : index
    %c0_53 = arith.constant 0 : index
    %81 = vector.load %arg3[%c0_52, %c0_53] : memref<32x1xf32, #tpu.memory_space<vmem>>, vector<32x1xf32>
    %cst_54 = arith.constant dense<0.000000e+00> : vector<32xf32>
    %82 = vector.multi_reduction <add>, %78, %cst_54 [1] : vector<32x256xf32> to vector<32xf32>
    %83 = vector.shape_cast %82 : vector<32xf32> to vector<32x1xf32>
    %84 = arith.mulf %78, %78 : vector<32x256xf32>
    %cst_55 = arith.constant dense<0.000000e+00> : vector<32xf32>
    %85 = vector.multi_reduction <add>, %84, %cst_55 [1] : vector<32x256xf32> to vector<32xf32>
    %86 = vector.shape_cast %85 : vector<32xf32> to vector<32x1xf32>
    %cst_56 = arith.constant dense<0.000000e+00> : vector<32x1xf32>
    %87 = tpu.matmul %79, %83, %cst_56 {dimension_numbers = #tpu.dot_dimension_numbers<[1], [0], [0], [1], [0, 0, 1, 1], [], []>} : vector<32x32xf32>, vector<32x1xf32>, vector<32x1xf32> -> vector<32x1xf32>
    %cst_57 = arith.constant dense<0.000000e+00> : vector<32x1xf32>
    %88 = tpu.matmul %79, %86, %cst_57 {dimension_numbers = #tpu.dot_dimension_numbers<[1], [0], [0], [1], [0, 0, 1, 1], [], []>} : vector<32x32xf32>, vector<32x1xf32>, vector<32x1xf32> -> vector<32x1xf32>
    %89 = arith.mulf %87, %87 : vector<32x1xf32>
    %90 = arith.subf %88, %89 : vector<32x1xf32>
    %91 = vector.broadcast %87 : vector<32x1xf32> to vector<32x256xf32>
    %92 = arith.subf %78, %91 : vector<32x256xf32>
    %cst_58 = arith.constant 9.99999974E-6 : f32
    %93 = vector.broadcast %cst_58 : f32 to vector<32x1xf32>
    %94 = arith.addf %90, %93 : vector<32x1xf32>
    %95 = math.rsqrt %94 : vector<32x1xf32>
    %96 = vector.broadcast %95 : vector<32x1xf32> to vector<32x256xf32>
    %97 = arith.mulf %92, %96 : vector<32x256xf32>
    %98 = vector.broadcast %80 : vector<32x1xf32> to vector<32x256xf32>
    %99 = arith.mulf %97, %98 : vector<32x256xf32>
    %100 = vector.broadcast %81 : vector<32x1xf32> to vector<32x256xf32>
    %101 = arith.addf %99, %100 : vector<32x256xf32>
    %cst_59 = arith.constant 0.000000e+00 : f32
    %102 = vector.broadcast %cst_59 : f32 to vector<32x256xf32>
    %103 = arith.subf %102, %101 : vector<32x256xf32>
    %104 = math.exp %103 : vector<32x256xf32>
    %cst_60 = arith.constant 1.000000e+00 : f32
    %105 = vector.broadcast %cst_60 : f32 to vector<32x256xf32>
    %106 = arith.addf %105, %104 : vector<32x256xf32>
    %107 = tpu.reciprocal %106 {approx = true} : vector<32x256xf32> -> vector<32x256xf32>
    %108 = arith.mulf %101, %107 : vector<32x256xf32>
    %c0_61 = arith.constant 0 : index
    %c17_62 = arith.constant 17 : index
    %109 = vector.load %arg15[%c0_61, %c17_62] : memref<32x290xf32, #tpu.memory_space<vmem>>, vector<32x256xf32>
    tpu.vector_store %arg15[%c0_61, %c17_62], %108 {strides = array<i32>} : memref<32x290xf32, #tpu.memory_space<vmem>>, vector<32x256xf32>,
    %c0_63 = arith.constant 0 : index
    %c0_64 = arith.constant 0 : index
    %110 = vector.load %arg15[%c0_63, %c0_64] : memref<32x290xf32, #tpu.memory_space<vmem>>, vector<32x256xf32>
    %111 = vector.broadcast %3 : vector<1x256xf32> to vector<32x256xf32>
    %112 = arith.mulf %110, %111 : vector<32x256xf32>
    %113 = arith.truncf %112 : vector<32x256xf32> to vector<32x256xbf16>
    %c0_65 = arith.constant 0 : index
    %c256_66 = arith.constant 256 : index
    %114 = vector.load %arg16[%c0_65, %c256_66] : memref<288x512xbf16, #tpu.memory_space<vmem>>, vector<32x256xbf16>
    tpu.vector_store %arg16[%c0_65, %c256_66], %113 {strides = array<i32>} : memref<288x512xbf16, #tpu.memory_space<vmem>>, vector<32x256xbf16>,
    %c0_67 = arith.constant 0 : index
    %c1_68 = arith.constant 1 : index
    %115 = vector.load %arg15[%c0_67, %c1_68] : memref<32x290xf32, #tpu.memory_space<vmem>>, vector<32x256xf32>
    %116 = arith.truncf %115 : vector<32x256xf32> to vector<32x256xbf16>
    %c32_69 = arith.constant 32 : index
    %c256_70 = arith.constant 256 : index
    %117 = vector.load %arg16[%c32_69, %c256_70] : memref<288x512xbf16, #tpu.memory_space<vmem>>, vector<32x256xbf16>
    tpu.vector_store %arg16[%c32_69, %c256_70], %116 {strides = array<i32>} : memref<288x512xbf16, #tpu.memory_space<vmem>>, vector<32x256xbf16>,
    %c0_71 = arith.constant 0 : index
    %c2_72 = arith.constant 2 : index
    %118 = vector.load %arg15[%c0_71, %c2_72] : memref<32x290xf32, #tpu.memory_space<vmem>>, vector<32x256xf32>
    %119 = vector.broadcast %4 : vector<1x256xf32> to vector<32x256xf32>
    %120 = arith.mulf %118, %119 : vector<32x256xf32>
    %121 = arith.truncf %120 : vector<32x256xf32> to vector<32x256xbf16>
    %c64_73 = arith.constant 64 : index
    %c256_74 = arith.constant 256 : index
    %122 = vector.load %arg16[%c64_73, %c256_74] : memref<288x512xbf16, #tpu.memory_space<vmem>>, vector<32x256xbf16>
    tpu.vector_store %arg16[%c64_73, %c256_74], %121 {strides = array<i32>} : memref<288x512xbf16, #tpu.memory_space<vmem>>, vector<32x256xbf16>,
    %c0_75 = arith.constant 0 : index
    %c16_76 = arith.constant 16 : index
    %123 = vector.load %arg15[%c0_75, %c16_76] : memref<32x290xf32, #tpu.memory_space<vmem>>, vector<32x256xf32>
    %124 = vector.broadcast %3 : vector<1x256xf32> to vector<32x256xf32>
    %125 = arith.mulf %123, %124 : vector<32x256xf32>
    %126 = arith.truncf %125 : vector<32x256xf32> to vector<32x256xbf16>
    %c96_77 = arith.constant 96 : index
    %c256_78 = arith.constant 256 : index
    %127 = vector.load %arg16[%c96_77, %c256_78] : memref<288x512xbf16, #tpu.memory_space<vmem>>, vector<32x256xbf16>
    tpu.vector_store %arg16[%c96_77, %c256_78], %126 {strides = array<i32>} : memref<288x512xbf16, #tpu.memory_space<vmem>>, vector<32x256xbf16>,
    %c0_79 = arith.constant 0 : index
    %c17_80 = arith.constant 17 : index
    %128 = vector.load %arg15[%c0_79, %c17_80] : memref<32x290xf32, #tpu.memory_space<vmem>>, vector<32x256xf32>
    %129 = arith.truncf %128 : vector<32x256xf32> to vector<32x256xbf16>
    %c128_81 = arith.constant 128 : index
    %c256_82 = arith.constant 256 : index
    %130 = vector.load %arg16[%c128_81, %c256_82] : memref<288x512xbf16, #tpu.memory_space<vmem>>, vector<32x256xbf16>
    tpu.vector_store %arg16[%c128_81, %c256_82], %129 {strides = array<i32>} : memref<288x512xbf16, #tpu.memory_space<vmem>>, vector<32x256xbf16>,
    %c0_83 = arith.constant 0 : index
    %c18_84 = arith.constant 18 : index
    %131 = vector.load %arg15[%c0_83, %c18_84] : memref<32x290xf32, #tpu.memory_space<vmem>>, vector<32x256xf32>
    %132 = vector.broadcast %4 : vector<1x256xf32> to vector<32x256xf32>
    %133 = arith.mulf %131, %132 : vector<32x256xf32>
    %134 = arith.truncf %133 : vector<32x256xf32> to vector<32x256xbf16>
    %c160_85 = arith.constant 160 : index
    %c256_86 = arith.constant 256 : index
    %135 = vector.load %arg16[%c160_85, %c256_86] : memref<288x512xbf16, #tpu.memory_space<vmem>>, vector<32x256xbf16>
    tpu.vector_store %arg16[%c160_85, %c256_86], %134 {strides = array<i32>} : memref<288x512xbf16, #tpu.memory_space<vmem>>, vector<32x256xbf16>,
    %c0_87 = arith.constant 0 : index
    %c32_88 = arith.constant 32 : index
    %136 = vector.load %arg15[%c0_87, %c32_88] : memref<32x290xf32, #tpu.memory_space<vmem>>, vector<32x256xf32>
    %137 = vector.broadcast %3 : vector<1x256xf32> to vector<32x256xf32>
    %138 = arith.mulf %136, %137 : vector<32x256xf32>
    %139 = arith.truncf %138 : vector<32x256xf32> to vector<32x256xbf16>
    %c192_89 = arith.constant 192 : index
    %c256_90 = arith.constant 256 : index
    %140 = vector.load %arg16[%c192_89, %c256_90] : memref<288x512xbf16, #tpu.memory_space<vmem>>, vector<32x256xbf16>
    tpu.vector_store %arg16[%c192_89, %c256_90], %139 {strides = array<i32>} : memref<288x512xbf16, #tpu.memory_space<vmem>>, vector<32x256xbf16>,
    %c0_91 = arith.constant 0 : index
    %c33_92 = arith.constant 33 : index
    %141 = vector.load %arg15[%c0_91, %c33_92] : memref<32x290xf32, #tpu.memory_space<vmem>>, vector<32x256xf32>
    %142 = arith.truncf %141 : vector<32x256xf32> to vector<32x256xbf16>
    %c224_93 = arith.constant 224 : index
    %c256_94 = arith.constant 256 : index
    %143 = vector.load %arg16[%c224_93, %c256_94] : memref<288x512xbf16, #tpu.memory_space<vmem>>, vector<32x256xbf16>
    tpu.vector_store %arg16[%c224_93, %c256_94], %142 {strides = array<i32>} : memref<288x512xbf16, #tpu.memory_space<vmem>>, vector<32x256xbf16>,
    %c0_95 = arith.constant 0 : index
    %c34_96 = arith.constant 34 : index
    %144 = vector.load %arg15[%c0_95, %c34_96] : memref<32x290xf32, #tpu.memory_space<vmem>>, vector<32x256xf32>
    %145 = vector.broadcast %4 : vector<1x256xf32> to vector<32x256xf32>
    %146 = arith.mulf %144, %145 : vector<32x256xf32>
    %147 = arith.truncf %146 : vector<32x256xf32> to vector<32x256xbf16>
    %c256_97 = arith.constant 256 : index
    %c256_98 = arith.constant 256 : index
    %148 = vector.load %arg16[%c256_97, %c256_98] : memref<288x512xbf16, #tpu.memory_space<vmem>>, vector<32x256xbf16>
    tpu.vector_store %arg16[%c256_97, %c256_98], %147 {strides = array<i32>} : memref<288x512xbf16, #tpu.memory_space<vmem>>, vector<32x256xbf16>,
    %c0_99 = arith.constant 0 : index
    %c0_100 = arith.constant 0 : index
    %149 = vector.load %arg5[%c0_99, %c0_100] : memref<32x288xbf16, #tpu.memory_space<vmem>>, vector<32x288xbf16>
    %c0_101 = arith.constant 0 : index
    %c0_102 = arith.constant 0 : index
    %150 = vector.load %arg16[%c0_101, %c0_102] : memref<288x512xbf16, #tpu.memory_space<vmem>>, vector<288x512xbf16>
    %cst_103 = arith.constant dense<0.000000e+00> : vector<32x512xf32>
    %151 = tpu.matmul %149, %150, %cst_103 {dimension_numbers = #tpu.dot_dimension_numbers<[1], [0], [0], [1], [0, 0, 1, 1], [], []>} : vector<32x288xbf16>, vector<288x512xbf16>, vector<32x512xf32> -> vector<32x512xf32>
    %c0_104 = arith.constant 0 : index
    %c0_105 = arith.constant 0 : index
    %152 = vector.load %arg6[%c0_104, %c0_105] : memref<32x1xf32, #tpu.memory_space<vmem>>, vector<32x1xf32>
    %153 = vector.broadcast %152 : vector<32x1xf32> to vector<32x512xf32>
    %154 = arith.addf %151, %153 : vector<32x512xf32>
    %c0_106 = arith.constant 0 : index
    %c0_107 = arith.constant 0 : index
    %155 = vector.load %arg17[%c0_106, %c0_107] : memref<32x512xf32, #tpu.memory_space<vmem>>, vector<32x512xf32>
    tpu.vector_store %arg17[%c0_106, %c0_107], %154 {strides = array<i32>} : memref<32x512xf32, #tpu.memory_space<vmem>>, vector<32x512xf32>,
    %c0_108 = arith.constant 0 : index
    %c0_109 = arith.constant 0 : index
    %156 = vector.load %arg17[%c0_108, %c0_109] : memref<32x512xf32, #tpu.memory_space<vmem>>, vector<32x256xf32>
    %c0_110 = arith.constant 0 : index
    %c0_111 = arith.constant 0 : index
    %157 = vector.load %arg9[%c0_110, %c0_111] : memref<32x32xf32, #tpu.memory_space<vmem>>, vector<32x32xf32>
    %c0_112 = arith.constant 0 : index
    %c0_113 = arith.constant 0 : index
    %158 = vector.load %arg7[%c0_112, %c0_113] : memref<32x1xf32, #tpu.memory_space<vmem>>, vector<32x1xf32>
    %c0_114 = arith.constant 0 : index
    %c0_115 = arith.constant 0 : index
    %159 = vector.load %arg8[%c0_114, %c0_115] : memref<32x1xf32, #tpu.memory_space<vmem>>, vector<32x1xf32>
    %cst_116 = arith.constant dense<0.000000e+00> : vector<32xf32>
    %160 = vector.multi_reduction <add>, %156, %cst_116 [1] : vector<32x256xf32> to vector<32xf32>
    %161 = vector.shape_cast %160 : vector<32xf32> to vector<32x1xf32>
    %162 = arith.mulf %156, %156 : vector<32x256xf32>
    %cst_117 = arith.constant dense<0.000000e+00> : vector<32xf32>
    %163 = vector.multi_reduction <add>, %162, %cst_117 [1] : vector<32x256xf32> to vector<32xf32>
    %164 = vector.shape_cast %163 : vector<32xf32> to vector<32x1xf32>
    %cst_118 = arith.constant dense<0.000000e+00> : vector<32x1xf32>
    %165 = tpu.matmul %157, %161, %cst_118 {dimension_numbers = #tpu.dot_dimension_numbers<[1], [0], [0], [1], [0, 0, 1, 1], [], []>} : vector<32x32xf32>, vector<32x1xf32>, vector<32x1xf32> -> vector<32x1xf32>
    %cst_119 = arith.constant dense<0.000000e+00> : vector<32x1xf32>
    %166 = tpu.matmul %157, %164, %cst_119 {dimension_numbers = #tpu.dot_dimension_numbers<[1], [0], [0], [1], [0, 0, 1, 1], [], []>} : vector<32x32xf32>, vector<32x1xf32>, vector<32x1xf32> -> vector<32x1xf32>
    %167 = arith.mulf %165, %165 : vector<32x1xf32>
    %168 = arith.subf %166, %167 : vector<32x1xf32>
    %169 = vector.broadcast %165 : vector<32x1xf32> to vector<32x256xf32>
    %170 = arith.subf %156, %169 : vector<32x256xf32>
    %cst_120 = arith.constant 9.99999974E-6 : f32
    %171 = vector.broadcast %cst_120 : f32 to vector<32x1xf32>
    %172 = arith.addf %168, %171 : vector<32x1xf32>
    %173 = math.rsqrt %172 : vector<32x1xf32>
    %174 = vector.broadcast %173 : vector<32x1xf32> to vector<32x256xf32>
    %175 = arith.mulf %170, %174 : vector<32x256xf32>
    %176 = vector.broadcast %158 : vector<32x1xf32> to vector<32x256xf32>
    %177 = arith.mulf %175, %176 : vector<32x256xf32>
    %178 = vector.broadcast %159 : vector<32x1xf32> to vector<32x256xf32>
    %179 = arith.addf %177, %178 : vector<32x256xf32>
    %cst_121 = arith.constant 0.000000e+00 : f32
    %180 = vector.broadcast %cst_121 : f32 to vector<32x256xf32>
    %181 = arith.subf %180, %179 : vector<32x256xf32>
    %182 = math.exp %181 : vector<32x256xf32>
    %cst_122 = arith.constant 1.000000e+00 : f32
    %183 = vector.broadcast %cst_122 : f32 to vector<32x256xf32>
    %184 = arith.addf %183, %182 : vector<32x256xf32>
    %185 = tpu.reciprocal %184 {approx = true} : vector<32x256xf32> -> vector<32x256xf32>
    %186 = arith.mulf %179, %185 : vector<32x256xf32>
    %c0_123 = arith.constant 0 : index
    %c17_124 = arith.constant 17 : index
    %187 = vector.load %arg15[%c0_123, %c17_124] : memref<32x290xf32, #tpu.memory_space<vmem>>, vector<32x256xf32>
    tpu.vector_store %arg15[%c0_123, %c17_124], %186 {strides = array<i32>} : memref<32x290xf32, #tpu.memory_space<vmem>>, vector<32x256xf32>,
    %c0_125 = arith.constant 0 : index
    %c0_126 = arith.constant 0 : index
    %188 = vector.load %arg15[%c0_125, %c0_126] : memref<32x290xf32, #tpu.memory_space<vmem>>, vector<32x256xf32>
    %189 = vector.broadcast %3 : vector<1x256xf32> to vector<32x256xf32>
    %190 = arith.mulf %188, %189 : vector<32x256xf32>
    %191 = arith.truncf %190 : vector<32x256xf32> to vector<32x256xbf16>
    %c0_127 = arith.constant 0 : index
    %c0_128 = arith.constant 0 : index
    %192 = vector.load %arg16[%c0_127, %c0_128] : memref<288x512xbf16, #tpu.memory_space<vmem>>, vector<32x256xbf16>
    tpu.vector_store %arg16[%c0_127, %c0_128], %191 {strides = array<i32>} : memref<288x512xbf16, #tpu.memory_space<vmem>>, vector<32x256xbf16>,
    %c0_129 = arith.constant 0 : index
    %c1_130 = arith.constant 1 : index
    %193 = vector.load %arg15[%c0_129, %c1_130] : memref<32x290xf32, #tpu.memory_space<vmem>>, vector<32x256xf32>
    %194 = arith.truncf %193 : vector<32x256xf32> to vector<32x256xbf16>
    %c32_131 = arith.constant 32 : index
    %c0_132 = arith.constant 0 : index
    %195 = vector.load %arg16[%c32_131, %c0_132] : memref<288x512xbf16, #tpu.memory_space<vmem>>, vector<32x256xbf16>
    tpu.vector_store %arg16[%c32_131, %c0_132], %194 {strides = array<i32>} : memref<288x512xbf16, #tpu.memory_space<vmem>>, vector<32x256xbf16>,
    %c0_133 = arith.constant 0 : index
    %c2_134 = arith.constant 2 : index
    %196 = vector.load %arg15[%c0_133, %c2_134] : memref<32x290xf32, #tpu.memory_space<vmem>>, vector<32x256xf32>
    %197 = vector.broadcast %4 : vector<1x256xf32> to vector<32x256xf32>
    %198 = arith.mulf %196, %197 : vector<32x256xf32>
    %199 = arith.truncf %198 : vector<32x256xf32> to vector<32x256xbf16>
    %c64_135 = arith.constant 64 : index
    %c0_136 = arith.constant 0 : index
    %200 = vector.load %arg16[%c64_135, %c0_136] : memref<288x512xbf16, #tpu.memory_space<vmem>>, vector<32x256xbf16>
    tpu.vector_store %arg16[%c64_135, %c0_136], %199 {strides = array<i32>} : memref<288x512xbf16, #tpu.memory_space<vmem>>, vector<32x256xbf16>,
    %c0_137 = arith.constant 0 : index
    %c16_138 = arith.constant 16 : index
    %201 = vector.load %arg15[%c0_137, %c16_138] : memref<32x290xf32, #tpu.memory_space<vmem>>, vector<32x256xf32>
    %202 = vector.broadcast %3 : vector<1x256xf32> to vector<32x256xf32>
    %203 = arith.mulf %201, %202 : vector<32x256xf32>
    %204 = arith.truncf %203 : vector<32x256xf32> to vector<32x256xbf16>
    %c96_139 = arith.constant 96 : index
    %c0_140 = arith.constant 0 : index
    %205 = vector.load %arg16[%c96_139, %c0_140] : memref<288x512xbf16, #tpu.memory_space<vmem>>, vector<32x256xbf16>
    tpu.vector_store %arg16[%c96_139, %c0_140], %204 {strides = array<i32>} : memref<288x512xbf16, #tpu.memory_space<vmem>>, vector<32x256xbf16>,
    %c0_141 = arith.constant 0 : index
    %c17_142 = arith.constant 17 : index
    %206 = vector.load %arg15[%c0_141, %c17_142] : memref<32x290xf32, #tpu.memory_space<vmem>>, vector<32x256xf32>
    %207 = arith.truncf %206 : vector<32x256xf32> to vector<32x256xbf16>
    %c128_143 = arith.constant 128 : index
    %c0_144 = arith.constant 0 : index
    %208 = vector.load %arg16[%c128_143, %c0_144] : memref<288x512xbf16, #tpu.memory_space<vmem>>, vector<32x256xbf16>
    tpu.vector_store %arg16[%c128_143, %c0_144], %207 {strides = array<i32>} : memref<288x512xbf16, #tpu.memory_space<vmem>>, vector<32x256xbf16>,
    %c0_145 = arith.constant 0 : index
    %c18_146 = arith.constant 18 : index
    %209 = vector.load %arg15[%c0_145, %c18_146] : memref<32x290xf32, #tpu.memory_space<vmem>>, vector<32x256xf32>
    %210 = vector.broadcast %4 : vector<1x256xf32> to vector<32x256xf32>
    %211 = arith.mulf %209, %210 : vector<32x256xf32>
    %212 = arith.truncf %211 : vector<32x256xf32> to vector<32x256xbf16>
    %c160_147 = arith.constant 160 : index
    %c0_148 = arith.constant 0 : index
    %213 = vector.load %arg16[%c160_147, %c0_148] : memref<288x512xbf16, #tpu.memory_space<vmem>>, vector<32x256xbf16>
    tpu.vector_store %arg16[%c160_147, %c0_148], %212 {strides = array<i32>} : memref<288x512xbf16, #tpu.memory_space<vmem>>, vector<32x256xbf16>,
    %c0_149 = arith.constant 0 : index
    %c32_150 = arith.constant 32 : index
    %214 = vector.load %arg15[%c0_149, %c32_150] : memref<32x290xf32, #tpu.memory_space<vmem>>, vector<32x256xf32>
    %215 = vector.broadcast %3 : vector<1x256xf32> to vector<32x256xf32>
    %216 = arith.mulf %214, %215 : vector<32x256xf32>
    %217 = arith.truncf %216 : vector<32x256xf32> to vector<32x256xbf16>
    %c192_151 = arith.constant 192 : index
    %c0_152 = arith.constant 0 : index
    %218 = vector.load %arg16[%c192_151, %c0_152] : memref<288x512xbf16, #tpu.memory_space<vmem>>, vector<32x256xbf16>
    tpu.vector_store %arg16[%c192_151, %c0_152], %217 {strides = array<i32>} : memref<288x512xbf16, #tpu.memory_space<vmem>>, vector<32x256xbf16>,
    %c0_153 = arith.constant 0 : index
    %c33_154 = arith.constant 33 : index
    %219 = vector.load %arg15[%c0_153, %c33_154] : memref<32x290xf32, #tpu.memory_space<vmem>>, vector<32x256xf32>
    %220 = arith.truncf %219 : vector<32x256xf32> to vector<32x256xbf16>
    %c224_155 = arith.constant 224 : index
    %c0_156 = arith.constant 0 : index
    %221 = vector.load %arg16[%c224_155, %c0_156] : memref<288x512xbf16, #tpu.memory_space<vmem>>, vector<32x256xbf16>
    tpu.vector_store %arg16[%c224_155, %c0_156], %220 {strides = array<i32>} : memref<288x512xbf16, #tpu.memory_space<vmem>>, vector<32x256xbf16>,
    %c0_157 = arith.constant 0 : index
    %c34_158 = arith.constant 34 : index
    %222 = vector.load %arg15[%c0_157, %c34_158] : memref<32x290xf32, #tpu.memory_space<vmem>>, vector<32x256xf32>
    %223 = vector.broadcast %4 : vector<1x256xf32> to vector<32x256xf32>
    %224 = arith.mulf %222, %223 : vector<32x256xf32>
    %225 = arith.truncf %224 : vector<32x256xf32> to vector<32x256xbf16>
    %c256_159 = arith.constant 256 : index
    %c0_160 = arith.constant 0 : index
    %226 = vector.load %arg16[%c256_159, %c0_160] : memref<288x512xbf16, #tpu.memory_space<vmem>>, vector<32x256xbf16>
    tpu.vector_store %arg16[%c256_159, %c0_160], %225 {strides = array<i32>} : memref<288x512xbf16, #tpu.memory_space<vmem>>, vector<32x256xbf16>,
    %c0_161 = arith.constant 0 : index
    %c256_162 = arith.constant 256 : index
    %227 = vector.load %arg17[%c0_161, %c256_162] : memref<32x512xf32, #tpu.memory_space<vmem>>, vector<32x256xf32>
    %c0_163 = arith.constant 0 : index
    %c0_164 = arith.constant 0 : index
    %228 = vector.load %arg9[%c0_163, %c0_164] : memref<32x32xf32, #tpu.memory_space<vmem>>, vector<32x32xf32>
    %c0_165 = arith.constant 0 : index
    %c0_166 = arith.constant 0 : index
    %229 = vector.load %arg7[%c0_165, %c0_166] : memref<32x1xf32, #tpu.memory_space<vmem>>, vector<32x1xf32>
    %c0_167 = arith.constant 0 : index
    %c0_168 = arith.constant 0 : index
    %230 = vector.load %arg8[%c0_167, %c0_168] : memref<32x1xf32, #tpu.memory_space<vmem>>, vector<32x1xf32>
    %cst_169 = arith.constant dense<0.000000e+00> : vector<32xf32>
    %231 = vector.multi_reduction <add>, %227, %cst_169 [1] : vector<32x256xf32> to vector<32xf32>
    %232 = vector.shape_cast %231 : vector<32xf32> to vector<32x1xf32>
    %233 = arith.mulf %227, %227 : vector<32x256xf32>
    %cst_170 = arith.constant dense<0.000000e+00> : vector<32xf32>
    %234 = vector.multi_reduction <add>, %233, %cst_170 [1] : vector<32x256xf32> to vector<32xf32>
    %235 = vector.shape_cast %234 : vector<32xf32> to vector<32x1xf32>
    %cst_171 = arith.constant dense<0.000000e+00> : vector<32x1xf32>
    %236 = tpu.matmul %228, %232, %cst_171 {dimension_numbers = #tpu.dot_dimension_numbers<[1], [0], [0], [1], [0, 0, 1, 1], [], []>} : vector<32x32xf32>, vector<32x1xf32>, vector<32x1xf32> -> vector<32x1xf32>
    %cst_172 = arith.constant dense<0.000000e+00> : vector<32x1xf32>
    %237 = tpu.matmul %228, %235, %cst_172 {dimension_numbers = #tpu.dot_dimension_numbers<[1], [0], [0], [1], [0, 0, 1, 1], [], []>} : vector<32x32xf32>, vector<32x1xf32>, vector<32x1xf32> -> vector<32x1xf32>
    %238 = arith.mulf %236, %236 : vector<32x1xf32>
    %239 = arith.subf %237, %238 : vector<32x1xf32>
    %240 = vector.broadcast %236 : vector<32x1xf32> to vector<32x256xf32>
    %241 = arith.subf %227, %240 : vector<32x256xf32>
    %cst_173 = arith.constant 9.99999974E-6 : f32
    %242 = vector.broadcast %cst_173 : f32 to vector<32x1xf32>
    %243 = arith.addf %239, %242 : vector<32x1xf32>
    %244 = math.rsqrt %243 : vector<32x1xf32>
    %245 = vector.broadcast %244 : vector<32x1xf32> to vector<32x256xf32>
    %246 = arith.mulf %241, %245 : vector<32x256xf32>
    %247 = vector.broadcast %229 : vector<32x1xf32> to vector<32x256xf32>
    %248 = arith.mulf %246, %247 : vector<32x256xf32>
    %249 = vector.broadcast %230 : vector<32x1xf32> to vector<32x256xf32>
    %250 = arith.addf %248, %249 : vector<32x256xf32>
    %cst_174 = arith.constant 0.000000e+00 : f32
    %251 = vector.broadcast %cst_174 : f32 to vector<32x256xf32>
    %252 = arith.subf %251, %250 : vector<32x256xf32>
    %253 = math.exp %252 : vector<32x256xf32>
    %cst_175 = arith.constant 1.000000e+00 : f32
    %254 = vector.broadcast %cst_175 : f32 to vector<32x256xf32>
    %255 = arith.addf %254, %253 : vector<32x256xf32>
    %256 = tpu.reciprocal %255 {approx = true} : vector<32x256xf32> -> vector<32x256xf32>
    %257 = arith.mulf %250, %256 : vector<32x256xf32>
    %c0_176 = arith.constant 0 : index
    %c17_177 = arith.constant 17 : index
    %258 = vector.load %arg15[%c0_176, %c17_177] : memref<32x290xf32, #tpu.memory_space<vmem>>, vector<32x256xf32>
    tpu.vector_store %arg15[%c0_176, %c17_177], %257 {strides = array<i32>} : memref<32x290xf32, #tpu.memory_space<vmem>>, vector<32x256xf32>,
    %c0_178 = arith.constant 0 : index
    %c0_179 = arith.constant 0 : index
    %259 = vector.load %arg15[%c0_178, %c0_179] : memref<32x290xf32, #tpu.memory_space<vmem>>, vector<32x256xf32>
    %260 = vector.broadcast %3 : vector<1x256xf32> to vector<32x256xf32>
    %261 = arith.mulf %259, %260 : vector<32x256xf32>
    %262 = arith.truncf %261 : vector<32x256xf32> to vector<32x256xbf16>
    %c0_180 = arith.constant 0 : index
    %c256_181 = arith.constant 256 : index
    %263 = vector.load %arg16[%c0_180, %c256_181] : memref<288x512xbf16, #tpu.memory_space<vmem>>, vector<32x256xbf16>
    tpu.vector_store %arg16[%c0_180, %c256_181], %262 {strides = array<i32>} : memref<288x512xbf16, #tpu.memory_space<vmem>>, vector<32x256xbf16>,
    %c0_182 = arith.constant 0 : index
    %c1_183 = arith.constant 1 : index
    %264 = vector.load %arg15[%c0_182, %c1_183] : memref<32x290xf32, #tpu.memory_space<vmem>>, vector<32x256xf32>
    %265 = arith.truncf %264 : vector<32x256xf32> to vector<32x256xbf16>
    %c32_184 = arith.constant 32 : index
    %c256_185 = arith.constant 256 : index
    %266 = vector.load %arg16[%c32_184, %c256_185] : memref<288x512xbf16, #tpu.memory_space<vmem>>, vector<32x256xbf16>
    tpu.vector_store %arg16[%c32_184, %c256_185], %265 {strides = array<i32>} : memref<288x512xbf16, #tpu.memory_space<vmem>>, vector<32x256xbf16>,
    %c0_186 = arith.constant 0 : index
    %c2_187 = arith.constant 2 : index
    %267 = vector.load %arg15[%c0_186, %c2_187] : memref<32x290xf32, #tpu.memory_space<vmem>>, vector<32x256xf32>
    %268 = vector.broadcast %4 : vector<1x256xf32> to vector<32x256xf32>
    %269 = arith.mulf %267, %268 : vector<32x256xf32>
    %270 = arith.truncf %269 : vector<32x256xf32> to vector<32x256xbf16>
    %c64_188 = arith.constant 64 : index
    %c256_189 = arith.constant 256 : index
    %271 = vector.load %arg16[%c64_188, %c256_189] : memref<288x512xbf16, #tpu.memory_space<vmem>>, vector<32x256xbf16>
    tpu.vector_store %arg16[%c64_188, %c256_189], %270 {strides = array<i32>} : memref<288x512xbf16, #tpu.memory_space<vmem>>, vector<32x256xbf16>,
    %c0_190 = arith.constant 0 : index
    %c16_191 = arith.constant 16 : index
    %272 = vector.load %arg15[%c0_190, %c16_191] : memref<32x290xf32, #tpu.memory_space<vmem>>, vector<32x256xf32>
    %273 = vector.broadcast %3 : vector<1x256xf32> to vector<32x256xf32>
    %274 = arith.mulf %272, %273 : vector<32x256xf32>
    %275 = arith.truncf %274 : vector<32x256xf32> to vector<32x256xbf16>
    %c96_192 = arith.constant 96 : index
    %c256_193 = arith.constant 256 : index
    %276 = vector.load %arg16[%c96_192, %c256_193] : memref<288x512xbf16, #tpu.memory_space<vmem>>, vector<32x256xbf16>
    tpu.vector_store %arg16[%c96_192, %c256_193], %275 {strides = array<i32>} : memref<288x512xbf16, #tpu.memory_space<vmem>>, vector<32x256xbf16>,
    %c0_194 = arith.constant 0 : index
    %c17_195 = arith.constant 17 : index
    %277 = vector.load %arg15[%c0_194, %c17_195] : memref<32x290xf32, #tpu.memory_space<vmem>>, vector<32x256xf32>
    %278 = arith.truncf %277 : vector<32x256xf32> to vector<32x256xbf16>
    %c128_196 = arith.constant 128 : index
    %c256_197 = arith.constant 256 : index
    %279 = vector.load %arg16[%c128_196, %c256_197] : memref<288x512xbf16, #tpu.memory_space<vmem>>, vector<32x256xbf16>
    tpu.vector_store %arg16[%c128_196, %c256_197], %278 {strides = array<i32>} : memref<288x512xbf16, #tpu.memory_space<vmem>>, vector<32x256xbf16>,
    %c0_198 = arith.constant 0 : index
    %c18_199 = arith.constant 18 : index
    %280 = vector.load %arg15[%c0_198, %c18_199] : memref<32x290xf32, #tpu.memory_space<vmem>>, vector<32x256xf32>
    %281 = vector.broadcast %4 : vector<1x256xf32> to vector<32x256xf32>
    %282 = arith.mulf %280, %281 : vector<32x256xf32>
    %283 = arith.truncf %282 : vector<32x256xf32> to vector<32x256xbf16>
    %c160_200 = arith.constant 160 : index
    %c256_201 = arith.constant 256 : index
    %284 = vector.load %arg16[%c160_200, %c256_201] : memref<288x512xbf16, #tpu.memory_space<vmem>>, vector<32x256xbf16>
    tpu.vector_store %arg16[%c160_200, %c256_201], %283 {strides = array<i32>} : memref<288x512xbf16, #tpu.memory_space<vmem>>, vector<32x256xbf16>,
    %c0_202 = arith.constant 0 : index
    %c32_203 = arith.constant 32 : index
    %285 = vector.load %arg15[%c0_202, %c32_203] : memref<32x290xf32, #tpu.memory_space<vmem>>, vector<32x256xf32>
    %286 = vector.broadcast %3 : vector<1x256xf32> to vector<32x256xf32>
    %287 = arith.mulf %285, %286 : vector<32x256xf32>
    %288 = arith.truncf %287 : vector<32x256xf32> to vector<32x256xbf16>
    %c192_204 = arith.constant 192 : index
    %c256_205 = arith.constant 256 : index
    %289 = vector.load %arg16[%c192_204, %c256_205] : memref<288x512xbf16, #tpu.memory_space<vmem>>, vector<32x256xbf16>
    tpu.vector_store %arg16[%c192_204, %c256_205], %288 {strides = array<i32>} : memref<288x512xbf16, #tpu.memory_space<vmem>>, vector<32x256xbf16>,
    %c0_206 = arith.constant 0 : index
    %c33_207 = arith.constant 33 : index
    %290 = vector.load %arg15[%c0_206, %c33_207] : memref<32x290xf32, #tpu.memory_space<vmem>>, vector<32x256xf32>
    %291 = arith.truncf %290 : vector<32x256xf32> to vector<32x256xbf16>
    %c224_208 = arith.constant 224 : index
    %c256_209 = arith.constant 256 : index
    %292 = vector.load %arg16[%c224_208, %c256_209] : memref<288x512xbf16, #tpu.memory_space<vmem>>, vector<32x256xbf16>
    tpu.vector_store %arg16[%c224_208, %c256_209], %291 {strides = array<i32>} : memref<288x512xbf16, #tpu.memory_space<vmem>>, vector<32x256xbf16>,
    %c0_210 = arith.constant 0 : index
    %c34_211 = arith.constant 34 : index
    %293 = vector.load %arg15[%c0_210, %c34_211] : memref<32x290xf32, #tpu.memory_space<vmem>>, vector<32x256xf32>
    %294 = vector.broadcast %4 : vector<1x256xf32> to vector<32x256xf32>
    %295 = arith.mulf %293, %294 : vector<32x256xf32>
    %296 = arith.truncf %295 : vector<32x256xf32> to vector<32x256xbf16>
    %c256_212 = arith.constant 256 : index
    %c256_213 = arith.constant 256 : index
    %297 = vector.load %arg16[%c256_212, %c256_213] : memref<288x512xbf16, #tpu.memory_space<vmem>>, vector<32x256xbf16>
    tpu.vector_store %arg16[%c256_212, %c256_213], %296 {strides = array<i32>} : memref<288x512xbf16, #tpu.memory_space<vmem>>, vector<32x256xbf16>,
    %c0_214 = arith.constant 0 : index
    %c0_215 = arith.constant 0 : index
    %298 = vector.load %arg10[%c0_214, %c0_215] : memref<32x288xbf16, #tpu.memory_space<vmem>>, vector<32x288xbf16>
    %c0_216 = arith.constant 0 : index
    %c0_217 = arith.constant 0 : index
    %299 = vector.load %arg16[%c0_216, %c0_217] : memref<288x512xbf16, #tpu.memory_space<vmem>>, vector<288x512xbf16>
    %cst_218 = arith.constant dense<0.000000e+00> : vector<32x512xf32>
    %300 = tpu.matmul %298, %299, %cst_218 {dimension_numbers = #tpu.dot_dimension_numbers<[1], [0], [0], [1], [0, 0, 1, 1], [], []>} : vector<32x288xbf16>, vector<288x512xbf16>, vector<32x512xf32> -> vector<32x512xf32>
    %c0_219 = arith.constant 0 : index
    %c0_220 = arith.constant 0 : index
    %301 = vector.load %arg11[%c0_219, %c0_220] : memref<32x1xf32, #tpu.memory_space<vmem>>, vector<32x1xf32>
    %302 = vector.broadcast %301 : vector<32x1xf32> to vector<32x512xf32>
    %303 = arith.addf %300, %302 : vector<32x512xf32>
    %c0_221 = arith.constant 0 : index
    %c0_222 = arith.constant 0 : index
    %304 = vector.load %arg17[%c0_221, %c0_222] : memref<32x512xf32, #tpu.memory_space<vmem>>, vector<32x512xf32>
    tpu.vector_store %arg17[%c0_221, %c0_222], %303 {strides = array<i32>} : memref<32x512xf32, #tpu.memory_space<vmem>>, vector<32x512xf32>,
    %c0_223 = arith.constant 0 : index
    %c0_224 = arith.constant 0 : index
    %305 = vector.load %arg17[%c0_223, %c0_224] : memref<32x512xf32, #tpu.memory_space<vmem>>, vector<32x256xf32>
    %c0_225 = arith.constant 0 : index
    %c0_226 = arith.constant 0 : index
    %c0_227 = arith.constant 0 : index
    %306 = vector.load %arg1[%c0_225, %c0_226, %c0_227] : memref<2x32x256xf32, #tpu.memory_space<vmem>>, vector<1x32x256xf32>
    %307 = vector.shape_cast %306 : vector<1x32x256xf32> to vector<32x256xf32>
    %308 = arith.addf %305, %307 : vector<32x256xf32>
    %c0_228 = arith.constant 0 : index
    %c0_229 = arith.constant 0 : index
    %c0_230 = arith.constant 0 : index
    %309 = vector.load %arg14[%c0_228, %c0_229, %c0_230] : memref<2x32x256xf32, #tpu.memory_space<vmem>>, vector<1x32x256xf32>
    %310 = vector.shape_cast %309 : vector<1x32x256xf32> to vector<32x256xf32>
    %311 = vector.shape_cast %308 : vector<32x256xf32> to vector<1x32x256xf32>
    tpu.vector_store %arg14[%c0_228, %c0_229, %c0_230], %311 {strides = array<i32>} : memref<2x32x256xf32, #tpu.memory_space<vmem>>, vector<1x32x256xf32>,
    %c0_231 = arith.constant 0 : index
    %c256_232 = arith.constant 256 : index
    %312 = vector.load %arg17[%c0_231, %c256_232] : memref<32x512xf32, #tpu.memory_space<vmem>>, vector<32x256xf32>
    %c1_233 = arith.constant 1 : index
    %c0_234 = arith.constant 0 : index
    %c0_235 = arith.constant 0 : index
    %313 = vector.load %arg1[%c1_233, %c0_234, %c0_235] : memref<2x32x256xf32, #tpu.memory_space<vmem>>, vector<1x32x256xf32>
    %314 = vector.shape_cast %313 : vector<1x32x256xf32> to vector<32x256xf32>
    %315 = arith.addf %312, %314 : vector<32x256xf32>
    %c1_236 = arith.constant 1 : index
    %c0_237 = arith.constant 0 : index
    %c0_238 = arith.constant 0 : index
    %316 = vector.load %arg14[%c1_236, %c0_237, %c0_238] : memref<2x32x256xf32, #tpu.memory_space<vmem>>, vector<1x32x256xf32>
    %317 = vector.shape_cast %316 : vector<1x32x256xf32> to vector<32x256xf32>
    %318 = vector.shape_cast %315 : vector<32x256xf32> to vector<1x32x256xf32>
    tpu.vector_store %arg14[%c1_236, %c0_237, %c0_238], %318 {strides = array<i32>} : memref<2x32x256xf32, #tpu.memory_space<vmem>>, vector<1x32x256xf32>,
    return
  }
  func.func @transform_0(%arg0: i32) -> (i32, i32, i32) {
    %c0_i32 = arith.constant 0 : i32
    %c0_i32_0 = arith.constant 0 : i32
    %c0_i32_1 = arith.constant 0 : i32
    return %arg0, %c0_i32, %c0_i32_0 : i32, i32, i32
  }
  func.func @transform_1(%arg0: i32) -> (i32, i32) {
    %c0_i32 = arith.constant 0 : i32
    %c0_i32_0 = arith.constant 0 : i32
    %c0_i32_1 = arith.constant 0 : i32
    return %c0_i32, %c0_i32_0 : i32, i32
  }
  func.func @transform_2(%arg0: i32) -> (i32, i32) {
    %c0_i32 = arith.constant 0 : i32
    %c0_i32_0 = arith.constant 0 : i32
    %c0_i32_1 = arith.constant 0 : i32
    return %c0_i32, %c0_i32_0 : i32, i32
  }
  func.func @transform_3(%arg0: i32) -> (i32, i32) {
    %c0_i32 = arith.constant 0 : i32
    %c0_i32_0 = arith.constant 0 : i32
    %c0_i32_1 = arith.constant 0 : i32
    return %c0_i32, %c0_i32_0 : i32, i32
  }
  func.func @transform_4(%arg0: i32) -> (i32, i32) {
    %c0_i32 = arith.constant 0 : i32
    %c0_i32_0 = arith.constant 0 : i32
    %c0_i32_1 = arith.constant 0 : i32
    return %c0_i32, %c0_i32_0 : i32, i32
  }
  func.func @transform_5(%arg0: i32) -> (i32, i32) {
    %c0_i32 = arith.constant 0 : i32
    %c0_i32_0 = arith.constant 0 : i32
    %c0_i32_1 = arith.constant 0 : i32
    return %c0_i32, %c0_i32_0 : i32, i32
  }
  func.func @transform_6(%arg0: i32) -> (i32, i32) {
    %c0_i32 = arith.constant 0 : i32
    %c0_i32_0 = arith.constant 0 : i32
    %c0_i32_1 = arith.constant 0 : i32
    return %c0_i32, %c0_i32_0 : i32, i32
  }
  func.func @transform_7(%arg0: i32) -> (i32, i32) {
    %c0_i32 = arith.constant 0 : i32
    %c0_i32_0 = arith.constant 0 : i32
    %c0_i32_1 = arith.constant 0 : i32
    return %c0_i32, %c0_i32_0 : i32, i32
  }
  func.func @transform_8(%arg0: i32) -> (i32, i32) {
    %c0_i32 = arith.constant 0 : i32
    %c0_i32_0 = arith.constant 0 : i32
    %c0_i32_1 = arith.constant 0 : i32
    return %c0_i32, %c0_i32_0 : i32, i32
  }
  func.func @transform_9(%arg0: i32) -> (i32, i32) {
    %c0_i32 = arith.constant 0 : i32
    %c0_i32_0 = arith.constant 0 : i32
    %c0_i32_1 = arith.constant 0 : i32
    return %c0_i32, %c0_i32_0 : i32, i32
  }
  func.func @transform_10(%arg0: i32) -> (i32, i32) {
    %c0_i32 = arith.constant 0 : i32
    %c0_i32_0 = arith.constant 0 : i32
    %c0_i32_1 = arith.constant 0 : i32
    return %c0_i32, %c0_i32_0 : i32, i32
  }
  func.func @transform_11(%arg0: i32) -> (i32, i32) {
    %c0_i32 = arith.constant 0 : i32
    %c0_i32_0 = arith.constant 0 : i32
    %c0_i32_1 = arith.constant 0 : i32
    return %c0_i32, %c0_i32_0 : i32, i32
  }
  func.func @transform_12(%arg0: i32) -> (i32, i32) {
    %c0_i32 = arith.constant 0 : i32
    %c0_i32_0 = arith.constant 0 : i32
    %c0_i32_1 = arith.constant 0 : i32
    return %c0_i32, %c0_i32_0 : i32, i32
  }
  func.func @transform_13(%arg0: i32) -> (i32, i32, i32) {
    %c0_i32 = arith.constant 0 : i32
    %c0_i32_0 = arith.constant 0 : i32
    %c0_i32_1 = arith.constant 0 : i32
    return %arg0, %c0_i32, %c0_i32_0 : i32, i32, i32
  }
}

</mosaic_0001>

<bundles_post_ra>
// kernel: tpu_custom_call.1
= control target key start
LH: loop header
LB: loop body
LE: loop exit
PB: predicated region body
PF: predicated region fallthrough
CT: control target
= control target key end

     0   :  { %18 = vsyncpa [#allocation6], 0  ;;  %s8179_s0 = inlined_call_operand.vmem [shape: f32[2,32,256], index: 0, kind: input, shape index: {}]   ;;  %s8180_s1 = inlined_call_operand.vmem [shape: f32[32,1], index: 1, kind: input, shape index: {}]   ;;  %s8181_s2 = inlined_call_operand.vmem [shape: f32[32,1], index: 2, kind: input, shape index: {}]   ;;  %s8182_s3 = inlined_call_operand.hbm [shape: f32[32,32], index: 3, kind: input, shape index: {}]   ;;  %s8183_s4 = inlined_call_operand.vmem [shape: bf16[32,288], index: 4, kind: input, shape index: {}]   ;;  %s8184_s5 = inlined_call_operand.vmem [shape: f32[32,1], index: 5, kind: input, shape index: {}]   ;;  %s8185_s6 = inlined_call_operand.vmem [shape: f32[32,1], index: 6, kind: input, shape index: {}]   ;;  %s8186_s7 = inlined_call_operand.vmem [shape: f32[32,1], index: 7, kind: input, shape index: {}]   ;;  %s8187_s8 = inlined_call_operand.hbm [shape: f32[32,32], index: 8, kind: input, shape index: {}]   ;;  %s8188_s9 = inlined_call_operand.vmem [shape: bf16[32,288], index: 9, kind: input, shape index: {}]   ;;  %s8189_s10 = inlined_call_operand.vmem [shape: f32[32,1], index: 10, kind: input, shape index: {}]   ;;  %s8190_s11 = inlined_call_operand.vmem [shape: f32[1,256], index: 11, kind: input, shape index: {}]   ;;  %s8191_s12 = inlined_call_operand.vmem [shape: f32[1,256], index: 12, kind: input, shape index: {}]   ;;  %s8192_s13 = inlined_call_operand.hbm [shape: f32[2,32,256], index: 13, kind: output, shape index: {}]  }
   0x1   :  { %19 = vsyncpa [#allocation9], 0 }
   0x2   :  { %20 = vsyncpa [#allocation7], 0  ;;  %s5344_s25 = smov [#allocation5]   ;;  %s5272_s29 = scalar_lea.hbm %s8182_s3, 512 }
   0x3   :  { %s32_s26 = sshll.u32 %s5344_s25, 4  ;;  %p5273_p0 = scmp.ne.s32.totalorder %s8182_s3, %s5272_s29  ;;  %s33_s26 = int_to_ptr.vmem [resolvable:$true] %s32_s26 }
   0x4   :  { %p5276_p1 = scmp.lt.u32.totalorder %s5272_s29, %s8182_s3 }
   0x6   :  { %p5278_p2 = pnand %p5276_p1, %p5273_p0 }
   0x8   :  { %5281 = shalt.err (!%p5278_p2)
}
   0x9   :  { %s5282_s17 = scalar_lea.vmem %s33_s26, 512  ;;  %p5287_p4 = scmp.lt.s32.totalorder %s33_s26, %s33_s26 }
   0xa   :  { %p5283_p3 = scmp.ne.s32.totalorder %s33_s26, %s5282_s17  ;;  %p5288_p5 = scmp.lt.s32.totalorder %s5282_s17, %s5282_s17 }
   0xc   :  { %p5289_p6 = por %p5288_p5, %p5287_p4 }
   0xe   :  { %p5290_p7 = pnand %p5289_p6, %p5283_p3 }
  0x10   :  { %5293 = shalt.err (!%p5290_p7)
}
  0x11   :  { %s5345_s18 = smov 128   ;;  %s5346_s19 = smov 8  }
  0x12   :  { %38 = dma.hbm_to_vmem [thread:$0]  %s8182_s3, 512, %s33_s26, [#allocation6], %s5345_s18, %s5345_s18, %s5346_s19  }
  0x13   :  { %s5347_s22 = smov [#allocation8]   ;;  %s5294_s27 = scalar_lea.hbm %s8187_s8, 512 }
  0x14   :  { %s52_s23 = sshll.u32 %s5347_s22, 4  ;;  %p5295_p8 = scmp.ne.s32.totalorder %s8187_s8, %s5294_s27  ;;  %s53_s23 = int_to_ptr.vmem [resolvable:$true] %s52_s23 }
  0x15   :  { %p5298_p9 = scmp.lt.u32.totalorder %s5294_s27, %s8187_s8 }
  0x17   :  { %p5300_p10 = pnand %p5298_p9, %p5295_p8 }
  0x19   :  { %5303 = shalt.err (!%p5300_p10)
}
  0x1a   :  { %s5304_s15 = scalar_lea.vmem %s53_s23, 512  ;;  %p5309_p12 = scmp.lt.s32.totalorder %s53_s23, %s53_s23 }
  0x1b   :  { %p5305_p11 = scmp.ne.s32.totalorder %s53_s23, %s5304_s15  ;;  %p5310_p13 = scmp.lt.s32.totalorder %s5304_s15, %s5304_s15 }
  0x1d   :  { %p5311_p0 = por %p5310_p13, %p5309_p12 }
  0x1f   :  { %p5312_p1 = pnand %p5311_p0, %p5305_p11 }
  0x21   :  { %5315 = shalt.err (!%p5312_p1)
}
  0x22   :  { %58 = dma.hbm_to_vmem [thread:$0]  %s8187_s8, 512, %s53_s23, [#allocation9], %s5345_s18, %s5345_s18, %s5346_s19  }
  0x23   :  { %5338 = dma.done.wait [#allocation6], 512  }
  0x24   :  { %5339 = vsyncadd [#allocation6], 4294966784 }
  0x25   :  { %5340 = dma.done.wait [#allocation9], 512  }
  0x26   :  { %5341 = vsyncadd [#allocation9], 4294966784  ;;  %v5463_v0 = vld [vmem:[%s8179_s0 + $0x30] sm:$0xff]  ;;  %v5468_v1 = vld [vmem:[%s8179_s0 + $0x38] sm:$0xff]  ;;  %vm138_vm0 = vcmask 261120   ;;  %v8193_v50 = vmov 0   ;;  %v559_v57 = vlaneseq }
  0x27   :  { %v5473_v2 = vld [vmem:[%s8179_s0] sm:$0xff]  ;;  %v115_v3 = vadd.f32 %v5468_v1, %v5463_v0  ;;  %v5480_v4 = vld [vmem:[%s8179_s0 + $0x8] sm:$0xff]  ;;  %v5487_v6 = vld [vmem:[%s8179_s0 + $0x10] sm:$0xff]  ;;  %v124_v17 = vmul.f32 %v5463_v0, %v5463_v0  ;;  %v125_v18 = vmul.f32 %v5468_v1, %v5468_v1  ;;  %5094 = vset.pattern.permute.xlu1 %v8193_v50  ;;  %5095 = vset.pattern.permute.xlu0 %v8193_v50  ;;  %s5350_s29 = smov 16   ;;  %s5353_s30 = smov 34   ;;  %vm74_vm1 = vcmask 138240  }
  0x28   :  { %v118_v5 = vmul.f32 %v5473_v2, %v5473_v2  ;;  %v5492_v7 = vld [vmem:[%s8179_s0 + $0x18] sm:$0xff]  ;;  %v106_v8 = vadd.f32 %v5480_v4, %v5473_v2  ;;  %v119_v9 = vmul.f32 %v5480_v4, %v5480_v4  ;;  %v120_v10 = vmul.f32 %v5487_v6, %v5487_v6  ;;  %v5507_v14 = vld [vmem:[%s8179_s0 + $0x20] sm:$0xff]  ;;  %v5512_v15 = vld [vmem:[%s8179_s0 + $0x28] sm:$0xff]  ;;  %s5355_s14 = smov 17   ;;  %s5356_s15 = smov 127  }
  0x29   :  { %116 = vadd.xlane.f32.xlu1 %v115_v3  ;;  %v121_v11 = vmul.f32 %v5492_v7, %v5492_v7  ;;  %v109_v13 = vadd.f32 %v5492_v7, %v5487_v6  ;;  %v112_v19 = vadd.f32 %v5512_v15, %v5507_v14  ;;  %v122_v20 = vmul.f32 %v5507_v14, %v5507_v14  ;;  %v5527_v24 = vld [vmem:[%s8179_s0 + $0x50] sm:$0xff]  ;;  %v5532_v25 = vld [vmem:[%s8179_s0 + $0x58] sm:$0xff]  ;;  %v5537_v26 = vld [vmem:[%s8179_s0 + $0x40] sm:$0xff]  ;;  %s5357_s3 = smov 111   ;;  %s5358_s26 = smov 95  }
  0x2a   :  { %107 = vadd.xlane.f32.xlu0 %v106_v8  ;;  %v126_v12 = vadd.f32 %v119_v9, %v118_v5  ;;  %v123_v21 = vmul.f32 %v5512_v15, %v5512_v15  ;;  %v135_v22 = vadd.f32 %v125_v18, %v124_v17  ;;  %v5542_v27 = vld [vmem:[%s8179_s0 + $0x48] sm:$0xff]  ;;  %v1114_v28 = vadd.f32 %v5532_v25, %v5527_v24  ;;  %v5559_v36 = vld [vmem:[%s8179_s0 + $0x70] sm:$0xff]  ;;  %v5564_v37 = vld [vmem:[%s8179_s0 + $0x78] sm:$0xff]  ;;  %s5359_s16 = smov 126   ;;  %s5360_s17 = smov 112  }
  0x2b   :  { %v129_v16 = vadd.f32 %v121_v11, %v120_v10  ;;  %v1125_v29 = vmul.f32 %v5527_v24, %v5527_v24  ;;  %v1126_v30 = vmul.f32 %v5532_v25, %v5532_v25  ;;  %v1111_v31 = vadd.f32 %v5542_v27, %v5537_v26  ;;  %v5569_v38 = vld [vmem:[%s8179_s0 + $0x60] sm:$0xff]  ;;  %v5574_v39 = vld [vmem:[%s8179_s0 + $0x68] sm:$0xff]  ;;  %v101_v53 = vld [vmem:[%s8180_s1 + $0x18] sm:$0xff]  ;;  %s5361_s20 = smov 110   ;;  %s5362_s21 = smov 96  }
  0x2c   :  { %v132_v23 = vadd.f32 %v123_v21, %v122_v20  ;;  %v1123_v32 = vmul.f32 %v5537_v26, %v5537_v26  ;;  %v1124_v33 = vmul.f32 %v5542_v27, %v5542_v27  ;;  %v1120_v40 = vadd.f32 %v5564_v37, %v5559_v36  ;;  %v5588_v48 = vld [vmem:[#allocation5] sm:$0xff]  ;;  %v103_v51 = vld [vmem:[%s8181_s2 + $0x8] sm:$0xff]  ;;  %v105_v55 = vld [vmem:[%s8181_s2 + $0x18] sm:$0xff]  ;;  %s5363_s8 = smov 94   ;;  %s5364_s23 = smov [#allocation10]  }
  0x2d   :  { %127 = vadd.xlane.f32.xlu1 %v126_v12  ;;  %v1134_v34 = vadd.f32 %v1126_v30, %v1125_v29  ;;  %v1129_v41 = vmul.f32 %v5559_v36, %v5559_v36  ;;  %v1130_v42 = vmul.f32 %v5564_v37, %v5564_v37  ;;  %v1117_v43 = vadd.f32 %v5574_v39, %v5569_v38  ;;  %v98_v49 = vld [vmem:[%s8180_s1] sm:$0xff]  ;;  %v99_v52 = vld [vmem:[%s8180_s1 + $0x8] sm:$0xff]  ;;  %v100_v56 = vld [vmem:[%s8180_s1 + $0x10] sm:$0xff] }
  0x2e   :  { %110 = vadd.xlane.f32.xlu0 %v109_v13  ;;  %v1131_v35 = vadd.f32 %v1124_v33, %v1123_v32  ;;  %v1127_v44 = vmul.f32 %v5569_v38, %v5569_v38  ;;  %v1128_v45 = vmul.f32 %v5574_v39, %v5574_v39  ;;  %4840 = vmatprep.mubr.msk.f32.mxu0 %vm138_vm0, %v5588_v48  ;;  %v102_v54 = vld [vmem:[%s8181_s2] sm:$0xff]  ;;  %v104_v58 = vld [vmem:[%s8181_s2 + $0x10] sm:$0xff]  ;;  %v560_v59 = vshrl.u32 %v559_v57, 7  ;;  %s5349_s2 = smov 2   ;;  %v97_v32 = vld [vmem:[#allocation5 + $0x18] sm:$0xff] }
  0x2f   :  { %v1140_v46 = vadd.f32 %v1130_v42, %v1129_v41  ;;  %4854 = vmatprep.mubr.msk.f32.mxu1 %vm138_vm0, %v5588_v48  ;;  %v85_v61 = vld [vmem:[%s8191_s12] sm:$0x3]  ;;  %v96_v29 = vld [vmem:[#allocation5 + $0x10] sm:$0xff]  ;;  %s5352_s12 = smov 32   ;;  %vm79_vm2 = vcmask 277640   ;;  %vm537_vm3 = vcmask 1047688  }
  0x30   :  { %v1137_v47 = vadd.f32 %v1128_v45, %v1127_v44  ;;  %v565_v60 = vsub.s32 1, %v560_v59  ;;  %v84_v63 = vld [vmem:[%s8190_s11] sm:$0x3]  ;;  %v561_v3 = vsub.s32 0, %v560_v59  ;;  %s5351_s11 = smov 18   ;;  %vm659_vm4 = vcmask 15360  }
  0x31   :  { %130 = vadd.xlane.f32.xlu1 %v129_v16  ;;  %vm729_vm5 = vcmask 130048   ;;  %vm848_vm6 = vcmask 146432   ;;  %vm1036_vm7 = vcmask 277504   ;;  %vm621_vm8 = vcmask 1039360  }
  0x32   :  { %113 = vadd.xlane.f32.xlu0 %v112_v19  ;;  %v5623_v62 = vrot.slane %v85_v61, %v565_v60  ;;  %v5629_v5 = vrot.slane %v84_v63, %v565_v60  ;;  %v5631_v8 = vrot.slane %v85_v61, %v561_v3  ;;  %v5636_v9 = vrot.slane %v84_v63, %v561_v3 }
  0x33   :  { %vm700_vm9 = vcmask 1031168   ;;  %vm770_vm10 = vcmask 916480   ;;  %vm819_vm11 = vcmask 908288   ;;  %vm889_vm12 = vcmask 900096  }
  0x34   :  { %8272 = vst [vmem:[#allocation14_spill] sm:$0xff] %v5629_v5  ;;  %8273 = vst [vmem:[#allocation15_spill] sm:$0xff] %v5636_v9  ;;  %vm958_vm13 = vcmask 785408   ;;  %vm1007_vm14 = vcmask 777216   ;;  %vm1077_vm15 = vcmask 769024  }
  0x35   :  { %136 = vadd.xlane.f32.xlu1 %v135_v22 }
  0x36   :  { %133 = vadd.xlane.f32.xlu0 %v132_v23  ;;  %v95_v23 = vld [vmem:[#allocation5 + $0x8] sm:$0xff] }
  0x39   :  { %1115 = vadd.xlane.f32.xlu1 %v1114_v28 }
  0x3a   :  { %1112 = vadd.xlane.f32.xlu0 %v1111_v31 }
  0x3d   :  { %1135 = vadd.xlane.f32.xlu1 %v1134_v34 }
  0x3e   :  { %1132 = vadd.xlane.f32.xlu0 %v1131_v35 }
  0x41   :  { %1121 = vadd.xlane.f32.xlu1 %v1120_v40 }
  0x42   :  { %1118 = vadd.xlane.f32.xlu0 %v1117_v43 }
  0x45   :  { %1141 = vadd.xlane.f32.xlu1 %v1140_v46 }
  0x46   :  { %1138 = vadd.xlane.f32.xlu0 %v1137_v47 }
  0x56   :  { %395 = vperm.xlu1 %5094, %v98_v49  }
  0x5a   :  { %400 = vperm.xlu1 %5094, %v99_v52  }
  0x5c   :  { %428 = vperm.xlu0 %5095, %v103_v51  }
  0x5e   :  { %423 = vperm.xlu1 %5094, %v102_v54  }
  0x60   :  { %410 = vperm.xlu0 %5095, %v101_v53  }
  0x62   :  { %405 = vperm.xlu1 %5094, %v100_v56  }
  0x64   :  { %438 = vperm.xlu0 %5095, %v105_v55  }
  0x66   :  { %433 = vperm.xlu1 %5094, %v104_v58  }
  0x68   :  { %1404 = vperm.xlu0 %5095, %v99_v52  }
  0x6a   :  { %1399 = vperm.xlu1 %5094, %v98_v49  }
  0x6c   :  { %1432 = vperm.xlu0 %5095, %v103_v51  }
  0x6e   :  { %1427 = vperm.xlu1 %5094, %v102_v54  }
  0x70   :  { %1414 = vperm.xlu0 %5095, %v101_v53  }
  0x72   :  { %1409 = vperm.xlu1 %5094, %v100_v56  }
  0x74   :  { %1442 = vperm.xlu0 %5095, %v105_v55  }
  0x76   :  { %1437 = vperm.xlu1 %5094, %v104_v58  }
  0x78   :  { %657 = vrot.lane.b32.xlu0 %v5623_v62, %s5349_s2 }
  0x7a   :  { %655 = vrot.lane.b32.xlu1 %v5631_v8, %s5349_s2 }
  0x7c   :  { %727 = vrot.lane.b32.xlu0 %v5629_v5, %s5350_s29 }
  0x7e   :  { %725 = vrot.lane.b32.xlu1 %v5636_v9, %s5350_s29 }
  0xb6   :  { %v117_v10 = vpop.xlane.xlu1 %116 }
  0xb7   :  { %v108_v11 = vpop.xlane.xlu0 %107 }
  0xba   :  { %v128_v12 = vpop.xlane.xlu1 %127 }
  0xbb   :  { %v111_v13 = vpop.xlane.xlu0 %110 }
  0xbc   :  { %v4944_v16 = vpack.c.bf16 %v111_v13, %v108_v11 }
  0xbe   :  { %4945 = vmatprep.subr.bf16.mxu0 %v4944_v16  ;;  %v131_v17 = vpop.xlane.xlu1 %130 }
  0xbf   :  { %4947 = vmatpush3.bf16.msra.mxu0 %v4944_v16  ;;  %v114_v18 = vpop.xlane.xlu0 %113  ;;  %v4952_v19 = vpack.c.bf16 %v131_v17, %v128_v12 }
  0xc0   :  { %v4948_v20 = vpack.c.bf16 %v117_v10, %v114_v18 }
  0xc1   :  { %4953 = vmatprep.subr.bf16.mxu1 %v4952_v19 }
  0xc2   :  { %4949 = vmatprep.subr.bf16.mxu0 %v4948_v20  ;;  %4955 = vmatpush3.bf16.msra.mxu1 %v4952_v19  ;;  %v137_v21 = vpop.xlane.xlu1 %136 }
  0xc3   :  { %4951 = vmatpush3.bf16.msra.mxu0 %v4948_v20  ;;  %v134_v22 = vpop.xlane.xlu0 %133 }
  0xc4   :  { %v4956_v28 = vpack.c.bf16 %v137_v21, %v134_v22 }
  0xc6   :  { %4841 = vmatmul.mubr.msk.f32.vlgmr.msra.gmra.mrb[0].mxu0 %vm138_vm0, %v95_v23  ;;  %4957 = vmatprep.subr.bf16.mxu1 %v4956_v28  ;;  %v1116_v30 = vpop.xlane.xlu1 %1115 }
  0xc7   :  { %4959 = vmatpush3.bf16.msra.mxu1 %v4956_v28  ;;  %v1113_v31 = vpop.xlane.xlu0 %1112  ;;  %4843 = vmatprep.mubr.msk.f32.mxu0 %vm138_vm0, %v96_v29 }
  0xc8   :  { %v4960_v33 = vpack.c.bf16 %v1116_v30, %v1113_v31 }
  0xca   :  { %4844 = vmatmul.mubr.msk.f32.gmra.mrb[2].mxu0 %vm138_vm0, %v97_v32  ;;  %4961 = vmatprep.subr.bf16.mxu0 %v4960_v33  ;;  %v1136_v34 = vpop.xlane.xlu1 %1135 }
  0xcb   :  { %4855 = vmatmul.mubr.msk.f32.vlgmr.msra.gmra.mrb[0].mxu1 %vm138_vm0, %v95_v23  ;;  %4963 = vmatpush3.bf16.msra.mxu0 %v4960_v33  ;;  %v1133_v35 = vpop.xlane.xlu0 %1132 }
  0xcc   :  { %v4968_v40 = vpack.c.bf16 %v1136_v34, %v1133_v35  ;;  %4857 = vmatprep.mubr.msk.f32.mxu1 %vm138_vm0, %v96_v29  ;;  %4868 = vmatprep.mubr.msk.f32.mxu0 %vm138_vm0, %v5588_v48 }
  0xce   :  { %4969 = vmatprep.subr.bf16.mxu1 %v4968_v40  ;;  %v1122_v41 = vpop.xlane.xlu1 %1121 }
  0xcf   :  { %4858 = vmatmul.mubr.msk.f32.gmra.mrb[2].mxu1 %vm138_vm0, %v97_v32  ;;  %v1119_v42 = vpop.xlane.xlu0 %1118 }
  0xd0   :  { %4971 = vmatpush3.bf16.msra.mxu1 %v4968_v40  ;;  %v4964_v43 = vpack.c.bf16 %v1122_v41, %v1119_v42  ;;  %4882 = vmatprep.mubr.msk.f32.mxu1 %vm138_vm0, %v5588_v48 }
  0xd2   :  { %4965 = vmatprep.subr.bf16.mxu0 %v4964_v43  ;;  %v1142_v44 = vpop.xlane.xlu1 %1141 }
  0xd3   :  { %4967 = vmatpush3.bf16.msra.mxu0 %v4964_v43  ;;  %v1139_v45 = vpop.xlane.xlu0 %1138 }
  0xd4   :  { %v4972_v46 = vpack.c.bf16 %v1142_v44, %v1139_v45 }
  0xd6   :  { %4869 = vmatmul.mubr.msk.f32.vlgmr.msra.gmra.mrb[4].mxu0 %vm138_vm0, %v95_v23  ;;  %4973 = vmatprep.subr.bf16.mxu1 %v4972_v46 }
  0xd7   :  { %4975 = vmatpush3.bf16.msra.mxu1 %v4972_v46  ;;  %4871 = vmatprep.mubr.msk.f32.mxu0 %vm138_vm0, %v96_v29 }
  0xda   :  { %4872 = vmatmul.mubr.msk.f32.gmra.mrb[6].mxu0 %vm138_vm0, %v97_v32  ;;  %4883 = vmatmul.mubr.msk.f32.vlgmr.msra.gmra.mrb[4].mxu1 %vm138_vm0, %v95_v23 }
  0xdb   :  { %4885 = vmatprep.mubr.msk.f32.mxu1 %vm138_vm0, %v96_v29 }
  0xde   :  { %4886 = vmatmul.mubr.msk.f32.gmra.mrb[6].mxu1 %vm138_vm0, %v97_v32 }
 0x199   :  { %v4842_v47 = vpop.f32.mrb[0].mxu0 }
 0x19a   :  { %v217_v48 = vpop.f32.mrb[1].mxu0  ;;  %336 = vperm.xlu1 %5094, %v4842_v47   ;;  %v322_v49 = vmul.f32 %v4842_v47, %v4842_v47 }
 0x19b   :  { %331 = vperm.xlu0 %5095, %v217_v48   ;;  %v321_v51 = vmul.f32 %v217_v48, %v217_v48 }
 0x19d   :  { %v4845_v52 = vpop.f32.mrb[2].mxu0 }
 0x19e   :  { %346 = vperm.xlu1 %5094, %v4845_v52   ;;  %v4856_v53 = vpop.f32.mrb[0].mxu1  ;;  %v227_v54 = vpop.f32.mrb[3].mxu0  ;;  %v324_v55 = vmul.f32 %v4845_v52, %v4845_v52 }
 0x19f   :  { %v326_v56 = vsub.f32 %v4856_v53, %v322_v49  ;;  %v302_v57 = vpop.f32.mrb[1].mxu1  ;;  %v323_v59 = vmul.f32 %v227_v54, %v227_v54  ;;  %v5662_v53 = vpop.permute.xlu1 %395 }
 0x1a0   :  { %v325_v58 = vsub.f32 %v302_v57, %v321_v51  ;;  %v429_v57 = vpop.permute.xlu0 %428 }
 0x1a1   :  { %v358_v3 = vadd.f32 1e-05, %v326_v56 }
 0x1a2   :  { %v4859_v60 = vpop.f32.mrb[2].mxu1  ;;  %341 = vperm.xlu1 %5094, %v227_v54   ;;  %v357_v12 = vadd.f32 1e-05, %v325_v58 }
 0x1a3   :  { %v328_v61 = vsub.f32 %v4859_v60, %v324_v55  ;;  %v312_v63 = vpop.f32.mrb[3].mxu1  ;;  %v401_v54 = vpop.permute.xlu1 %400  ;;  %v5354_v60 = vmov 0.0  }
 0x1a4   :  { %v327_v10 = vsub.f32 %v312_v63, %v323_v59  ;;  %v411_v59 = vpop.permute.xlu0 %410  ;;  %81 = vst.msk [vmem:[#allocation2 + $0x28] sm:$0xff] %vm79_vm2, %v5354_v60  ;;  %80 = vst.msk [vmem:[#allocation2 + $0x10] sm:$0xff] %vm79_vm2, %v5354_v60 }
 0x1a5   :  { %v360_v11 = vadd.f32 1e-05, %v328_v61  ;;  %75 = vst.msk [vmem:[#allocation2] sm:$0xff] %vm74_vm1, %v5354_v60  ;;  %76 = vst.msk [vmem:[#allocation2 + $0x18] sm:$0xff] %vm74_vm1, %v5354_v60 }
 0x1a6   :  { %v359_v17 = vadd.f32 1e-05, %v327_v10  ;;  %77 = vst.msk [vmem:[#allocation2 + $0x30] sm:$0xff] %vm74_vm1, %v5354_v60  ;;  %78 = vst.msk [vmem:[#allocation2 + $0x48] sm:$0xff] %vm74_vm1, %v5354_v60 }
 0x1a7   :  { %5112 = vrsqrt.f32 %v360_v11  ;;  %v5664_v55 = vpop.permute.xlu1 %423  ;;  %82 = vst.msk [vmem:[#allocation2 + $0x40] sm:$0xff] %vm79_vm2, %v5354_v60  ;;  %83 = vst.msk [vmem:[#allocation2 + $0x58] sm:$0xff] %vm79_vm2, %v5354_v60 }
 0x1a8   :  { %5114 = vrsqrt.f32 %v358_v3 }
 0x1a9   :  { %v4870_v13 = vpop.f32.mrb[4].mxu0  ;;  %5116 = vrsqrt.f32 %v357_v12 }
 0x1aa   :  { %v1221_v16 = vpop.f32.mrb[5].mxu0  ;;  %1340 = vperm.xlu0 %5095, %v4870_v13   ;;  %v1326_v18 = vmul.f32 %v4870_v13, %v4870_v13  ;;  %5118 = vrsqrt.f32 %v359_v17 }
 0x1ab   :  { %1335 = vperm.xlu1 %5094, %v1221_v16   ;;  %v1325_v19 = vmul.f32 %v1221_v16, %v1221_v16  ;;  %v5666_v56 = vpop.permute.xlu1 %405 }
 0x1ad   :  { %v4873_v20 = vpop.f32.mrb[6].mxu0  ;;  %v4884_v21 = vpop.f32.mrb[4].mxu1 }
 0x1ae   :  { %v1330_v22 = vsub.f32 %v4884_v21, %v1326_v18  ;;  %v1231_v23 = vpop.f32.mrb[7].mxu0  ;;  %v1306_v28 = vpop.f32.mrb[5].mxu1  ;;  %1350 = vperm.xlu0 %5095, %v4873_v20   ;;  %v1328_v30 = vmul.f32 %v4873_v20, %v4873_v20 }
 0x1af   :  { %v1329_v29 = vsub.f32 %v1306_v28, %v1325_v19  ;;  %1345 = vperm.xlu1 %5094, %v1231_v23   ;;  %v1327_v33 = vmul.f32 %v1231_v23, %v1231_v23  ;;  %v5668_v58 = vpop.permute.xlu1 %433 }
 0x1b0   :  { %v1362_v31 = vadd.f32 1e-05, %v1330_v22 }
 0x1b1   :  { %v5113_v32 = vpop.eup %5112  ;;  %v1361_v34 = vadd.f32 1e-05, %v1329_v29  ;;  %v4887_v35 = vpop.f32.mrb[6].mxu1 }
 0x1b2   :  { %v5115_v40 = vpop.eup %5114  ;;  %5120 = vrsqrt.f32 %v1362_v31  ;;  %v1332_v41 = vsub.f32 %v4887_v35, %v1328_v30  ;;  %v1316_v42 = vpop.f32.mrb[7].mxu1  ;;  %382 = vperm.xlu0 %5095, %v5113_v32  }
 0x1b3   :  { %5122 = vrsqrt.f32 %v1361_v34  ;;  %v1331_v43 = vsub.f32 %v1316_v42, %v1327_v33  ;;  %372 = vperm.xlu1 %5094, %v5115_v40   ;;  %v5117_v46 = vpop.eup %5116 }
 0x1b4   :  { %v1364_v44 = vadd.f32 1e-05, %v1332_v41  ;;  %v5119_v47 = vpop.eup %5118 }
 0x1b5   :  { %v1363_v45 = vadd.f32 1e-05, %v1331_v43 }
 0x1b6   :  { %5124 = vrsqrt.f32 %v1364_v44 }
 0x1b7   :  { %5126 = vrsqrt.f32 %v1363_v45  ;;  %367 = vperm.xlu1 %5094, %v5117_v46  }
 0x1bb   :  { %377 = vperm.xlu1 %5094, %v5119_v47  }
 0x1bc   :  { %v5121_v48 = vpop.eup %5120 }
 0x1bd   :  { %v5123_v49 = vpop.eup %5122  ;;  %1376 = vperm.xlu0 %5095, %v5121_v48  }
 0x1bf   :  { %1371 = vperm.xlu1 %5094, %v5123_v49  }
 0x1c0   :  { %v5125_v51 = vpop.eup %5124 }
 0x1c1   :  { %v5127_v52 = vpop.eup %5126  ;;  %1386 = vperm.xlu0 %5095, %v5125_v51  }
 0x1c3   :  { %1381 = vperm.xlu1 %5094, %v5127_v52  }
 0x1c5   :  { %846 = vrot.lane.b32.xlu0 %v5623_v62, %s5351_s11 }
 0x1c7   :  { %844 = vrot.lane.b32.xlu1 %v5631_v8, %s5351_s11 }
 0x1c9   :  { %916 = vrot.lane.b32.xlu0 %v5629_v5, %s5352_s12 }
 0x1cb   :  { %914 = vrot.lane.b32.xlu1 %v5636_v9, %s5352_s12 }
 0x1cd   :  { %1032 = vrot.lane.b32.xlu0 %v5631_v8, %s5353_s30  ;;  %v439_v8 = vpop.permute.xlu0 %438 }
 0x1cf   :  { %1034 = vrot.lane.b32.xlu1 %v5623_v62, %s5353_s30  ;;  %v5674_v62 = vpop.permute.xlu1 %1399 }
 0x1d1   :  { %v5678_v63 = vpop.permute.xlu0 %1404 }
 0x1d3   :  { %v5676_v61 = vpop.permute.xlu1 %1427 }
 0x1d5   :  { %v5682_v10 = vpop.permute.xlu0 %1432 }
 0x1d7   :  { %v5680_v3 = vpop.permute.xlu1 %1409 }
 0x1d9   :  { %v5686_v12 = vpop.permute.xlu0 %1414 }
 0x1db   :  { %v5684_v11 = vpop.permute.xlu1 %1437 }
 0x1dd   :  { %v5690_v16 = vpop.permute.xlu0 %1442 }
 0x1df   :  { %v5688_v13 = vpop.permute.xlu1 %655 }
 0x1e0   :  { %8274 = vst [vmem:[#allocation16_spill] sm:$0xff] %v5688_v13 }
 0x1e1   :  { %v5694_v19 = vpop.permute.xlu0 %657 }
 0x1e3   :  { %v5692_v17 = vpop.permute.xlu1 %725 }
 0x1e4   :  { %8275 = vst [vmem:[#allocation17_spill] sm:$0xff] %v5692_v17 }
 0x1e5   :  { %v5696_v21 = vpop.permute.xlu0 %727 }
 0x219   :  { %v337_v18 = vpop.permute.xlu1 %336 }
 0x21a   :  { %v332_v22 = vpop.permute.xlu0 %331  ;;  %v351_v34 = vsub.f32 %v5487_v6, %v337_v18  ;;  %v352_v35 = vsub.f32 %v5492_v7, %v337_v18 }
 0x21b   :  { %v349_v48 = vsub.f32 %v5473_v2, %v332_v22  ;;  %v350_v49 = vsub.f32 %v5480_v4, %v332_v22 }
 0x21d   :  { %v347_v20 = vpop.permute.xlu1 %346 }
 0x21e   :  { %v355_v32 = vsub.f32 %v5463_v0, %v347_v20  ;;  %v356_v33 = vsub.f32 %v5468_v1, %v347_v20 }
 0x221   :  { %v342_v23 = vpop.permute.xlu1 %341 }
 0x222   :  { %v353_v1 = vsub.f32 %v5507_v14, %v342_v23  ;;  %v354_v6 = vsub.f32 %v5512_v15, %v342_v23 }
 0x229   :  { %v1341_v28 = vpop.permute.xlu0 %1340 }
 0x22a   :  { %v1336_v29 = vpop.permute.xlu1 %1335  ;;  %v1355_v2 = vsub.f32 %v5527_v24, %v1341_v28  ;;  %v1356_v4 = vsub.f32 %v5532_v25, %v1341_v28 }
 0x22d   :  { %v5698_v30 = vpop.permute.xlu0 %1350 }
 0x22e   :  { %v5700_v31 = vpop.permute.xlu1 %1345  ;;  %v1360_v24 = vsub.f32 %v5564_v37, %v5698_v30 }
 0x231   :  { %v383_v40 = vpop.permute.xlu0 %382 }
 0x232   :  { %v391_v41 = vmul.f32 %v383_v40, %v355_v32  ;;  %v392_v42 = vmul.f32 %v383_v40, %v356_v33  ;;  %v373_v43 = vpop.permute.xlu1 %372  ;;  %v1354_v33 = vsub.f32 %v5542_v27, %v1336_v29 }
 0x233   :  { %v387_v44 = vmul.f32 %v373_v43, %v351_v34  ;;  %v388_v45 = vmul.f32 %v373_v43, %v352_v35 }
 0x234   :  { %v419_v46 = vmul.f32 %v411_v59, %v391_v41  ;;  %v420_v47 = vmul.f32 %v411_v59, %v392_v42 }
 0x235   :  { %v415_v51 = vmul.f32 %v401_v54, %v387_v44  ;;  %v416_v0 = vmul.f32 %v401_v54, %v388_v45  ;;  %v1353_v54 = vsub.f32 %v5537_v26, %v1336_v29 }
 0x236   :  { %v368_v52 = vpop.permute.xlu1 %367  ;;  %v5710_v7 = vadd.f32 %v439_v8, %v420_v47  ;;  %v5712_v60 = vadd.f32 %v439_v8, %v419_v46 }
 0x237   :  { %v385_v18 = vmul.f32 %v368_v52, %v349_v48  ;;  %v386_v20 = vmul.f32 %v368_v52, %v350_v49  ;;  %v5714_v32 = vadd.f32 %v429_v57, %v416_v0  ;;  %v5716_v59 = vadd.f32 %v429_v57, %v415_v51 }
 0x238   :  { %v456_v14 = vsub.f32 0.0, %v5710_v7  ;;  %v1359_v57 = vsub.f32 %v5559_v36, %v5698_v30  ;;  %v455_v40 = vsub.f32 0.0, %v5712_v60  ;;  %v1358_v36 = vsub.f32 %v5574_v39, %v5700_v31 }
 0x239   :  { %v413_v15 = vmul.f32 %v5662_v53, %v385_v18  ;;  %v414_v22 = vmul.f32 %v5662_v53, %v386_v20  ;;  %v452_v8 = vsub.f32 0.0, %v5714_v32  ;;  %v451_v23 = vsub.f32 0.0, %v5716_v59 }
 0x23a   :  { %v378_v25 = vpop.permute.xlu1 %377  ;;  %v471_v26 = vmul.f32 1.442695, %v456_v14  ;;  %v469_v49 = vmul.f32 1.442695, %v455_v40  ;;  %v1357_v14 = vsub.f32 %v5569_v38, %v5700_v31 }
 0x23b   :  { %v389_v28 = vmul.f32 %v378_v25, %v353_v1  ;;  %v390_v34 = vmul.f32 %v378_v25, %v354_v6  ;;  %v463_v35 = vmul.f32 1.442695, %v452_v8  ;;  %v461_v41 = vmul.f32 1.442695, %v451_v23 }
 0x23c   :  { %v1377_v53 = vpop.permute.xlu0 %1376  ;;  %v5733_v42 = vadd.f32 %v5664_v55, %v414_v22  ;;  %v5736_v27 = vadd.f32 %v5664_v55, %v413_v15  ;;  %5128 = vpow2.f32 %v471_v26 }
 0x23d   :  { %v418_v37 = vmul.f32 %v5666_v56, %v390_v34  ;;  %v1391_v29 = vmul.f32 %v1377_v53, %v1355_v2  ;;  %v1392_v30 = vmul.f32 %v1377_v53, %v1356_v4  ;;  %v417_v43 = vmul.f32 %v5666_v56, %v389_v28 }
 0x23e   :  { %v1372_v44 = vpop.permute.xlu1 %1371  ;;  %5130 = vpow2.f32 %v463_v35  ;;  %v450_v45 = vsub.f32 0.0, %v5733_v42  ;;  %v449_v46 = vsub.f32 0.0, %v5736_v27 }
 0x23f   :  { %v1420_v47 = vmul.f32 %v5678_v63, %v1392_v30  ;;  %v1389_v55 = vmul.f32 %v1372_v44, %v1353_v54  ;;  %v1390_v48 = vmul.f32 %v1372_v44, %v1354_v33  ;;  %5132 = vpow2.f32 %v461_v41 }
 0x240   :  { %v1387_v51 = vpop.permute.xlu0 %1386  ;;  %v459_v39 = vmul.f32 1.442695, %v450_v45  ;;  %v457_v0 = vmul.f32 1.442695, %v449_v46  ;;  %v5746_v1 = vadd.f32 %v5668_v58, %v418_v37  ;;  %v1419_v56 = vmul.f32 %v5678_v63, %v1391_v29 }
 0x241   :  { %v1418_v6 = vmul.f32 %v5674_v62, %v1390_v48  ;;  %v1395_v52 = vmul.f32 %v1387_v51, %v1359_v57  ;;  %v1396_v18 = vmul.f32 %v1387_v51, %v1360_v24  ;;  %v5752_v4 = vadd.f32 %v5668_v58, %v417_v43 }
 0x242   :  { %v1382_v20 = vpop.permute.xlu1 %1381  ;;  %5134 = vpow2.f32 %v459_v39  ;;  %v454_v2 = vsub.f32 0.0, %v5746_v1  ;;  %v5755_v54 = vadd.f32 %v5682_v10, %v1420_v47  ;;  %v1417_v15 = vmul.f32 %v5674_v62, %v1389_v55 }
 0x243   :  { %v1424_v63 = vmul.f32 %v5686_v12, %v1396_v18  ;;  %v1394_v22 = vmul.f32 %v1382_v20, %v1358_v36  ;;  %5136 = vpow2.f32 %v457_v0  ;;  %v453_v23 = vsub.f32 0.0, %v5752_v4 }
 0x244   :  { %v467_v8 = vmul.f32 1.442695, %v454_v2  ;;  %v1456_v33 = vsub.f32 0.0, %v5755_v54  ;;  %v1423_v58 = vmul.f32 %v5686_v12, %v1395_v52  ;;  %v1393_v57 = vmul.f32 %v1382_v20, %v1357_v14 }
 0x245   :  { %5138 = vpow2.f32 %v469_v49  ;;  %v5765_v24 = vadd.f32 %v5682_v10, %v1419_v56  ;;  %v465_v38 = vmul.f32 1.442695, %v453_v23  ;;  %v5768_v31 = vadd.f32 %v5676_v61, %v1418_v6 }
 0x246   :  { %v5129_v25 = vpop.eup %5128  ;;  %5140 = vpow2.f32 %v467_v8  ;;  %v1467_v62 = vmul.f32 1.442695, %v1456_v33  ;;  %v5772_v34 = vadd.f32 %v5676_v61, %v1417_v15  ;;  %v1422_v12 = vmul.f32 %v5680_v3, %v1394_v22 }
 0x247   :  { %v480_v26 = vadd.f32 1.0, %v5129_v25  ;;  %v1455_v28 = vsub.f32 0.0, %v5765_v24  ;;  %5142 = vpow2.f32 %v465_v38  ;;  %v1454_v10 = vsub.f32 0.0, %v5768_v31 }
 0x248   :  { %v5131_v35 = vpop.eup %5130  ;;  %v5777_v40 = vadd.f32 %v5690_v16, %v1424_v63  ;;  %v1453_v36 = vsub.f32 0.0, %v5772_v34  ;;  %v1421_v29 = vmul.f32 %v5680_v3, %v1393_v57  ;;  %v5782_v30 = vadd.f32 %v5690_v16, %v1423_v58 }
 0x249   :  { %v476_v53 = vadd.f32 1.0, %v5131_v35  ;;  %5144 = vrcp.f32 %v480_v26  ;;  %v1465_v41 = vmul.f32 1.442695, %v1455_v28  ;;  %v5133_v37 = vpop.eup %5132  ;;  %v1463_v61 = vmul.f32 1.442695, %v1454_v10 }
 0x24a   :  { %5146 = vpow2.f32 %v1467_v62  ;;  %v475_v43 = vadd.f32 1.0, %v5133_v37  ;;  %v1461_v45 = vmul.f32 1.442695, %v1453_v36  ;;  %v1460_v46 = vsub.f32 0.0, %v5777_v40 }
 0x24b   :  { %5148 = vrcp.f32 %v476_v53  ;;  %v5786_v47 = vadd.f32 %v5684_v11, %v1422_v12  ;;  %v1459_v3 = vsub.f32 0.0, %v5782_v30  ;;  %v5790_v49 = vadd.f32 %v5684_v11, %v1421_v29 }
 0x24c   :  { %v5135_v44 = vpop.eup %5134  ;;  %5150 = vpow2.f32 %v1465_v41  ;;  %v1475_v56 = vmul.f32 1.442695, %v1460_v46 }
 0x24d   :  { %5152 = vrcp.f32 %v475_v43  ;;  %v474_v55 = vadd.f32 1.0, %v5135_v44  ;;  %v5137_v48 = vpop.eup %5136  ;;  %v1458_v6 = vsub.f32 0.0, %v5786_v47  ;;  %v1473_v20 = vmul.f32 1.442695, %v1459_v3 }
 0x24e   :  { %5154 = vpow2.f32 %v1463_v61  ;;  %v473_v51 = vadd.f32 1.0, %v5137_v48  ;;  %v1457_v2 = vsub.f32 0.0, %v5790_v49 }
 0x24f   :  { %v5139_v16 = vpop.eup %5138  ;;  %5156 = vrcp.f32 %v474_v55  ;;  %v1471_v63 = vmul.f32 1.442695, %v1458_v6 }
 0x250   :  { %v5141_v39 = vpop.eup %5140  ;;  %v479_v0 = vadd.f32 1.0, %v5139_v16  ;;  %5158 = vpow2.f32 %v1461_v45  ;;  %v1469_v58 = vmul.f32 1.442695, %v1457_v2  ;;  %v5828_v2 = vpop.permute.xlu1 %844 }
 0x251   :  { %5160 = vrcp.f32 %v473_v51  ;;  %v478_v52 = vadd.f32 1.0, %v5141_v39  ;;  %v5143_v18 = vpop.eup %5142  ;;  %8277 = vst [vmem:[#allocation19_spill] sm:$0xff] %v5828_v2 }
 0x252   :  { %5162 = vrcp.f32 %v479_v0  ;;  %v477_v15 = vadd.f32 1.0, %v5143_v18 }
 0x253   :  { %v5145_v14 = vpop.eup %5144  ;;  %5164 = vpow2.f32 %v1475_v56 }
 0x254   :  { %v5147_v11 = vpop.eup %5146  ;;  %5166 = vrcp.f32 %v478_v52  ;;  %v496_v36 = vmul.f32 %v5145_v14, %v5710_v7  ;;  %v5832_v14 = vpop.permute.xlu1 %914 }
 0x255   :  { %v5149_v22 = vpop.eup %5148  ;;  %v1480_v8 = vadd.f32 1.0, %v5147_v11  ;;  %5168 = vpow2.f32 %v1473_v20 }
 0x256   :  { %v5151_v23 = vpop.eup %5150  ;;  %v492_v33 = vmul.f32 %v5149_v22, %v5714_v32  ;;  %5170 = vrcp.f32 %v477_v15 }
 0x257   :  { %v5153_v57 = vpop.eup %5152  ;;  %v1479_v25 = vadd.f32 1.0, %v5151_v23  ;;  %5172 = vpow2.f32 %v1471_v63 }
 0x258   :  { %v5155_v38 = vpop.eup %5154  ;;  %511 = vrot.lane.b32.xlu0 %v492_v33, %s5355_s14  ;;  %v491_v62 = vmul.f32 %v5153_v57, %v5716_v59  ;;  %5174 = vrcp.f32 %v1480_v8  ;;  %v5836_v15 = vpop.permute.xlu1 %1034 }
 0x259   :  { %v5157_v26 = vpop.eup %5156  ;;  %v1478_v28 = vadd.f32 1.0, %v5155_v38  ;;  %5176 = vpow2.f32 %v1469_v58  ;;  %8279 = vst [vmem:[#allocation21_spill] sm:$0xff] %v5836_v15 }
 0x25a   :  { %v5159_v35 = vpop.eup %5158  ;;  %509 = vrot.lane.b32.xlu1 %v491_v62, %s5355_s14  ;;  %v490_v32 = vmul.f32 %v5157_v26, %v5733_v42  ;;  %5178 = vrcp.f32 %v1479_v25 }
 0x25b   :  { %v5161_v12 = vpop.eup %5160  ;;  %v1477_v10 = vadd.f32 1.0, %v5159_v35  ;;  %5180 = vrcp.f32 %v1478_v28 }
 0x25c   :  { %507 = vrot.lane.b32.xlu0 %v490_v32, %s5355_s14  ;;  %v489_v53 = vmul.f32 %v5161_v12, %v5736_v27  ;;  %v5163_v41 = vpop.eup %5162 }
 0x25d   :  { %v5165_v59 = vpop.eup %5164  ;;  %5182 = vrcp.f32 %v1477_v10  ;;  %v495_v42 = vmul.f32 %v5163_v41, %v5712_v60 }
 0x25e   :  { %505 = vrot.lane.b32.xlu1 %v489_v53, %s5355_s14  ;;  %v5167_v37 = vpop.eup %5166  ;;  %v1484_v29 = vadd.f32 1.0, %v5165_v59 }
 0x25f   :  { %v5169_v61 = vpop.eup %5168  ;;  %v494_v27 = vmul.f32 %v5167_v37, %v5746_v1 }
 0x260   :  { %519 = vrot.lane.b32.xlu0 %v496_v36, %s5355_s14  ;;  %v5171_v43 = vpop.eup %5170  ;;  %5184 = vrcp.f32 %v1484_v29  ;;  %v1483_v44 = vadd.f32 1.0, %v5169_v61 }
 0x261   :  { %v5173_v45 = vpop.eup %5172  ;;  %v493_v48 = vmul.f32 %v5171_v43, %v5752_v4 }
 0x262   :  { %517 = vrot.lane.b32.xlu1 %v495_v42, %s5355_s14  ;;  %v5175_v46 = vpop.eup %5174  ;;  %5186 = vrcp.f32 %v1483_v44  ;;  %v1482_v55 = vadd.f32 1.0, %v5173_v45 }
 0x263   :  { %v5177_v7 = vpop.eup %5176  ;;  %v1496_v60 = vmul.f32 %v5175_v46, %v5755_v54 }
 0x264   :  { %515 = vrot.lane.b32.xlu0 %v494_v27, %s5355_s14  ;;  %v5179_v3 = vpop.eup %5178  ;;  %5188 = vrcp.f32 %v1482_v55  ;;  %v1481_v16 = vadd.f32 1.0, %v5177_v7 }
 0x265   :  { %v5181_v51 = vpop.eup %5180  ;;  %v1495_v1 = vmul.f32 %v5179_v3, %v5765_v24 }
 0x266   :  { %513 = vrot.lane.b32.xlu1 %v493_v48, %s5355_s14  ;;  %5190 = vrcp.f32 %v1481_v16  ;;  %v1494_v0 = vmul.f32 %v5181_v51, %v5768_v31 }
 0x267   :  { %v5183_v39 = vpop.eup %5182 }
 0x268   :  { %1515 = vrot.lane.b32.xlu0 %v1496_v60, %s5355_s14  ;;  %v1493_v4 = vmul.f32 %v5183_v39, %v5772_v34  ;;  %v5826_v34 = vpop.permute.xlu0 %846 }
 0x269   :  { %8276 = vst [vmem:[#allocation18_spill] sm:$0xff] %v5826_v34 }
 0x26a   :  { %1513 = vrot.lane.b32.xlu1 %v1495_v1, %s5355_s14  ;;  %v5185_v56 = vpop.eup %5184 }
 0x26b   :  { %v1500_v54 = vmul.f32 %v5185_v56, %v5777_v40 }
 0x26c   :  { %1511 = vrot.lane.b32.xlu0 %v1494_v0, %s5355_s14  ;;  %v5187_v6 = vpop.eup %5186  ;;  %v5830_v40 = vpop.permute.xlu0 %916 }
 0x26d   :  { %v1499_v24 = vmul.f32 %v5187_v6, %v5782_v30 }
 0x26e   :  { %1509 = vrot.lane.b32.xlu1 %v1493_v4, %s5355_s14  ;;  %v5189_v52 = vpop.eup %5188 }
 0x26f   :  { %v1498_v31 = vmul.f32 %v5189_v52, %v5786_v47 }
 0x270   :  { %1523 = vrot.lane.b32.xlu0 %v1500_v54, %s5355_s14  ;;  %v5191_v18 = vpop.eup %5190  ;;  %v5834_v30 = vpop.permute.xlu0 %1032 }
 0x271   :  { %v1497_v20 = vmul.f32 %v5191_v18, %v5790_v49  ;;  %8278 = vst [vmem:[#allocation20_spill] sm:$0xff] %v5834_v30 }
 0x272   :  { %1521 = vrot.lane.b32.xlu1 %v1499_v24, %s5355_s14 }
 0x274   :  { %1519 = vrot.lane.b32.xlu0 %v1498_v31, %s5355_s14 }
 0x276   :  { %1517 = vrot.lane.b32.xlu1 %v1497_v20, %s5355_s14 }
 0x2ca   :  { %v512_v11 = vpop.permute.xlu0 %511 }
 0x2cb   :  { %543 = vst.msk [vmem:[#allocation2 + $0x28] sm:$0xff] %vm74_vm1, %v512_v11 }
 0x2cc   :  { %v510_v47 = vpop.permute.xlu1 %509 }
 0x2cd   :  { %541 = vst.msk [vmem:[#allocation2 + $0x18] sm:$0xff] %vm537_vm3, %v510_v47  ;;  %v5841_v63 = vsel %vm74_vm1, %v510_v47, %v512_v11 }
 0x2ce   :  { %v508_v49 = vpop.permute.xlu0 %507  ;;  %v572_v58 = vmul.f32 %v5629_v5, %v5841_v63 }
 0x2cf   :  { %540 = vst.msk [vmem:[#allocation2 + $0x10] sm:$0xff] %vm74_vm1, %v508_v49 }
 0x2d0   :  { %v506_v22 = vpop.permute.xlu1 %505 }
 0x2d1   :  { %v5845_v8 = vsel %vm74_vm1, %v506_v22, %v508_v49  ;;  %538 = vst.msk [vmem:[#allocation2] sm:$0xff] %vm537_vm3, %v506_v22  ;;  %v5932_v49 = vsel %vm659_vm4, %v5688_v13, %v5694_v19 }
 0x2d2   :  { %v520_v23 = vpop.permute.xlu0 %519  ;;  %v570_v33 = vmul.f32 %v5629_v5, %v5845_v8  ;;  %v5854_v38 = vld [vmem:[#allocation2 + $0x28] sm:$0xff]  ;;  %v598_v18 = vpack.c.bf16 %v5841_v63, %v5845_v8  ;;  %8280 = vst [vmem:[#allocation22_spill] sm:$0xff] %v5932_v49 }
 0x2d3   :  { %549 = vst.msk [vmem:[#allocation2 + $0x58] sm:$0xff] %vm74_vm1, %v520_v23  ;;  %v669_v16 = vmul.f32 %v5854_v38, %v5694_v19  ;;  %v739_v31 = vmul.f32 %v5854_v38, %v5696_v21 }
 0x2d4   :  { %v518_v57 = vpop.permute.xlu1 %517  ;;  %v578_v25 = vpack.c.bf16 %v572_v58, %v570_v33  ;;  %v5856_v62 = vld [vmem:[#allocation2 + $0x18] sm:$0xff] }
 0x2d5   :  { %547 = vst.msk [vmem:[#allocation2 + $0x48] sm:$0xff] %vm537_vm3, %v518_v57  ;;  %v5861_v35 = vsel %vm74_vm1, %v518_v57, %v520_v23  ;;  %v571_v36 = vmul.f32 %v5856_v62, %v5636_v9 }
 0x2d6   :  { %v5858_v26 = vld [vmem:[#allocation2 + $0x10] sm:$0xff]  ;;  %v516_v28 = vpop.permute.xlu0 %515  ;;  %2161 = vmatprep.subr.bf16.mxu0 %v578_v25  ;;  %v576_v61 = vmul.f32 %v5629_v5, %v5861_v35 }
 0x2d7   :  { %546 = vst.msk [vmem:[#allocation2 + $0x40] sm:$0xff] %vm74_vm1, %v516_v28  ;;  %v599_v32 = vpack.c.bf16 %v5854_v38, %v5858_v26  ;;  %v666_v55 = vmul.f32 %v5858_v26, %v5694_v19  ;;  %v736_v54 = vmul.f32 %v5858_v26, %v5696_v21  ;;  %v855_v57 = vmul.f32 %v5858_v26, %v5826_v34 }
 0x2d8   :  { %v5866_v12 = vld [vmem:[#allocation2] sm:$0xff]  ;;  %v514_v10 = vpop.permute.xlu1 %513 }
 0x2d9   :  { %v5869_v53 = vsel %vm74_vm1, %v514_v10, %v516_v28  ;;  %544 = vst.msk [vmem:[#allocation2 + $0x30] sm:$0xff] %vm537_vm3, %v514_v10  ;;  %613 = vrot.lane.b32.xlu0 %v599_v32, %s5356_s15  ;;  %v597_v41 = vpack.c.bf16 %v5856_v62, %v5866_v12  ;;  %v569_v59 = vmul.f32 %v5866_v12, %v5636_v9 }
 0x2da   :  { %v1516_v37 = vpop.permute.xlu0 %1515  ;;  %v574_v29 = vmul.f32 %v5629_v5, %v5869_v53  ;;  %v5909_v1 = vld [vmem:[#allocation2 + $0x58] sm:$0xff]  ;;  %v678_v4 = vpack.c.bf16 %v669_v16, %v666_v55  ;;  %v748_v58 = vpack.c.bf16 %v739_v31, %v736_v54  ;;  %v5958_v10 = vsel %vm729_vm5, %v5692_v17, %v5696_v21 }
 0x2db   :  { %609 = vrot.lane.b32.xlu1 %v597_v41, %s5356_s15  ;;  %v577_v42 = vpack.c.bf16 %v571_v36, %v569_v59  ;;  %1546 = vst.msk [vmem:[#allocation2 + $0x28] sm:$0xff] %vm74_vm1, %v1516_v37  ;;  %8281 = vst [vmem:[#allocation23_spill] sm:$0xff] %v5958_v10  ;;  %v6015_v54 = vsel %vm138_vm0, %v5832_v14, %v5830_v40  ;;  %v922_v59 = vmul.f32 %v5832_v14, %v5866_v12 }
 0x2dc   :  { %v1514_v43 = vpop.permute.xlu1 %1513  ;;  %v580_v44 = vpack.c.bf16 %v576_v61, %v574_v29  ;;  %v5887_v45 = vld [vmem:[#allocation2 + $0x48] sm:$0xff]  ;;  %v858_v29 = vmul.f32 %v5854_v38, %v5826_v34 }
 0x2dd   :  { %811 = vrot.lane.b32.xlu0 %v599_v32, %s5357_s3  ;;  %2162 = vmatpush1.bf16.msra.mxu0 %v577_v42  ;;  %1544 = vst.msk [vmem:[#allocation2 + $0x18] sm:$0xff] %vm537_vm3, %v1514_v43  ;;  %v5890_v46 = vsel %vm74_vm1, %v1514_v43, %v1516_v37  ;;  %v575_v51 = vmul.f32 %v5887_v45, %v5636_v9 }
 0x2de   :  { %v1512_v27 = vpop.permute.xlu0 %1511  ;;  %2163 = vmatprep.subr.bf16.mxu0 %v580_v44  ;;  %v1564_v56 = vmul.f32 %v5890_v46, %v5629_v5  ;;  %v5925_v20 = vld [vmem:[#allocation2 + $0x40] sm:$0xff]  ;;  %v5940_v23 = vmul.f32 %v5828_v2, %v5887_v45  ;;  %v5969_v36 = vmul.f32 %v5832_v14, %v5887_v45  ;;  %v924_v43 = vmul.f32 %v5858_v26, %v5830_v40 }
 0x2df   :  { %807 = vrot.lane.b32.xlu1 %v597_v41, %s5357_s3  ;;  %1543 = vst.msk [vmem:[#allocation2 + $0x10] sm:$0xff] %vm74_vm1, %v1512_v27  ;;  %v6104_v55 = vmul.f32 %v5890_v46, %v6015_v54 }
 0x2e0   :  { %v5896_v7 = vld [vmem:[#allocation2 + $0x30] sm:$0xff]  ;;  %v1510_v48 = vpop.permute.xlu1 %1509 }
 0x2e1   :  { %v5899_v3 = vsel %vm74_vm1, %v1510_v48, %v1512_v27  ;;  %999 = vrot.lane.b32.xlu0 %v599_v32, %s5358_s26  ;;  %1541 = vst.msk [vmem:[#allocation2] sm:$0xff] %vm537_vm3, %v1510_v48  ;;  %v573_v60 = vmul.f32 %v5896_v7, %v5636_v9  ;;  %v5936_v22 = vmul.f32 %v5828_v2, %v5896_v7  ;;  %8293 = vst [vmem:[#allocation35_spill] sm:$0xff] %v6104_v55 }
 0x2e2   :  { %v1524_v39 = vpop.permute.xlu0 %1523  ;;  %v1562_v0 = vmul.f32 %v5899_v3, %v5629_v5  ;;  %v5951_v25 = vmul.f32 %v5832_v14, %v5896_v7  ;;  %v867_v48 = vpack.c.bf16 %v858_v29, %v855_v57  ;;  %v6036_v29 = vmul.f32 %v6015_v54, %v5869_v53 }
 0x2e3   :  { %995 = vrot.lane.b32.xlu1 %v597_v41, %s5358_s26  ;;  %v579_v6 = vpack.c.bf16 %v575_v51, %v573_v60  ;;  %1552 = vst.msk [vmem:[#allocation2 + $0x58] sm:$0xff] %vm74_vm1, %v1524_v39  ;;  %v5963_v41 = vsel %vm848_vm6, %v5828_v2, %v5826_v34  ;;  %v5993_v60 = vmul.f32 %v5932_v49, %v5869_v53 }
 0x2e4   :  { %v1522_v52 = vpop.permute.xlu1 %1521  ;;  %v1570_v24 = vpack.c.bf16 %v1564_v56, %v1562_v0  ;;  %v5927_v47 = vld [vmem:[#allocation2 + $0x18] sm:$0xff]  ;;  %v5997_v51 = vmul.f32 %v5932_v49, %v5861_v35  ;;  %v6003_v56 = vmul.f32 %v5958_v10, %v5869_v53  ;;  %v6031_v57 = vmul.f32 %v5963_v41, %v5861_v35  ;;  %8283 = vst [vmem:[#allocation25_spill] sm:$0xff] %v6036_v29 }
 0x2e5   :  { %692 = vrot.lane.b32.xlu0 %v678_v4, %s5359_s16  ;;  %2164 = vmatpush1.bf16.msra.mxu0 %v579_v6  ;;  %1550 = vst.msk [vmem:[#allocation2 + $0x48] sm:$0xff] %vm537_vm3, %v1522_v52  ;;  %v5943_v33 = vsel %vm74_vm1, %v1522_v52, %v1524_v39  ;;  %v1563_v42 = vmul.f32 %v5927_v47, %v5636_v9 }
 0x2e6   :  { %v1520_v11 = vpop.permute.xlu0 %1519  ;;  %2267 = vmatprep.subr.bf16.mxu1 %v1570_v24  ;;  %v1568_v27 = vmul.f32 %v5943_v33, %v5629_v5  ;;  %v664_v39 = vmul.f32 %v5688_v13, %v5866_v12  ;;  %v6007_v4 = vmul.f32 %v5958_v10, %v5861_v35  ;;  %v927_v6 = vmul.f32 %v5854_v38, %v5830_v40 }
 0x2e7   :  { %611 = vrot.lane.b32.xlu1 %v598_v18, %s5356_s15  ;;  %1549 = vst.msk [vmem:[#allocation2 + $0x40] sm:$0xff] %vm74_vm1, %v1520_v11  ;;  %v667_v24 = vmul.f32 %v5688_v13, %v5856_v62  ;;  %v6070_v50 = vmul.f32 %v5899_v3, %v5932_v49  ;;  %v665_v52 = vmul.f32 %v5932_v49, %v5845_v8 }
 0x2e8   :  { %v1518_v28 = vpop.permute.xlu1 %1517  ;;  %v5953_v32 = vld [vmem:[#allocation2] sm:$0xff]  ;;  %v742_v55 = vmul.f32 %v5925_v20, %v5696_v21  ;;  %v6205_v29 = vmul.f32 %v5836_v15, %v5858_v26  ;;  %v6222_v26 = vmul.f32 %v5834_v30, %v5856_v62 }
 0x2e9   :  { %v5972_v37 = vsel %vm74_vm1, %v1518_v28, %v1520_v11  ;;  %762 = vrot.lane.b32.xlu0 %v748_v58, %s5360_s17  ;;  %v1561_v61 = vmul.f32 %v5953_v32, %v5636_v9  ;;  %1547 = vst.msk [vmem:[#allocation2 + $0x30] sm:$0xff] %vm537_vm3, %v1518_v28  ;;  %v6027_v58 = vmul.f32 %v5963_v41, %v5869_v53  ;;  %8286 = vst [vmem:[#allocation28_spill] sm:$0xff] %v6070_v50 }
 0x2ea   :  { %v1566_v44 = vmul.f32 %v5972_v37, %v5629_v5  ;;  %v936_v28 = vpack.c.bf16 %v927_v6, %v924_v43  ;;  %v853_v6 = vmul.f32 %v5828_v2, %v5866_v12  ;;  %v6078_v11 = vmul.f32 %v5899_v3, %v5958_v10 }
 0x2eb   :  { %809 = vrot.lane.b32.xlu1 %v598_v18, %s5357_s3  ;;  %v1569_v16 = vpack.c.bf16 %v1563_v42, %v1561_v61  ;;  %v6040_v61 = vmul.f32 %v6015_v54, %v5861_v35  ;;  %v676_v42 = vpack.c.bf16 %v667_v24, %v664_v39  ;;  %v6057_v39 = vpack.c.bf16 %v5890_v46, %v5899_v3 }
 0x2ec   :  { %v1572_v0 = vpack.c.bf16 %v1568_v27, %v1566_v44  ;;  %v6021_v31 = vld [vmem:[#allocation2 + $0x48] sm:$0xff]  ;;  %v734_v44 = vmul.f32 %v5692_v17, %v5866_v12  ;;  %v6066_v24 = vpack.c.bf16 %v5887_v45, %v5896_v7  ;;  %8288 = vst [vmem:[#allocation30_spill] sm:$0xff] %v6078_v11  ;;  %v6125_v5 = vsel %vm1036_vm7, %v5834_v30, %v5836_v15 }
 0x2ed   :  { %881 = vrot.lane.b32.xlu0 %v867_v48, %s5361_s20  ;;  %2268 = vmatpush1.bf16.msra.mxu1 %v1569_v16  ;;  %8282 = vst [vmem:[#allocation24_spill] sm:$0xff] %v6021_v31  ;;  %v1567_v43 = vmul.f32 %v6021_v31, %v5636_v9  ;;  %8285 = vst [vmem:[#allocation27_spill] sm:$0xff] %v6057_v39  ;;  %v6074_v16 = vmul.f32 %v5890_v46, %v5932_v49 }
 0x2ee   :  { %2269 = vmatprep.subr.bf16.mxu1 %v1572_v0  ;;  %v737_v0 = vmul.f32 %v5692_v17, %v5856_v62  ;;  %8295 = vst [vmem:[#allocation37_spill] sm:$0xff] %v6125_v5  ;;  %v6160_v50 = vmul.f32 %v5943_v33, %v5958_v10  ;;  %v6168_v31 = vmul.f32 %v6125_v5, %v5841_v63 }
 0x2ef   :  { %997 = vrot.lane.b32.xlu1 %v598_v18, %s5358_s26  ;;  %8287 = vst [vmem:[#allocation29_spill] sm:$0xff] %v6074_v16 }
 0x2f0   :  { %v6044_v27 = vld [vmem:[#allocation2 + $0x30] sm:$0xff]  ;;  %v746_v48 = vpack.c.bf16 %v737_v0, %v734_v44  ;;  %v6094_v44 = vmul.f32 %v5890_v46, %v5963_v41  ;;  %v6098_v0 = vmul.f32 %v5899_v3, %v6015_v54  ;;  %8299 = vst [vmem:[#allocation41_spill] sm:$0xff] %v6160_v50 }
 0x2f1   :  { %8284 = vst [vmem:[#allocation26_spill] sm:$0xff] %v6044_v27  ;;  %950 = vrot.lane.b32.xlu0 %v936_v28, %s5362_s21  ;;  %v1565_v18 = vmul.f32 %v6044_v27, %v5636_v9  ;;  %v6117_v9 = vpack.c.bf16 %v5943_v33, %v5972_v37  ;;  %v6186_v27 = vmul.f32 %v5943_v33, %v5963_v41 }
 0x2f2   :  { %8291 = vst [vmem:[#allocation33_spill] sm:$0xff] %v6094_v44  ;;  %8292 = vst [vmem:[#allocation34_spill] sm:$0xff] %v6098_v0  ;;  %v925_v0 = vmul.f32 %v5832_v14, %v5856_v62 }
 0x2f3   :  { %688 = vrot.lane.b32.xlu1 %v676_v42, %s5359_s16  ;;  %v1571_v28 = vpack.c.bf16 %v1567_v43, %v1565_v18  ;;  %v6082_v42 = vmul.f32 %v5890_v46, %v5958_v10  ;;  %v6086_v18 = vmul.f32 %v5899_v3, %v5963_v41  ;;  %v856_v43 = vmul.f32 %v5828_v2, %v5856_v62 }
 0x2f4   :  { %8294 = vst [vmem:[#allocation36_spill] sm:$0xff] %v6117_v9  ;;  %v6133_v9 = vmul.f32 %v5972_v37, %v5932_v49  ;;  %v934_v44 = vpack.c.bf16 %v925_v0, %v922_v59  ;;  %v6190_v59 = vmul.f32 %v5972_v37, %v6015_v54  ;;  %v6263_v62 = vmul.f32 %v5890_v46, %v6125_v5 }
 0x2f5   :  { %8289 = vst [vmem:[#allocation31_spill] sm:$0xff] %v6082_v42  ;;  %8290 = vst [vmem:[#allocation32_spill] sm:$0xff] %v6086_v18  ;;  %615 = vrot.lane.b32.xlu0 %v6066_v24, %s5356_s15  ;;  %2270 = vmatpush1.bf16.msra.mxu1 %v1571_v28  ;;  %v6109_v28 = vpack.c.bf16 %v5909_v1, %v5925_v20  ;;  %v865_v11 = vpack.c.bf16 %v856_v43, %v853_v6 }
 0x2f6   :  { %8296 = vst [vmem:[#allocation38_spill] sm:$0xff] %v6133_v9  ;;  %v6137_v18 = vmul.f32 %v5943_v33, %v5932_v49  ;;  %v672_v6 = vmul.f32 %v5925_v20, %v5694_v19  ;;  %v668_v43 = vmul.f32 %v5932_v49, %v5841_v63  ;;  %v6156_v42 = vmul.f32 %v5972_v37, %v5958_v10 }
 0x2f7   :  { %758 = vrot.lane.b32.xlu1 %v746_v48, %s5360_s17  ;;  %v6141_v48 = vpack.c.bf16 %v5861_v35, %v5869_v53  ;;  %v735_v49 = vmul.f32 %v5958_v10, %v5845_v8  ;;  %v675_v9 = vmul.f32 %v5909_v1, %v5694_v19  ;;  %v6280_v46 = vmul.f32 %v5943_v33, %v6125_v5 }
 0x2f8   :  { %8297 = vst [vmem:[#allocation39_spill] sm:$0xff] %v6137_v18  ;;  %8298 = vst [vmem:[#allocation40_spill] sm:$0xff] %v6156_v42  ;;  %v677_v16 = vpack.c.bf16 %v668_v43, %v665_v52  ;;  %v745_v52 = vmul.f32 %v5909_v1, %v5696_v21  ;;  %v6182_v18 = vmul.f32 %v5972_v37, %v5963_v41 }
 0x2f9   :  { %817 = vrot.lane.b32.xlu0 %v6109_v28, %s5357_s3  ;;  %v681_v0 = vpack.c.bf16 %v675_v9, %v672_v6  ;;  %v6195_v43 = vmul.f32 %v5943_v33, %v6015_v54  ;;  %v6199_v42 = vmul.f32 %v6125_v5, %v5845_v8  ;;  %v6213_v9 = vmul.f32 %v5834_v30, %v5866_v12 }
 0x2fa   :  { %v751_v39 = vpack.c.bf16 %v745_v52, %v742_v55  ;;  %v6232_v52 = vmul.f32 %v6125_v5, %v5861_v35  ;;  %v6240_v6 = vmul.f32 %v5836_v15, %v5909_v1  ;;  %v6251_v35 = vmul.f32 %v5834_v30, %v5887_v45  ;;  %v6300_v55 = vld [vmem:[#allocation2 + $0x28] sm:$0xff] }
 0x2fb   :  { %877 = vrot.lane.b32.xlu1 %v865_v11, %s5361_s20  ;;  %v738_v11 = vmul.f32 %v5958_v10, %v5841_v63  ;;  %v861_v10 = vmul.f32 %v5925_v20, %v5826_v34  ;;  %v6255_v12 = vmul.f32 %v5899_v3, %v6125_v5  ;;  %v854_v3 = vmul.f32 %v5963_v41, %v5845_v8 }
 0x2fc   :  { %v923_v33 = vmul.f32 %v6015_v54, %v5845_v8  ;;  %v673_v8 = vmul.f32 %v5688_v13, %v5887_v45 }
 0x2fd   :  { %617 = vrot.lane.b32.xlu0 %v6141_v48, %s5356_s15  ;;  %v747_v50 = vpack.c.bf16 %v738_v11, %v735_v49  ;;  %v930_v11 = vmul.f32 %v5925_v20, %v5830_v40 }
 0x2ff   :  { %946 = vrot.lane.b32.xlu1 %v934_v44, %s5362_s21  ;;  %v6209_v44 = vmul.f32 %v5836_v15, %v5854_v38  ;;  %v6226_v38 = vmul.f32 %v6125_v5, %v5869_v53  ;;  %v6247_v53 = vmul.f32 %v5834_v30, %v5896_v7  ;;  %v864_v30 = vmul.f32 %v5909_v1, %v5826_v34 }
 0x301   :  { %698 = vrot.lane.b32.xlu0 %v681_v0, %s5359_s16  ;;  %v6236_v0 = vmul.f32 %v5836_v15, %v5925_v20  ;;  %v870_v49 = vpack.c.bf16 %v864_v30, %v861_v10  ;;  %v933_v15 = vmul.f32 %v5909_v1, %v5830_v40  ;;  %v926_v30 = vmul.f32 %v6015_v54, %v5841_v63  ;;  %v6297_v10 = vld [vmem:[#allocation2 + $0x10] sm:$0xff] }
 0x302   :  { %v6305_v1 = vpack.c.bf16 %v6300_v55, %v6297_v10 }
 0x303   :  { %690 = vrot.lane.b32.xlu1 %v677_v16, %s5359_s16  ;;  %v6276_v16 = vmul.f32 %v5972_v37, %v6125_v5  ;;  %v935_v20 = vpack.c.bf16 %v926_v30, %v923_v33 }
 0x305   :  { %768 = vrot.lane.b32.xlu0 %v751_v39, %s5360_s17  ;;  %v857_v39 = vmul.f32 %v5963_v41, %v5841_v63  ;;  %v670_v63 = vmul.f32 %v5688_v13, %v5896_v7 }
 0x307   :  { %760 = vrot.lane.b32.xlu1 %v747_v50, %s5360_s17  ;;  %v866_v37 = vpack.c.bf16 %v857_v39, %v854_v3  ;;  %v939_v50 = vpack.c.bf16 %v933_v15, %v930_v11  ;;  %v6313_v15 = vpack.c.bf16 %v5927_v47, %v5953_v32  ;;  %v1639_v3 = vmul.f32 %v6297_v10, %v5694_v19 }
 0x308   :  { %v740_v39 = vmul.f32 %v5692_v17, %v5896_v7  ;;  %v1642_v11 = vmul.f32 %v6300_v55, %v5694_v19 }
 0x309   :  { %887 = vrot.lane.b32.xlu0 %v870_v49, %s5361_s20  ;;  %v679_v49 = vpack.c.bf16 %v673_v8, %v670_v63  ;;  %v1699_v63 = vmul.f32 %v6297_v10, %v5696_v21  ;;  %v8300_v8 = vpack.c.bf16 %v5940_v23, %v5936_v22  ;;  %v1810_v22 = vmul.f32 %v6300_v55, %v5826_v34 }
 0x30a   :  { %v1651_v33 = vpack.c.bf16 %v1642_v11, %v1639_v3  ;;  %v8301_v11 = vpack.c.bf16 %v5969_v36, %v5951_v25  ;;  %v8302_v23 = vpack.c.bf16 %v5997_v51, %v5993_v60  ;;  %v1808_v25 = vmul.f32 %v5927_v47, %v5828_v2 }
 0x30b   :  { %879 = vrot.lane.b32.xlu1 %v866_v37, %s5361_s20  ;;  %v743_v37 = vmul.f32 %v5692_v17, %v5887_v45  ;;  %v1702_v45 = vmul.f32 %v6300_v55, %v5696_v21  ;;  %v8303_v36 = vpack.c.bf16 %v6007_v4, %v6003_v56  ;;  %v1870_v60 = vmul.f32 %v6300_v55, %v5830_v40  ;;  %v8305_v4 = vld [vmem:[#allocation25_spill] sm:$0xff] }
 0x30c   :  { %v8304_v51 = vpack.c.bf16 %v6031_v57, %v6027_v58  ;;  %v1868_v56 = vmul.f32 %v5927_v47, %v5832_v14  ;;  %v6401_v58 = vld [vmem:[#allocation2 + $0x58] sm:$0xff]  ;;  %v8307_v57 = vld [vmem:[#allocation27_spill] sm:$0xff] }
 0x30d   :  { %956 = vrot.lane.b32.xlu0 %v939_v50, %s5362_s21  ;;  %v1637_v50 = vmul.f32 %v5953_v32, %v5688_v13  ;;  %v749_v30 = vpack.c.bf16 %v743_v37, %v740_v39  ;;  %v1711_v3 = vpack.c.bf16 %v1702_v45, %v1699_v63  ;;  %v1700_v39 = vmul.f32 %v5927_v47, %v5692_v17 }
 0x30e   :  { %v1865_v45 = vmul.f32 %v5953_v32, %v5832_v14 }
 0x30f   :  { %948 = vrot.lane.b32.xlu1 %v935_v20, %s5362_s21  ;;  %v1640_v20 = vmul.f32 %v5927_v47, %v5688_v13 }
 0x311   :  { %1605 = vrot.lane.b32.xlu0 %v6305_v1, %s5356_s15  ;;  %v1649_v7 = vpack.c.bf16 %v1640_v20, %v1637_v50 }
 0x313   :  { %619 = vrot.lane.b32.xlu1 %v6109_v28, %s5356_s15 }
 0x315   :  { %1601 = vrot.lane.b32.xlu0 %v6313_v15, %s5356_s15 }
 0x317   :  { %813 = vrot.lane.b32.xlu1 %v6066_v24, %s5357_s3 }
 0x319   :  { %1773 = vrot.lane.b32.xlu0 %v6305_v1, %s5357_s3 }
 0x31b   :  { %815 = vrot.lane.b32.xlu1 %v6141_v48, %s5357_s3 }
 0x31d   :  { %1769 = vrot.lane.b32.xlu0 %v6313_v15, %s5357_s3 }
 0x31f   :  { %694 = vrot.lane.b32.xlu1 %v679_v49, %s5359_s16  ;;  %v1697_v49 = vmul.f32 %v5953_v32, %v5692_v17 }
 0x321   :  { %1665 = vrot.lane.b32.xlu0 %v1651_v33, %s5359_s16  ;;  %v1709_v37 = vpack.c.bf16 %v1700_v39, %v1697_v49  ;;  %v1807_v33 = vmul.f32 %v6297_v10, %v5826_v34  ;;  %v6398_v49 = vld [vmem:[#allocation2 + $0x40] sm:$0xff] }
 0x322   :  { %v6407_v39 = vpack.c.bf16 %v6401_v58, %v6398_v49 }
 0x323   :  { %764 = vrot.lane.b32.xlu1 %v749_v30, %s5360_s17  ;;  %v1819_v50 = vpack.c.bf16 %v1810_v22, %v1807_v33  ;;  %v1805_v30 = vmul.f32 %v5953_v32, %v5828_v2  ;;  %v8310_v33 = vld [vmem:[#allocation29_spill] sm:$0xff]  ;;  %v8311_v22 = vld [vmem:[#allocation28_spill] sm:$0xff] }
 0x325   :  { %1661 = vrot.lane.b32.xlu0 %v1649_v7, %s5359_s16  ;;  %v1817_v20 = vpack.c.bf16 %v1808_v25, %v1805_v30  ;;  %v1867_v7 = vmul.f32 %v6297_v10, %v5830_v40  ;;  %v8314_v30 = vld [vmem:[#allocation30_spill] sm:$0xff] }
 0x327   :  { %883 = vrot.lane.b32.xlu1 %v8300_v8, %s5361_s20  ;;  %v1879_v63 = vpack.c.bf16 %v1870_v60, %v1867_v7  ;;  %v8306_v8 = vpack.c.bf16 %v6040_v61, %v8305_v4  ;;  %v8308_v61 = vld [vmem:[#allocation26_spill] sm:$0xff]  ;;  %v1648_v60 = vmul.f32 %v6401_v58, %v5694_v19 }
 0x329   :  { %1725 = vrot.lane.b32.xlu0 %v1711_v3, %s5360_s17  ;;  %v1877_v3 = vpack.c.bf16 %v1868_v56, %v1865_v45 }
 0x32b   :  { %952 = vrot.lane.b32.xlu1 %v8301_v11, %s5362_s21  ;;  %v8309_v11 = vld [vmem:[#allocation24_spill] sm:$0xff] }
 0x32d   :  { %1721 = vrot.lane.b32.xlu0 %v1709_v37, %s5360_s17  ;;  %v6415_v37 = vpack.c.bf16 %v8309_v11, %v8308_v61 }
 0x32f   :  { %696 = vrot.lane.b32.xlu1 %v8302_v23, %s5359_s16  ;;  %v8312_v23 = vpack.c.bf16 %v8310_v33, %v8311_v22  ;;  %v1646_v33 = vmul.f32 %v8309_v11, %v5688_v13  ;;  %v8319_v22 = vld [vmem:[#allocation35_spill] sm:$0xff] }
 0x331   :  { %1833 = vrot.lane.b32.xlu0 %v1819_v50, %s5361_s20  ;;  %v8313_v50 = vld [vmem:[#allocation31_spill] sm:$0xff] }
 0x332   :  { %v8315_v25 = vpack.c.bf16 %v8313_v50, %v8314_v30 }
 0x333   :  { %766 = vrot.lane.b32.xlu1 %v8303_v36, %s5360_s17 }
 0x335   :  { %1829 = vrot.lane.b32.xlu0 %v1817_v20, %s5361_s20  ;;  %v1645_v20 = vmul.f32 %v6398_v49, %v5694_v19 }
 0x337   :  { %885 = vrot.lane.b32.xlu1 %v8304_v51, %s5361_s20  ;;  %v8316_v51 = vld [vmem:[#allocation33_spill] sm:$0xff]  ;;  %v1654_v4 = vpack.c.bf16 %v1648_v60, %v1645_v20  ;;  %v1705_v20 = vmul.f32 %v6398_v49, %v5696_v21 }
 0x339   :  { %1893 = vrot.lane.b32.xlu0 %v1879_v63, %s5362_s21  ;;  %v8317_v63 = vld [vmem:[#allocation32_spill] sm:$0xff] }
 0x33a   :  { %v8318_v45 = vpack.c.bf16 %v8316_v51, %v8317_v63  ;;  %v1708_v51 = vmul.f32 %v6401_v58, %v5696_v21  ;;  %v8322_v63 = vld [vmem:[#allocation36_spill] sm:$0xff] }
 0x33b   :  { %954 = vrot.lane.b32.xlu1 %v8306_v8, %s5362_s21  ;;  %v1643_v8 = vmul.f32 %v8308_v61, %v5688_v13 }
 0x33d   :  { %1889 = vrot.lane.b32.xlu0 %v1877_v3, %s5362_s21 }
 0x33f   :  { %1603 = vrot.lane.b32.xlu1 %v8307_v57, %s5356_s15 }
 0x341   :  { %1611 = vrot.lane.b32.xlu0 %v6407_v39, %s5356_s15 }
 0x343   :  { %1771 = vrot.lane.b32.xlu1 %v8307_v57, %s5357_s3 }
 0x345   :  { %1607 = vrot.lane.b32.xlu0 %v6415_v37, %s5356_s15 }
 0x347   :  { %1663 = vrot.lane.b32.xlu1 %v8312_v23, %s5359_s16  ;;  %v8320_v23 = vld [vmem:[#allocation34_spill] sm:$0xff] }
 0x348   :  { %v8321_v50 = vpack.c.bf16 %v8319_v22, %v8320_v23  ;;  %v1706_v22 = vmul.f32 %v8309_v11, %v5692_v17 }
 0x349   :  { %1779 = vrot.lane.b32.xlu0 %v6407_v39, %s5357_s3 }
 0x34b   :  { %1723 = vrot.lane.b32.xlu1 %v8315_v25, %s5360_s17  ;;  %v614_v36 = vpop.permute.xlu0 %613  ;;  %v1652_v25 = vpack.c.bf16 %v1646_v33, %v1643_v8  ;;  %v1703_v8 = vmul.f32 %v8308_v61, %v5692_v17 }
 0x34d   :  { %v610_v7 = vpop.permute.xlu1 %609  ;;  %1775 = vrot.lane.b32.xlu0 %v6415_v37, %s5357_s3 }
 0x34f   :  { %1831 = vrot.lane.b32.xlu1 %v8318_v45, %s5361_s20  ;;  %v6439_v56 = vpop.permute.xlu0 %811 }
 0x351   :  { %v6443_v3 = vpop.permute.xlu1 %807  ;;  %1671 = vrot.lane.b32.xlu0 %v1654_v4, %s5359_s16  ;;  %v1714_v4 = vpack.c.bf16 %v1708_v51, %v1705_v20  ;;  %v1712_v20 = vpack.c.bf16 %v1706_v22, %v1703_v8  ;;  %v1813_v51 = vmul.f32 %v6398_v49, %v5826_v34  ;;  %v1811_v8 = vmul.f32 %v8308_v61, %v5828_v2 }
 0x353   :  { %1891 = vrot.lane.b32.xlu1 %v8321_v50, %s5362_s21  ;;  %v6452_v30 = vpop.permute.xlu0 %999 }
 0x355   :  { %v6456_v60 = vpop.permute.xlu1 %995  ;;  %1667 = vrot.lane.b32.xlu0 %v1652_v25, %s5359_s16 }
 0x357   :  { %1609 = vrot.lane.b32.xlu1 %v8322_v63, %s5356_s15  ;;  %v6463_v45 = vpop.permute.xlu0 %692 }
 0x359   :  { %v612_v33 = vpop.permute.xlu1 %611  ;;  %1731 = vrot.lane.b32.xlu0 %v1714_v4, %s5360_s17  ;;  %v8324_v4 = vld [vmem:[#allocation38_spill] sm:$0xff] }
 0x35a   :  { %v623_v23 = vsel %vm621_vm8, %v612_v33, %v614_v36  ;;  %v622_v50 = vsel %vm621_vm8, %v610_v7, %v612_v33  ;;  %v1816_v36 = vmul.f32 %v6401_v58, %v5826_v34  ;;  %v8323_v7 = vld [vmem:[#allocation39_spill] sm:$0xff] }
 0x35b   :  { %1777 = vrot.lane.b32.xlu1 %v8322_v63, %s5357_s3  ;;  %2165 = vmatprep.subr.bf16.mxu0 %v623_v23  ;;  %v6474_v25 = vpop.permute.xlu0 %762  ;;  %v8325_v33 = vpack.c.bf16 %v8323_v7, %v8324_v4 }
 0x35c   :  { %2166 = vmatpush1.bf16.msra.mxu0 %v622_v50  ;;  %v1822_v17 = vpack.c.bf16 %v1816_v36, %v1813_v51  ;;  %v1814_v50 = vmul.f32 %v8309_v11, %v5828_v2  ;;  %v8326_v51 = vld [vmem:[#allocation41_spill] sm:$0xff]  ;;  %v8327_v36 = vld [vmem:[#allocation40_spill] sm:$0xff] }
 0x35d   :  { %v6478_v13 = vpop.permute.xlu1 %809  ;;  %1727 = vrot.lane.b32.xlu0 %v1712_v20, %s5360_s17 }
 0x35e   :  { %v1820_v7 = vpack.c.bf16 %v1814_v50, %v1811_v8 }
 0x35f   :  { %1669 = vrot.lane.b32.xlu1 %v8325_v33, %s5359_s16  ;;  %v6487_v23 = vpop.permute.xlu0 %881  ;;  %v8328_v33 = vpack.c.bf16 %v8326_v51, %v8327_v36  ;;  %v1874_v36 = vmul.f32 %v8309_v11, %v5832_v14 }
 0x361   :  { %v6491_v22 = vpop.permute.xlu1 %997  ;;  %1839 = vrot.lane.b32.xlu0 %v1822_v17, %s5361_s20  ;;  %v1873_v17 = vmul.f32 %v6398_v49, %v5830_v40 }
 0x363   :  { %1003 = vrot.lane.b32.xlu1 %v6141_v48, %s5358_s26  ;;  %v6498_v20 = vpop.permute.xlu0 %950  ;;  %v1876_v48 = vmul.f32 %v6401_v58, %v5830_v40 }
 0x365   :  { %v689_v4 = vpop.permute.xlu1 %688  ;;  %1835 = vrot.lane.b32.xlu0 %v1820_v7, %s5361_s20  ;;  %v1882_v50 = vpack.c.bf16 %v1876_v48, %v1873_v17  ;;  %v1871_v7 = vmul.f32 %v8308_v61, %v5832_v14 }
 0x367   :  { %1729 = vrot.lane.b32.xlu1 %v8328_v33, %s5360_s17  ;;  %v616_v34 = vpop.permute.xlu0 %615  ;;  %v1880_v33 = vpack.c.bf16 %v1874_v36, %v1871_v7 }
 0x369   :  { %v6507_v5 = vpop.permute.xlu1 %758  ;;  %1005 = vrot.lane.b32.xlu0 %v6109_v28, %s5358_s26 }
 0x36b   :  { %1001 = vrot.lane.b32.xlu1 %v6066_v24, %s5358_s26  ;;  %v6515_v8 = vpop.permute.xlu0 %817  ;;  %v5098_v24 = vld [vmem:[%s8183_s4 + $0x4] ss:$12 sps:$4 sm:$0xff]  }
 0x36c   :  { %2193 = vmatprep.mubr.bf16.mxu0 %v5098_v24  ;;  %2299 = vmatprep.mubr.bf16.mxu1 %v5098_v24 }
 0x36d   :  { %v6519_v51 = vpop.permute.xlu1 %877  ;;  %1899 = vrot.lane.b32.xlu0 %v1882_v50, %s5362_s21 }
 0x36f   :  { %1939 = vrot.lane.b32.xlu1 %v8307_v57, %s5358_s26  ;;  %v618_v28 = vpop.permute.xlu0 %617  ;;  %v8329_v57 = vpack.c.bf16 %v6186_v27, %v6182_v18  ;;  %v8330_v27 = vpack.c.bf16 %v6195_v43, %v6190_v59  ;;  %v8333_v43 = vpack.c.bf16 %v6232_v52, %v6226_v38 }
 0x371   :  { %v6526_v2 = vpop.permute.xlu1 %946  ;;  %1895 = vrot.lane.b32.xlu0 %v1880_v33, %s5362_s21 }
 0x373   :  { %1937 = vrot.lane.b32.xlu1 %v6313_v15, %s5358_s26  ;;  %v6534_v17 = vpop.permute.xlu0 %698 }
 0x375   :  { %v691_v48 = vpop.permute.xlu1 %690  ;;  %1941 = vrot.lane.b32.xlu0 %v6305_v1, %s5358_s26 }
 0x376   :  { %v702_v38 = vsel %vm700_vm9, %v691_v48, %v6463_v45 }
 0x377   :  { %1837 = vrot.lane.b32.xlu1 %v8329_v57, %s5361_s20  ;;  %v6542_v50 = vpop.permute.xlu0 %768 }
 0x379   :  { %v6544_v7 = vpop.permute.xlu1 %760  ;;  %1945 = vrot.lane.b32.xlu0 %v8322_v63, %s5358_s26  ;;  %v8332_v63 = vpack.c.bf16 %v6168_v31, %v6199_v42  ;;  %v624_v31 = vsel %vm621_vm8, %v616_v34, %v618_v28 }
 0x37b   :  { %1947 = vrot.lane.b32.xlu1 %v6407_v39, %s5358_s26  ;;  %v6550_v15 = vpop.permute.xlu0 %887  ;;  %v8331_v39 = vpack.c.bf16 %v6209_v44, %v6205_v29  ;;  %v8334_v29 = vpack.c.bf16 %v6222_v26, %v6213_v9  ;;  %v8335_v44 = vld [vmem:[#allocation21_spill] sm:$0xff]  ;;  %v8336_v9 = vpack.c.bf16 %v6251_v35, %v6247_v53  ;;  %v8337_v26 = vpack.c.bf16 %v6240_v6, %v6236_v0  ;;  %v8338_v53 = vld [vmem:[#allocation20_spill] sm:$0xff] }
 0x37c   :  { %v1975_v24 = vmul.f32 %v6297_v10, %v8335_v44  ;;  %v1978_v34 = vmul.f32 %v6300_v55, %v8335_v44  ;;  %v701_v10 = vsel %vm700_vm9, %v689_v4, %v691_v48  ;;  %v1973_v35 = vmul.f32 %v5953_v32, %v8338_v53 }
 0x37d   :  { %v6552_v36 = vpop.permute.xlu1 %879  ;;  %1943 = vrot.lane.b32.xlu0 %v6415_v37, %s5358_s26  ;;  %v8339_v55 = vpack.c.bf16 %v6263_v62, %v6255_v12  ;;  %v1976_v0 = vmul.f32 %v5927_v47, %v8338_v53  ;;  %v1979_v4 = vmul.f32 %v8308_v61, %v8338_v53  ;;  %v1981_v32 = vmul.f32 %v6398_v49, %v8335_v44  ;;  %v2101_v49 = vld [vmem:[%s8184_s5] sm:$0xff] }
 0x37e   :  { %v1987_v45 = vpack.c.bf16 %v1978_v34, %v1975_v24  ;;  %v1982_v12 = vmul.f32 %v8309_v11, %v8338_v53  ;;  %v1984_v47 = vmul.f32 %v6401_v58, %v8335_v44  ;;  %v2104_v58 = vld [vmem:[%s8184_s5 + $0x18] sm:$0xff] }
 0x37f   :  { %1897 = vrot.lane.b32.xlu1 %v8330_v27, %s5362_s21  ;;  %v6560_v18 = vpop.permute.xlu0 %956  ;;  %v1985_v27 = vpack.c.bf16 %v1976_v0, %v1973_v35 }
 0x380   :  { %v1988_v61 = vpack.c.bf16 %v1982_v12, %v1979_v4 }
 0x381   :  { %v6562_v1 = vpop.permute.xlu1 %948  ;;  %1069 = vrot.lane.b32.xlu0 %v8331_v39, %s5363_s8  ;;  %v8340_v39 = vpack.c.bf16 %v6280_v46, %v6276_v16  ;;  %v2102_v16 = vld [vmem:[%s8184_s5 + $0x8] sm:$0xff] }
 0x383   :  { %1067 = vrot.lane.b32.xlu1 %v8332_v63, %s5363_s8  ;;  %v6572_v37 = vpop.permute.xlu0 %1605 }
 0x385   :  { %v620_v33 = vpop.permute.xlu1 %619  ;;  %1073 = vrot.lane.b32.xlu0 %v8333_v43, %s5363_s8 }
 0x386   :  { %v625_v59 = vsel %vm621_vm8, %v618_v28, %v620_v33  ;;  %v1990_v33 = vpack.c.bf16 %v1984_v47, %v1981_v32 }
 0x387   :  { %1065 = vrot.lane.b32.xlu1 %v8334_v29, %s5363_s8  ;;  %2167 = vmatprep.subr.bf16.mxu0 %v625_v59  ;;  %v6584_v42 = vpop.permute.xlu0 %1601  ;;  %v2103_v59 = vld [vmem:[%s8184_s5 + $0x10] sm:$0xff] }
 0x388   :  { %2168 = vmatpush1.bf16.msra.mxu0 %v624_v31 }
 0x389   :  { %v6590_v52 = vpop.permute.xlu1 %813  ;;  %2169 = vmatprep.subr.bf16.mxu0 %v702_v38  ;;  %1071 = vrot.lane.b32.xlu0 %v8336_v9, %s5363_s8 }
 0x38b   :  { %1075 = vrot.lane.b32.xlu1 %v8337_v26, %s5363_s8  ;;  %v6603_v28 = vpop.permute.xlu0 %1773  ;;  %v772_v26 = vsel %vm770_vm10, %v6544_v7, %v6474_v25  ;;  %v821_v25 = vsel %vm819_vm11, %v6478_v13, %v6439_v56 }
 0x38c   :  { %2170 = vmatpush1.bf16.msra.mxu0 %v701_v10 }
 0x38d   :  { %v6605_v57 = vpop.permute.xlu1 %815  ;;  %2001 = vrot.lane.b32.xlu0 %v1987_v45, %s5363_s8  ;;  %v771_v45 = vsel %vm770_vm10, %v6507_v5, %v6544_v7  ;;  %v820_v5 = vsel %vm819_vm11, %v6443_v3, %v6478_v13 }
 0x38e   :  { %v822_v13 = vsel %vm819_vm11, %v6590_v52, %v6605_v57 }
 0x38f   :  { %1999 = vrot.lane.b32.xlu1 %v8339_v55, %s5363_s8  ;;  %v6614_v6 = vpop.permute.xlu0 %1769 }
 0x391   :  { %v695_v48 = vpop.permute.xlu1 %694  ;;  %2005 = vrot.lane.b32.xlu0 %v8340_v39, %s5363_s8 }
 0x393   :  { %1997 = vrot.lane.b32.xlu1 %v1985_v27, %s5363_s8  ;;  %v6629_v62 = vpop.permute.xlu0 %1665 }
 0x395   :  { %v765_v63 = vpop.permute.xlu1 %764  ;;  %2003 = vrot.lane.b32.xlu0 %v1988_v61, %s5363_s8 }
 0x397   :  { %2007 = vrot.lane.b32.xlu1 %v1990_v33, %s5363_s8  ;;  %v6638_v46 = vpop.permute.xlu0 %1661 }
 0x399   :  { %v884_v11 = vpop.permute.xlu1 %883  ;;  %2112 = vperm.xlu0 %5095, %v2102_v16  }
 0x39b   :  { %2107 = vperm.xlu1 %5094, %v2101_v49   ;;  %v6646_v43 = vpop.permute.xlu0 %1725 }
 0x39d   :  { %v6651_v29 = vpop.permute.xlu1 %952  ;;  %2122 = vperm.xlu0 %5095, %v2104_v58  }
 0x39f   :  { %2117 = vperm.xlu1 %5094, %v2103_v59   ;;  %v6653_v31 = vpop.permute.xlu0 %1721 }
 0x3a1   :  { %v697_v24 = vpop.permute.xlu1 %696 }
 0x3a2   :  { %v704_v38 = vsel %vm700_vm9, %v697_v24, %v6534_v17  ;;  %v703_v9 = vsel %vm700_vm9, %v695_v48, %v697_v24 }
 0x3a3   :  { %2171 = vmatprep.subr.bf16.mxu0 %v704_v38  ;;  %v6658_v34 = vpop.permute.xlu0 %1833 }
 0x3a4   :  { %2172 = vmatpush1.bf16.msra.mxu0 %v703_v9 }
 0x3a5   :  { %v767_v10 = vpop.permute.xlu1 %766  ;;  %2173 = vmatprep.subr.bf16.mxu0 %v772_v26 }
 0x3a6   :  { %v774_v17 = vsel %vm770_vm10, %v767_v10, %v6542_v50  ;;  %v773_v0 = vsel %vm770_vm10, %v765_v63, %v767_v10  ;;  %v823_v50 = vsel %vm819_vm11, %v6605_v57, %v6515_v8  ;;  %v891_v8 = vsel %vm889_vm12, %v6552_v36, %v6487_v23 }
 0x3a7   :  { %v6666_v35 = vpop.permute.xlu0 %1829  ;;  %v960_v23 = vsel %vm958_vm13, %v6562_v1, %v6498_v20  ;;  %v1009_v20 = vsel %vm1007_vm14, %v6491_v22, %v6452_v30 }
 0x3a8   :  { %2174 = vmatpush1.bf16.msra.mxu0 %v771_v45 }
 0x3a9   :  { %v886_v55 = vpop.permute.xlu1 %885  ;;  %2175 = vmatprep.subr.bf16.mxu0 %v774_v17 }
 0x3aa   :  { %v893_v12 = vsel %vm889_vm12, %v886_v55, %v6550_v15  ;;  %v892_v57 = vsel %vm889_vm12, %v884_v11, %v886_v55 }
 0x3ab   :  { %v6671_v4 = vpop.permute.xlu0 %1893 }
 0x3ac   :  { %2176 = vmatpush1.bf16.msra.mxu0 %v773_v0 }
 0x3ad   :  { %v955_v48 = vpop.permute.xlu1 %954  ;;  %2177 = vmatprep.subr.bf16.mxu0 %v821_v25 }
 0x3ae   :  { %v962_v15 = vsel %vm958_vm13, %v955_v48, %v6560_v18  ;;  %v961_v33 = vsel %vm958_vm13, %v6651_v29, %v955_v48 }
 0x3af   :  { %v6679_v7 = vpop.permute.xlu0 %1889 }
 0x3b0   :  { %2178 = vmatpush1.bf16.msra.mxu0 %v820_v5 }
 0x3b1   :  { %v1604_v27 = vpop.permute.xlu1 %1603  ;;  %2179 = vmatprep.subr.bf16.mxu0 %v823_v50  ;;  %v5096_v50 = vld [vmem:[%s8183_s4] ss:$12 sps:$4 sm:$0xff]  }
 0x3b2   :  { %v1614_v39 = vsel %vm621_vm8, %v1604_v27, %v6572_v37  ;;  %v1613_v56 = vsel %vm621_vm8, %v6584_v42, %v1604_v27  ;;  %v890_v37 = vsel %vm889_vm12, %v6519_v51, %v6552_v36  ;;  %v959_v51 = vsel %vm958_vm13, %v6526_v2, %v6562_v1 }
 0x3b3   :  { %2271 = vmatprep.subr.bf16.mxu1 %v1614_v39  ;;  %v1612_v3 = vpop.permute.xlu0 %1611  ;;  %v1008_v2 = vsel %vm1007_vm14, %v6456_v60, %v6491_v22 }
 0x3b4   :  { %2180 = vmatpush1.bf16.msra.mxu0 %v822_v13  ;;  %2272 = vmatpush1.bf16.msra.mxu1 %v1613_v56 }
 0x3b5   :  { %v6694_v32 = vpop.permute.xlu1 %1771  ;;  %2181 = vmatprep.subr.bf16.mxu0 %v891_v8 }
 0x3b6   :  { %v1782_v48 = vsel %vm819_vm11, %v6694_v32, %v6603_v28  ;;  %v1781_v27 = vsel %vm819_vm11, %v6614_v6, %v6694_v32  ;;  %v5099_v28 = vld [vmem:[%s8183_s4 + $0x1c] ss:$12 sps:$4 sm:$0xff]  }
 0x3b7   :  { %v1608_v42 = vpop.permute.xlu0 %1607 }
 0x3b8   :  { %2182 = vmatpush1.bf16.msra.mxu0 %v890_v37  ;;  %v5101_v37 = vld [vmem:[%s8183_s4 + $0x18] ss:$12 sps:$4 sm:$0xff]  }
 0x3b9   :  { %v1664_v52 = vpop.permute.xlu1 %1663  ;;  %2183 = vmatprep.subr.bf16.mxu0 %v893_v12 }
 0x3ba   :  { %v1674_v30 = vsel %vm700_vm9, %v1664_v52, %v6629_v62  ;;  %v1673_v24 = vsel %vm700_vm9, %v6638_v46, %v1664_v52 }
 0x3bb   :  { %v6702_v47 = vpop.permute.xlu0 %1779 }
 0x3bc   :  { %2184 = vmatpush1.bf16.msra.mxu0 %v892_v57 }
 0x3bd   :  { %v1724_v61 = vpop.permute.xlu1 %1723  ;;  %2185 = vmatprep.subr.bf16.mxu0 %v960_v23  ;;  %v8341_v23 = vmov 0  }
 0x3be   :  { %v1734_v10 = vsel %vm770_vm10, %v1724_v61, %v6646_v43  ;;  %v1733_v62 = vsel %vm770_vm10, %v6653_v31, %v1724_v61 }
 0x3bf   :  { %v1776_v36 = vpop.permute.xlu0 %1775 }
 0x3c0   :  { %2186 = vmatpush1.bf16.msra.mxu0 %v959_v51 }
 0x3c1   :  { %v6712_v63 = vpop.permute.xlu1 %1831  ;;  %2187 = vmatprep.subr.bf16.mxu0 %v962_v15 }
 0x3c2   :  { %v1842_v6 = vsel %vm889_vm12, %v6712_v63, %v6658_v34 }
 0x3c3   :  { %v1672_v16 = vpop.permute.xlu0 %1671 }
 0x3c4   :  { %2188 = vmatpush1.bf16.msra.mxu0 %v961_v33 }
 0x3c5   :  { %v6719_v49 = vpop.permute.xlu1 %1891  ;;  %2189 = vmatprep.subr.bf16.mxu0 %v1009_v20 }
 0x3c6   :  { %v1902_v61 = vsel %vm958_vm13, %v6719_v49, %v6671_v4 }
 0x3c7   :  { %v1668_v18 = vpop.permute.xlu0 %1667 }
 0x3c8   :  { %2190 = vmatpush1.bf16.msra.mxu0 %v1008_v2 }
 0x3c9   :  { %v1610_v1 = vpop.permute.xlu1 %1609 }
 0x3ca   :  { %v1616_v11 = vsel %vm621_vm8, %v1610_v1, %v1612_v3  ;;  %v1615_v58 = vsel %vm621_vm8, %v1608_v42, %v1610_v1  ;;  %v1841_v42 = vsel %vm889_vm12, %v6666_v35, %v6712_v63  ;;  %v1901_v35 = vsel %vm958_vm13, %v6679_v7, %v6719_v49 }
 0x3cb   :  { %2273 = vmatprep.subr.bf16.mxu1 %v1616_v11  ;;  %v1732_v59 = vpop.permute.xlu0 %1731 }
 0x3cc   :  { %2274 = vmatpush1.bf16.msra.mxu1 %v1615_v58 }
 0x3cd   :  { %v1778_v29 = vpop.permute.xlu1 %1777  ;;  %2275 = vmatprep.subr.bf16.mxu1 %v1674_v30 }
 0x3ce   :  { %v1784_v56 = vsel %vm819_vm11, %v1778_v29, %v6702_v47  ;;  %v1783_v3 = vsel %vm819_vm11, %v1776_v36, %v1778_v29 }
 0x3cf   :  { %v1728_v38 = vpop.permute.xlu0 %1727 }
 0x3d0   :  { %2276 = vmatpush1.bf16.msra.mxu1 %v1673_v24 }
 0x3d1   :  { %v1670_v60 = vpop.permute.xlu1 %1669 }
 0x3d2   :  { %v1676_v22 = vsel %vm700_vm9, %v1670_v60, %v1672_v16  ;;  %v1675_v9 = vsel %vm700_vm9, %v1668_v18, %v1670_v60  ;;  %v5102_v60 = vld [vmem:[%s8183_s4 + $0x8] ss:$12 sps:$4 sm:$0xff]  }
 0x3d3   :  { %2277 = vmatprep.subr.bf16.mxu1 %v1676_v22  ;;  %v1840_v26 = vpop.permute.xlu0 %1839 }
 0x3d4   :  { %2278 = vmatpush1.bf16.msra.mxu1 %v1675_v9 }
 0x3d5   :  { %v1004_v45 = vpop.permute.xlu1 %1003  ;;  %2279 = vmatprep.subr.bf16.mxu1 %v1734_v10 }
 0x3d7   :  { %v1836_v17 = vpop.permute.xlu0 %1835 }
 0x3d8   :  { %2280 = vmatpush1.bf16.msra.mxu1 %v1733_v62 }
 0x3d9   :  { %v1730_v46 = vpop.permute.xlu1 %1729 }
 0x3da   :  { %v1736_v55 = vsel %vm770_vm10, %v1730_v46, %v1732_v59  ;;  %v1735_v0 = vsel %vm770_vm10, %v1728_v38, %v1730_v46 }
 0x3db   :  { %2281 = vmatprep.subr.bf16.mxu1 %v1736_v55  ;;  %v1006_v25 = vpop.permute.xlu0 %1005 }
 0x3dc   :  { %2282 = vmatpush1.bf16.msra.mxu1 %v1735_v0  ;;  %v1011_v43 = vsel %vm1007_vm14, %v1004_v45, %v1006_v25 }
 0x3dd   :  { %v1002_v5 = vpop.permute.xlu1 %1001  ;;  %2283 = vmatprep.subr.bf16.mxu1 %v1782_v48  ;;  %2191 = vmatprep.subr.bf16.mxu0 %v1011_v43 }
 0x3de   :  { %v1010_v31 = vsel %vm1007_vm14, %v1002_v5, %v1004_v45 }
 0x3df   :  { %2192 = vmatpush1.bf16.msra.mxu0 %v1010_v31  ;;  %v1900_v39 = vpop.permute.xlu0 %1899 }
 0x3e0   :  { %2284 = vmatpush1.bf16.msra.mxu1 %v1781_v27 }
 0x3e1   :  { %v1940_v13 = vpop.permute.xlu1 %1939  ;;  %2285 = vmatprep.subr.bf16.mxu1 %v1784_v56 }
 0x3e2   :  { %2194 = vmatmul.mubr.bf16.vlgmr.msra.gmra.mrb[8].mxu0 %v5096_v50 }
 0x3e3   :  { %v1896_v8 = vpop.permute.xlu0 %1895  ;;  %2203 = vmatprep.mubr.bf16.mxu0 %v5099_v28 }
 0x3e4   :  { %2286 = vmatpush1.bf16.msra.mxu1 %v1783_v3 }
 0x3e5   :  { %v1938_v32 = vpop.permute.xlu1 %1937  ;;  %2287 = vmatprep.subr.bf16.mxu1 %v1842_v6 }
 0x3e6   :  { %v1949_v18 = vsel %vm1007_vm14, %v1938_v32, %v1940_v13 }
 0x3e7   :  { %v1942_v12 = vpop.permute.xlu0 %1941 }
 0x3e8   :  { %2288 = vmatpush1.bf16.msra.mxu1 %v1841_v42  ;;  %v1950_v20 = vsel %vm1007_vm14, %v1940_v13, %v1942_v12 }
 0x3e9   :  { %v1838_v52 = vpop.permute.xlu1 %1837 }
 0x3ea   :  { %v1844_v57 = vsel %vm889_vm12, %v1838_v52, %v1840_v26  ;;  %v1843_v47 = vsel %vm889_vm12, %v1836_v17, %v1838_v52  ;;  %2204 = vmatmul.mubr.bf16.gmra.mrb[12].mxu0 %v5101_v37  ;;  %v5103_v17 = vld [vmem:[%s8183_s4 + $0x20] ss:$12 sps:$4 sm:$0xff]  }
 0x3eb   :  { %2289 = vmatprep.subr.bf16.mxu1 %v1844_v57  ;;  %v1946_v34 = vpop.permute.xlu0 %1945  ;;  %2246 = vmatprep.mubr.bf16.mxu0 %v8341_v23 }
 0x3ec   :  { %2290 = vmatpush1.bf16.msra.mxu1 %v1843_v47 }
 0x3ed   :  { %v1948_v51 = vpop.permute.xlu1 %1947  ;;  %2291 = vmatprep.subr.bf16.mxu1 %v1902_v61 }
 0x3ee   :  { %v1952_v49 = vsel %vm1007_vm14, %v1946_v34, %v1948_v51 }
 0x3ef   :  { %v1944_v36 = vpop.permute.xlu0 %1943 }
 0x3f0   :  { %2292 = vmatpush1.bf16.msra.mxu1 %v1901_v35  ;;  %v1951_v58 = vsel %vm1007_vm14, %v1944_v36, %v1946_v34 }
 0x3f1   :  { %v1898_v15 = vpop.permute.xlu1 %1897 }
 0x3f2   :  { %v1904_v63 = vsel %vm958_vm13, %v1898_v15, %v1900_v39  ;;  %v1903_v33 = vsel %vm958_vm13, %v1896_v8, %v1898_v15 }
 0x3f3   :  { %2293 = vmatprep.subr.bf16.mxu1 %v1904_v63  ;;  %v1070_v16 = vpop.permute.xlu0 %1069 }
 0x3f4   :  { %2294 = vmatpush1.bf16.msra.mxu1 %v1903_v33 }
 0x3f5   :  { %v1068_v4 = vpop.permute.xlu1 %1067  ;;  %2295 = vmatprep.subr.bf16.mxu1 %v1950_v20 }
 0x3f6   :  { %v1079_v2 = vsel %vm1077_vm15, %v1068_v4, %v1070_v16 }
 0x3f7   :  { %2214 = vmatprep.subr.bf16.mxu0 %v1079_v2  ;;  %v1074_v7 = vpop.permute.xlu0 %1073 }
 0x3f8   :  { %2296 = vmatpush1.bf16.msra.mxu1 %v1949_v18 }
 0x3f9   :  { %v1066_v1 = vpop.permute.xlu1 %1065  ;;  %2297 = vmatprep.subr.bf16.mxu1 %v1952_v49 }
 0x3fa   :  { %v1078_v11 = vsel %vm1077_vm15, %v1066_v1, %v1068_v4 }
 0x3fb   :  { %2215 = vmatpush1.bf16.msra.mxu0 %v1078_v11  ;;  %v1072_v59 = vpop.permute.xlu0 %1071 }
 0x3fc   :  { %2298 = vmatpush1.bf16.msra.mxu1 %v1951_v58  ;;  %v1080_v29 = vsel %vm1077_vm15, %v1072_v59, %v1074_v7 }
 0x3fd   :  { %v1076_v30 = vpop.permute.xlu1 %1075 }
 0x3fe   :  { %v1081_v24 = vsel %vm1077_vm15, %v1074_v7, %v1076_v30 }
 0x3ff   :  { %2216 = vmatprep.subr.bf16.mxu0 %v1081_v24  ;;  %2300 = vmatmul.mubr.bf16.vlgmr.msra.gmra.mrb[8].mxu1 %v5096_v50  ;;  %v2002_v38 = vpop.permute.xlu0 %2001 }
 0x400   :  { %2217 = vmatpush1.bf16.msra.mxu0 %v1080_v29  ;;  %2309 = vmatprep.mubr.bf16.mxu1 %v5099_v28 }
 0x401   :  { %v2000_v22 = vpop.permute.xlu1 %1999 }
 0x402   :  { %v2010_v9 = vsel %vm1077_vm15, %v2000_v22, %v2002_v38 }
 0x403   :  { %4730 = vmatmul.mubr.msk.bf16.vlgmr.msra.gmra.mrb[8].mxu0 %vm138_vm0, %v5102_v60  ;;  %2320 = vmatprep.subr.bf16.mxu1 %v2010_v9  ;;  %v2006_v26 = vpop.permute.xlu0 %2005 }
 0x404   :  { %2256 = vmatprep.mubr.bf16.mxu0 %v8341_v23 }
 0x405   :  { %v1998_v10 = vpop.permute.xlu1 %1997 }
 0x406   :  { %v2009_v45 = vsel %vm1077_vm15, %v1998_v10, %v2000_v22 }
 0x407   :  { %2310 = vmatmul.mubr.bf16.gmra.mrb[12].mxu1 %v5101_v37  ;;  %v2004_v62 = vpop.permute.xlu0 %2003 }
 0x408   :  { %2321 = vmatpush1.bf16.msra.mxu1 %v2009_v45  ;;  %2352 = vmatprep.mubr.bf16.mxu1 %v8341_v23  ;;  %v2011_v55 = vsel %vm1077_vm15, %v2004_v62, %v2006_v26 }
 0x409   :  { %v2008_v46 = vpop.permute.xlu1 %2007 }
 0x40a   :  { %v2012_v0 = vsel %vm1077_vm15, %v2006_v26, %v2008_v46 }
 0x40b   :  { %4731 = vmatmul.mubr.msk.bf16.gmra.mrb[12].mxu0 %vm138_vm0, %v5103_v17  ;;  %2322 = vmatprep.subr.bf16.mxu1 %v2012_v0 }
 0x40c   :  { %2323 = vmatpush1.bf16.msra.mxu1 %v2011_v55 }
 0x40f   :  { %4732 = vmatmul.mubr.msk.bf16.vlgmr.msra.gmra.mrb[8].mxu1 %vm138_vm0, %v5102_v60 }
 0x410   :  { %2362 = vmatprep.mubr.bf16.mxu1 %v8341_v23 }
 0x417   :  { %4733 = vmatmul.mubr.msk.bf16.gmra.mrb[12].mxu1 %vm138_vm0, %v5103_v17 }
 0x418   :  { %v2113_v31 = vpop.permute.xlu0 %2112 }
 0x41a   :  { %v2108_v25 = vpop.permute.xlu1 %2107 }
 0x41c   :  { %v2123_v47 = vpop.permute.xlu0 %2122 }
 0x41e   :  { %v2118_v52 = vpop.permute.xlu1 %2117 }
 0x4d6   :  { %v2248_v48 = vpop.f32.mrb[8].mxu0 }
 0x4d7   :  { %v6800_v43 = vadd.f32 %v2248_v48, %v2108_v25  ;;  %v2250_v5 = vpop.f32.mrb[9].mxu0 }
 0x4d8   :  { %v6802_v50 = vadd.f32 %v2250_v5, %v2108_v25  ;;  %v2252_v27 = vpop.f32.mrb[10].mxu0 }
 0x4d9   :  { %v6804_v39 = vadd.f32 %v2252_v27, %v2113_v31  ;;  %v2254_v28 = vpop.f32.mrb[11].mxu0  ;;  %v2421_v8 = vmul.f32 %v6800_v43, %v6800_v43 }
 0x4da   :  { %v6806_v56 = vadd.f32 %v2254_v28, %v2113_v31  ;;  %v2409_v13 = vadd.f32 %v6802_v50, %v6800_v43  ;;  %v2422_v6 = vmul.f32 %v6802_v50, %v6802_v50 }
 0x4db   :  { %v2423_v3 = vmul.f32 %v6804_v39, %v6804_v39 }
 0x4dc   :  { %v2424_v32 = vmul.f32 %v6806_v56, %v6806_v56  ;;  %2410 = vadd.xlane.f32.xlu1 %v2409_v13  ;;  %v2412_v37 = vadd.f32 %v6806_v56, %v6804_v39  ;;  %v2429_v35 = vadd.f32 %v2422_v6, %v2421_v8 }
 0x4de   :  { %v2258_v42 = vpop.f32.mrb[12].mxu0  ;;  %2413 = vadd.xlane.f32.xlu0 %v2412_v37  ;;  %v2432_v12 = vadd.f32 %v2424_v32, %v2423_v3 }
 0x4df   :  { %v2260_v57 = vpop.f32.mrb[13].mxu0  ;;  %v6820_v34 = vadd.f32 %v2258_v42, %v2118_v52 }
 0x4e0   :  { %v6822_v61 = vadd.f32 %v2260_v57, %v2118_v52  ;;  %v2262_v51 = vpop.f32.mrb[14].mxu0  ;;  %2433 = vadd.xlane.f32.xlu1 %v2432_v12  ;;  %v6880_v12 = vld [vmem:[#allocation8] sm:$0xff] }
 0x4e1   :  { %v6824_v36 = vadd.f32 %v2262_v51, %v2123_v47  ;;  %v2264_v15 = vpop.f32.mrb[15].mxu0  ;;  %v2425_v58 = vmul.f32 %v6820_v34, %v6820_v34  ;;  %4896 = vmatprep.mubr.msk.f32.mxu0 %vm138_vm0, %v6880_v12  ;;  %4910 = vmatprep.mubr.msk.f32.mxu1 %vm138_vm0, %v6880_v12  ;;  %v2405_v57 = vld [vmem:[%s8186_s7] sm:$0xff]  ;;  %v2403_v51 = vld [vmem:[%s8185_s6 + $0x10] sm:$0xff] }
 0x4e2   :  { %v6826_v63 = vadd.f32 %v2264_v15, %v2123_v47  ;;  %v2354_v33 = vpop.f32.mrb[8].mxu1  ;;  %2430 = vadd.xlane.f32.xlu0 %v2429_v35  ;;  %v2415_v18 = vadd.f32 %v6822_v61, %v6820_v34  ;;  %v2426_v59 = vmul.f32 %v6822_v61, %v6822_v61  ;;  %v2406_v35 = vld [vmem:[%s8186_s7 + $0x8] sm:$0xff]  ;;  %v6904_v15 = vld [vmem:[%s8186_s7 + $0x10] sm:$0xff] }
 0x4e3   :  { %v2356_v16 = vpop.f32.mrb[9].mxu1  ;;  %v6828_v20 = vadd.f32 %v2354_v33, %v2108_v25  ;;  %v2427_v30 = vmul.f32 %v6824_v36, %v6824_v36  ;;  %v2404_v33 = vld [vmem:[%s8185_s6 + $0x18] sm:$0xff] }
 0x4e4   :  { %v6830_v4 = vadd.f32 %v2356_v16, %v2108_v25  ;;  %v2358_v2 = vpop.f32.mrb[10].mxu1  ;;  %v2418_v7 = vadd.f32 %v6826_v63, %v6824_v36  ;;  %v2428_v29 = vmul.f32 %v6826_v63, %v6826_v63  ;;  %v2435_v26 = vadd.f32 %v2426_v59, %v2425_v58  ;;  %v6913_v16 = vld [vmem:[%s8186_s7 + $0x18] sm:$0xff] }
 0x4e5   :  { %v6836_v49 = vadd.f32 %v2358_v2, %v2113_v31  ;;  %v2360_v1 = vpop.f32.mrb[11].mxu1  ;;  %v3351_v22 = vmul.f32 %v6828_v20, %v6828_v20 }
 0x4e6   :  { %v6838_v11 = vadd.f32 %v2360_v1, %v2113_v31  ;;  %2416 = vadd.xlane.f32.xlu0 %v2415_v18  ;;  %2419 = vadd.xlane.f32.xlu1 %v2418_v7  ;;  %v3339_v24 = vadd.f32 %v6830_v4, %v6828_v20  ;;  %v3352_v10 = vmul.f32 %v6830_v4, %v6830_v4 }
 0x4e7   :  { %v3353_v45 = vmul.f32 %v6836_v49, %v6836_v49  ;;  %v2438_v46 = vadd.f32 %v2428_v29, %v2427_v30 }
 0x4e8   :  { %v3342_v38 = vadd.f32 %v6838_v11, %v6836_v49  ;;  %v3354_v62 = vmul.f32 %v6838_v11, %v6838_v11  ;;  %v3359_v31 = vadd.f32 %v3352_v10, %v3351_v22  ;;  %v2398_v22 = vld [vmem:[#allocation8 + $0x8] sm:$0xff] }
 0x4ea   :  { %v2364_v60 = vpop.f32.mrb[12].mxu1  ;;  %3340 = vadd.xlane.f32.xlu0 %v3339_v24  ;;  %3343 = vadd.xlane.f32.xlu1 %v3342_v38  ;;  %v3362_v27 = vadd.f32 %v3354_v62, %v3353_v45  ;;  %v2400_v62 = vld [vmem:[#allocation8 + $0x18] sm:$0xff] }
 0x4eb   :  { %v2366_v9 = vpop.f32.mrb[13].mxu1  ;;  %v6860_v0 = vadd.f32 %v2364_v60, %v2118_v52 }
 0x4ec   :  { %v2368_v17 = vpop.f32.mrb[14].mxu1  ;;  %v6862_v25 = vadd.f32 %v2366_v9, %v2118_v52  ;;  %v2401_v52 = vld [vmem:[%s8185_s6] sm:$0xff] }
 0x4ed   :  { %v2370_v55 = vpop.f32.mrb[15].mxu1  ;;  %v6864_v48 = vadd.f32 %v2368_v17, %v2123_v47  ;;  %v3355_v28 = vmul.f32 %v6860_v0, %v6860_v0 }
 0x4ee   :  { %2436 = vadd.xlane.f32.xlu0 %v2435_v26  ;;  %2439 = vadd.xlane.f32.xlu1 %v2438_v46  ;;  %v6866_v5 = vadd.f32 %v2370_v55, %v2123_v47  ;;  %v3356_v13 = vmul.f32 %v6862_v25, %v6862_v25  ;;  %v3345_v6 = vadd.f32 %v6862_v25, %v6860_v0  ;;  %v2402_v47 = vld [vmem:[%s8185_s6 + $0x8] sm:$0xff]  ;;  %v2399_v26 = vld [vmem:[#allocation8 + $0x10] sm:$0xff] }
 0x4ef   :  { %v3357_v3 = vmul.f32 %v6864_v48, %v6864_v48 }
 0x4f0   :  { %v3358_v8 = vmul.f32 %v6866_v5, %v6866_v5  ;;  %v3348_v32 = vadd.f32 %v6866_v5, %v6864_v48  ;;  %v3365_v37 = vadd.f32 %v3356_v13, %v3355_v28 }
 0x4f2   :  { %3360 = vadd.xlane.f32.xlu0 %v3359_v31  ;;  %3363 = vadd.xlane.f32.xlu1 %v3362_v27  ;;  %v3368_v42 = vadd.f32 %v3358_v8, %v3357_v3 }
 0x4f6   :  { %3346 = vadd.xlane.f32.xlu0 %v3345_v6  ;;  %3349 = vadd.xlane.f32.xlu1 %v3348_v32 }
 0x4fa   :  { %3366 = vadd.xlane.f32.xlu0 %v3365_v37  ;;  %3369 = vadd.xlane.f32.xlu1 %v3368_v42 }
 0x50b   :  { %2697 = vperm.xlu1 %5094, %v2401_v52  }
 0x50f   :  { %2725 = vperm.xlu1 %5094, %v2405_v57  }
 0x510   :  { %2702 = vperm.xlu0 %5095, %v2402_v47  }
 0x513   :  { %2707 = vperm.xlu1 %5094, %v2403_v51  }
 0x514   :  { %2730 = vperm.xlu0 %5095, %v2406_v35  }
 0x517   :  { %2735 = vperm.xlu1 %5094, %v6904_v15  }
 0x518   :  { %2712 = vperm.xlu0 %5095, %v2404_v33  }
 0x51b   :  { %3627 = vperm.xlu1 %5094, %v2401_v52  }
 0x51c   :  { %2740 = vperm.xlu0 %5095, %v6913_v16  }
 0x51f   :  { %3655 = vperm.xlu1 %5094, %v2405_v57  }
 0x520   :  { %3632 = vperm.xlu0 %5095, %v2402_v47  }
 0x523   :  { %3637 = vperm.xlu1 %5094, %v2403_v51  }
 0x524   :  { %3660 = vperm.xlu0 %5095, %v2406_v35  }
 0x528   :  { %3642 = vperm.xlu0 %5095, %v2404_v33  }
 0x569   :  { %v2411_v2 = vpop.xlane.xlu1 %2410 }
 0x56b   :  { %v2414_v18 = vpop.xlane.xlu0 %2413 }
 0x56c   :  { %v4976_v7 = vpack.c.bf16 %v2414_v18, %v2411_v2 }
 0x56d   :  { %v2434_v1 = vpop.xlane.xlu1 %2433 }
 0x56e   :  { %4977 = vmatprep.subr.bf16.mxu0 %v4976_v7 }
 0x56f   :  { %v2431_v58 = vpop.xlane.xlu0 %2430  ;;  %4979 = vmatpush3.bf16.msra.mxu0 %v4976_v7 }
 0x570   :  { %v4984_v59 = vpack.c.bf16 %v2434_v1, %v2431_v58 }
 0x572   :  { %4985 = vmatprep.subr.bf16.mxu1 %v4984_v59 }
 0x573   :  { %v2417_v30 = vpop.xlane.xlu0 %2416  ;;  %4987 = vmatpush3.bf16.msra.mxu1 %v4984_v59  ;;  %v2420_v29 = vpop.xlane.xlu1 %2419 }
 0x574   :  { %v4980_v24 = vpack.c.bf16 %v2420_v29, %v2417_v30 }
 0x576   :  { %4981 = vmatprep.subr.bf16.mxu0 %v4980_v24 }
 0x577   :  { %v3341_v38 = vpop.xlane.xlu0 %3340  ;;  %4983 = vmatpush3.bf16.msra.mxu0 %v4980_v24  ;;  %v3344_v60 = vpop.xlane.xlu1 %3343 }
 0x578   :  { %v4992_v9 = vpack.c.bf16 %v3344_v60, %v3341_v38 }
 0x57a   :  { %4897 = vmatmul.mubr.msk.f32.vlgmr.msra.gmra.mrb[16].mxu0 %vm138_vm0, %v2398_v22  ;;  %4993 = vmatprep.subr.bf16.mxu0 %v4992_v9 }
 0x57b   :  { %v2437_v10 = vpop.xlane.xlu0 %2436  ;;  %4995 = vmatpush3.bf16.msra.mxu0 %v4992_v9  ;;  %v2440_v45 = vpop.xlane.xlu1 %2439  ;;  %4899 = vmatprep.mubr.msk.f32.mxu0 %vm138_vm0, %v2399_v26 }
 0x57c   :  { %v4988_v17 = vpack.c.bf16 %v2440_v45, %v2437_v10 }
 0x57e   :  { %4900 = vmatmul.mubr.msk.f32.gmra.mrb[18].mxu0 %vm138_vm0, %v2400_v62  ;;  %4989 = vmatprep.subr.bf16.mxu1 %v4988_v17 }
 0x57f   :  { %v3361_v46 = vpop.xlane.xlu0 %3360  ;;  %4991 = vmatpush3.bf16.msra.mxu1 %v4988_v17  ;;  %v3364_v55 = vpop.xlane.xlu1 %3363  ;;  %4924 = vmatprep.mubr.msk.f32.mxu0 %vm138_vm0, %v6880_v12 }
 0x580   :  { %v5000_v31 = vpack.c.bf16 %v3364_v55, %v3361_v46 }
 0x582   :  { %5001 = vmatprep.subr.bf16.mxu1 %v5000_v31  ;;  %4911 = vmatmul.mubr.msk.f32.vlgmr.msra.gmra.mrb[16].mxu1 %vm138_vm0, %v2398_v22 }
 0x583   :  { %v3347_v27 = vpop.xlane.xlu0 %3346  ;;  %5003 = vmatpush3.bf16.msra.mxu1 %v5000_v31  ;;  %v3350_v28 = vpop.xlane.xlu1 %3349  ;;  %4913 = vmatprep.mubr.msk.f32.mxu1 %vm138_vm0, %v2399_v26 }
 0x584   :  { %v4996_v13 = vpack.c.bf16 %v3350_v28, %v3347_v27 }
 0x586   :  { %4997 = vmatprep.subr.bf16.mxu0 %v4996_v13  ;;  %4914 = vmatmul.mubr.msk.f32.gmra.mrb[18].mxu1 %vm138_vm0, %v2400_v62 }
 0x587   :  { %v3367_v3 = vpop.xlane.xlu0 %3366  ;;  %4999 = vmatpush3.bf16.msra.mxu0 %v4996_v13  ;;  %v3370_v8 = vpop.xlane.xlu1 %3369  ;;  %4938 = vmatprep.mubr.msk.f32.mxu1 %vm138_vm0, %v6880_v12 }
 0x588   :  { %v5004_v6 = vpack.c.bf16 %v3370_v8, %v3367_v3 }
 0x58a   :  { %4925 = vmatmul.mubr.msk.f32.vlgmr.msra.gmra.mrb[20].mxu0 %vm138_vm0, %v2398_v22  ;;  %5005 = vmatprep.subr.bf16.mxu1 %v5004_v6 }
 0x58b   :  { %5007 = vmatpush3.bf16.msra.mxu1 %v5004_v6  ;;  %4927 = vmatprep.mubr.msk.f32.mxu0 %vm138_vm0, %v2399_v26 }
 0x58e   :  { %4928 = vmatmul.mubr.msk.f32.gmra.mrb[22].mxu0 %vm138_vm0, %v2400_v62  ;;  %4939 = vmatmul.mubr.msk.f32.vlgmr.msra.gmra.mrb[20].mxu1 %vm138_vm0, %v2398_v22 }
 0x58f   :  { %4941 = vmatprep.mubr.msk.f32.mxu1 %vm138_vm0, %v2399_v26 }
 0x592   :  { %4942 = vmatmul.mubr.msk.f32.gmra.mrb[22].mxu1 %vm138_vm0, %v2400_v62 }
 0x64d   :  { %v4898_v32 = vpop.f32.mrb[16].mxu0 }
 0x64e   :  { %2638 = vperm.xlu1 %5094, %v4898_v32   ;;  %v2519_v37 = vpop.f32.mrb[17].mxu0  ;;  %v2624_v12 = vmul.f32 %v4898_v32, %v4898_v32 }
 0x64f   :  { %2633 = vperm.xlu0 %5095, %v2519_v37   ;;  %v2623_v57 = vmul.f32 %v2519_v37, %v2519_v37 }
 0x651   :  { %v4901_v42 = vpop.f32.mrb[18].mxu0 }
 0x652   :  { %v2529_v52 = vpop.f32.mrb[19].mxu0  ;;  %v2626_v51 = vmul.f32 %v4901_v42, %v4901_v42 }
 0x653   :  { %2648 = vperm.xlu0 %5095, %v4901_v42   ;;  %2643 = vperm.xlu1 %5094, %v2529_v52   ;;  %v2625_v2 = vmul.f32 %v2529_v52, %v2529_v52 }
 0x655   :  { %v4912_v47 = vpop.f32.mrb[16].mxu1 }
 0x656   :  { %v2628_v35 = vsub.f32 %v4912_v47, %v2624_v12  ;;  %v2604_v33 = vpop.f32.mrb[17].mxu1 }
 0x657   :  { %v2627_v18 = vsub.f32 %v2604_v33, %v2623_v57 }
 0x658   :  { %v2660_v7 = vadd.f32 1e-05, %v2628_v35 }
 0x659   :  { %v2659_v1 = vadd.f32 1e-05, %v2627_v18  ;;  %v4915_v58 = vpop.f32.mrb[18].mxu1  ;;  %v2703_v18 = vpop.permute.xlu0 %2702 }
 0x65a   :  { %5192 = vrsqrt.f32 %v2660_v7  ;;  %v2630_v59 = vsub.f32 %v4915_v58, %v2626_v51  ;;  %v2614_v30 = vpop.f32.mrb[19].mxu1  ;;  %v2698_v7 = vpop.permute.xlu1 %2697 }
 0x65b   :  { %5194 = vrsqrt.f32 %v2659_v1  ;;  %v2629_v29 = vsub.f32 %v2614_v30, %v2625_v2 }
 0x65c   :  { %v2662_v24 = vadd.f32 1e-05, %v2630_v59 }
 0x65d   :  { %v2661_v38 = vadd.f32 1e-05, %v2629_v29  ;;  %v4926_v60 = vpop.f32.mrb[20].mxu0  ;;  %v2731_v1 = vpop.permute.xlu0 %2730 }
 0x65e   :  { %5196 = vrsqrt.f32 %v2662_v24  ;;  %3568 = vperm.xlu0 %5095, %v4926_v60   ;;  %v3449_v22 = vpop.f32.mrb[21].mxu0  ;;  %v3554_v9 = vmul.f32 %v4926_v60, %v4926_v60  ;;  %v2726_v58 = vpop.permute.xlu1 %2725 }
 0x65f   :  { %5198 = vrsqrt.f32 %v2661_v38  ;;  %3563 = vperm.xlu1 %5094, %v3449_v22   ;;  %v3553_v26 = vmul.f32 %v3449_v22, %v3449_v22 }
 0x661   :  { %v4929_v10 = vpop.f32.mrb[22].mxu0  ;;  %v4940_v45 = vpop.f32.mrb[20].mxu1 }
 0x662   :  { %v3558_v62 = vsub.f32 %v4940_v45, %v3554_v9  ;;  %3578 = vperm.xlu0 %5095, %v4929_v10   ;;  %v3459_v17 = vpop.f32.mrb[23].mxu0  ;;  %v3534_v46 = vpop.f32.mrb[21].mxu1  ;;  %v3556_v27 = vmul.f32 %v4929_v10, %v4929_v10 }
 0x663   :  { %v3557_v55 = vsub.f32 %v3534_v46, %v3553_v26  ;;  %3573 = vperm.xlu1 %5094, %v3459_v17   ;;  %v3555_v3 = vmul.f32 %v3459_v17, %v3459_v17  ;;  %v2713_v59 = vpop.permute.xlu0 %2712  ;;  %v2708_v30 = vpop.permute.xlu1 %2707 }
 0x664   :  { %v5193_v31 = vpop.eup %5192  ;;  %v3590_v28 = vadd.f32 1e-05, %v3558_v62 }
 0x665   :  { %v5195_v13 = vpop.eup %5194  ;;  %v3589_v8 = vadd.f32 1e-05, %v3557_v55  ;;  %v4943_v6 = vpop.f32.mrb[22].mxu1 }
 0x666   :  { %5200 = vrsqrt.f32 %v3590_v28  ;;  %v3560_v32 = vsub.f32 %v4943_v6, %v3556_v27  ;;  %2674 = vperm.xlu0 %5095, %v5193_v31   ;;  %v3544_v37 = vpop.f32.mrb[23].mxu1 }
 0x667   :  { %5202 = vrsqrt.f32 %v3589_v8  ;;  %v3559_v42 = vsub.f32 %v3544_v37, %v3555_v3  ;;  %2669 = vperm.xlu1 %5094, %v5195_v13   ;;  %v2741_v29 = vpop.permute.xlu0 %2740  ;;  %v6934_v24 = vpop.permute.xlu1 %2735 }
 0x668   :  { %v5197_v12 = vpop.eup %5196  ;;  %v3592_v52 = vadd.f32 1e-05, %v3560_v32 }
 0x669   :  { %v5199_v57 = vpop.eup %5198  ;;  %v3591_v47 = vadd.f32 1e-05, %v3559_v42 }
 0x66a   :  { %5204 = vrsqrt.f32 %v3592_v52  ;;  %2684 = vperm.xlu0 %5095, %v5197_v12  }
 0x66b   :  { %5206 = vrsqrt.f32 %v3591_v47  ;;  %2679 = vperm.xlu1 %5094, %v5199_v57   ;;  %v6936_v38 = vpop.permute.xlu0 %3632  ;;  %v6938_v60 = vpop.permute.xlu1 %3627 }
 0x66f   :  { %v6940_v22 = vpop.permute.xlu0 %3660  ;;  %v6942_v9 = vpop.permute.xlu1 %3655 }
 0x670   :  { %v5201_v51 = vpop.eup %5200 }
 0x671   :  { %v5203_v35 = vpop.eup %5202  ;;  %3604 = vperm.xlu0 %5095, %v5201_v51  }
 0x672   :  { %3599 = vperm.xlu1 %5094, %v5203_v35  }
 0x674   :  { %v5205_v33 = vpop.eup %5204 }
 0x675   :  { %v5207_v2 = vpop.eup %5206  ;;  %3614 = vperm.xlu0 %5095, %v5205_v33  }
 0x676   :  { %3609 = vperm.xlu1 %5094, %v5207_v2  }
 0x679   :  { %3670 = vperm.xlu0 %5095, %v6913_v16   ;;  %v6944_v16 = vpop.permute.xlu0 %3642 }
 0x67a   :  { %3665 = vperm.xlu1 %5094, %v6904_v15   ;;  %v6946_v15 = vpop.permute.xlu1 %3637 }
 0x6cd   :  { %v2639_v10 = vpop.permute.xlu1 %2638 }
 0x6ce   :  { %v2634_v26 = vpop.permute.xlu0 %2633  ;;  %v2653_v27 = vsub.f32 %v6804_v39, %v2639_v10  ;;  %v2654_v28 = vsub.f32 %v6806_v56, %v2639_v10 }
 0x6cf   :  { %v2651_v13 = vsub.f32 %v6800_v43, %v2634_v26  ;;  %v2652_v3 = vsub.f32 %v6802_v50, %v2634_v26 }
 0x6d2   :  { %v2649_v45 = vpop.permute.xlu0 %2648  ;;  %v2644_v62 = vpop.permute.xlu1 %2643 }
 0x6d3   :  { %v2657_v8 = vsub.f32 %v6824_v36, %v2649_v45  ;;  %v2658_v6 = vsub.f32 %v6826_v63, %v2649_v45  ;;  %v2655_v32 = vsub.f32 %v6820_v34, %v2644_v62  ;;  %v2656_v42 = vsub.f32 %v6822_v61, %v2644_v62 }
 0x6dd   :  { %v6948_v17 = vpop.permute.xlu0 %3568 }
 0x6de   :  { %v6950_v46 = vpop.permute.xlu1 %3563  ;;  %v3583_v12 = vsub.f32 %v6836_v49, %v6948_v17  ;;  %v3584_v43 = vsub.f32 %v6838_v11, %v6948_v17 }
 0x6df   :  { %v3581_v50 = vsub.f32 %v6828_v20, %v6950_v46  ;;  %v3582_v34 = vsub.f32 %v6830_v4, %v6950_v46 }
 0x6e1   :  { %v6952_v55 = vpop.permute.xlu0 %3578 }
 0x6e2   :  { %v6954_v31 = vpop.permute.xlu1 %3573  ;;  %v3587_v61 = vsub.f32 %v6864_v48, %v6952_v55  ;;  %v3588_v49 = vsub.f32 %v6866_v5, %v6952_v55 }
 0x6e3   :  { %v3585_v51 = vsub.f32 %v6860_v0, %v6954_v31 }
 0x6e5   :  { %v2675_v37 = vpop.permute.xlu0 %2674 }
 0x6e6   :  { %v2689_v52 = vmul.f32 %v2675_v37, %v2653_v27  ;;  %v2690_v39 = vmul.f32 %v2675_v37, %v2654_v28  ;;  %v2670_v57 = vpop.permute.xlu1 %2669 }
 0x6e7   :  { %v2687_v56 = vmul.f32 %v2670_v57, %v2651_v13  ;;  %v2688_v36 = vmul.f32 %v2670_v57, %v2652_v3 }
 0x6e8   :  { %v2717_v63 = vmul.f32 %v2703_v18, %v2689_v52  ;;  %v2718_v47 = vmul.f32 %v2703_v18, %v2690_v39 }
 0x6e9   :  { %v2715_v11 = vmul.f32 %v2698_v7, %v2687_v56  ;;  %v2716_v35 = vmul.f32 %v2698_v7, %v2688_v36  ;;  %v2685_v33 = vpop.permute.xlu0 %2684 }
 0x6ea   :  { %v6978_v20 = vadd.f32 %v2731_v1, %v2717_v63  ;;  %v6980_v2 = vadd.f32 %v2731_v1, %v2718_v47  ;;  %v2693_v26 = vmul.f32 %v2685_v33, %v2657_v8  ;;  %v2694_v4 = vmul.f32 %v2685_v33, %v2658_v6  ;;  %v2680_v10 = vpop.permute.xlu1 %2679 }
 0x6eb   :  { %v6982_v45 = vadd.f32 %v2726_v58, %v2715_v11  ;;  %v6984_v48 = vadd.f32 %v2726_v58, %v2716_v35  ;;  %v2691_v18 = vmul.f32 %v2680_v10, %v2655_v32  ;;  %v2692_v62 = vmul.f32 %v2680_v10, %v2656_v42 }
 0x6ec   :  { %v2753_v5 = vsub.f32 0.0, %v6978_v20  ;;  %v2754_v17 = vsub.f32 0.0, %v6980_v2  ;;  %v2721_v46 = vmul.f32 %v2713_v59, %v2693_v26  ;;  %v2722_v7 = vmul.f32 %v2713_v59, %v2694_v4 }
 0x6ed   :  { %v2751_v55 = vsub.f32 0.0, %v6982_v45  ;;  %v2752_v1 = vsub.f32 0.0, %v6984_v48  ;;  %v2719_v27 = vmul.f32 %v2708_v30, %v2691_v18  ;;  %v2720_v28 = vmul.f32 %v2708_v30, %v2692_v62 }
 0x6ee   :  { %v2763_v13 = vmul.f32 1.442695, %v2753_v5  ;;  %v2765_v3 = vmul.f32 1.442695, %v2754_v17  ;;  %v6990_v8 = vadd.f32 %v2741_v29, %v2721_v46  ;;  %v6992_v58 = vadd.f32 %v2741_v29, %v2722_v7 }
 0x6ef   :  { %v2759_v6 = vmul.f32 1.442695, %v2751_v55  ;;  %v2761_v32 = vmul.f32 1.442695, %v2752_v1  ;;  %v6995_v37 = vadd.f32 %v6934_v24, %v2719_v27  ;;  %v6998_v42 = vadd.f32 %v6934_v24, %v2720_v28 }
 0x6f0   :  { %v3586_v59 = vsub.f32 %v6862_v25, %v6954_v31  ;;  %5208 = vpow2.f32 %v2763_v13  ;;  %v2757_v30 = vsub.f32 0.0, %v6990_v8  ;;  %v2758_v52 = vsub.f32 0.0, %v6992_v58  ;;  %v3605_v39 = vpop.permute.xlu0 %3604 }
 0x6f1   :  { %5210 = vpow2.f32 %v2765_v3  ;;  %v2755_v29 = vsub.f32 0.0, %v6995_v37  ;;  %v2756_v57 = vsub.f32 0.0, %v6998_v42  ;;  %v3619_v56 = vmul.f32 %v3605_v39, %v3583_v12  ;;  %v3600_v36 = vpop.permute.xlu1 %3599 }
 0x6f2   :  { %5212 = vpow2.f32 %v2759_v6  ;;  %v2771_v63 = vmul.f32 1.442695, %v2757_v30  ;;  %v2773_v24 = vmul.f32 1.442695, %v2758_v52  ;;  %v3620_v47 = vmul.f32 %v3605_v39, %v3584_v43 }
 0x6f3   :  { %5214 = vpow2.f32 %v2761_v32  ;;  %v2767_v11 = vmul.f32 1.442695, %v2755_v29  ;;  %v2769_v25 = vmul.f32 1.442695, %v2756_v57  ;;  %v3647_v35 = vmul.f32 %v6936_v38, %v3619_v56 }
 0x6f4   :  { %5216 = vpow2.f32 %v2771_v63  ;;  %v3648_v33 = vmul.f32 %v6936_v38, %v3620_v47  ;;  %v3617_v26 = vmul.f32 %v3600_v36, %v3581_v50  ;;  %v3618_v4 = vmul.f32 %v3600_v36, %v3582_v34  ;;  %v3615_v10 = vpop.permute.xlu0 %3614 }
 0x6f5   :  { %5218 = vpow2.f32 %v2773_v24  ;;  %v7009_v18 = vadd.f32 %v6940_v22, %v3647_v35  ;;  %v3623_v12 = vmul.f32 %v3615_v10, %v3587_v61  ;;  %v3624_v62 = vmul.f32 %v3615_v10, %v3588_v49  ;;  %v3610_v5 = vpop.permute.xlu1 %3609 }
 0x6f6   :  { %5220 = vpow2.f32 %v2767_v11  ;;  %v7012_v43 = vadd.f32 %v6940_v22, %v3648_v33  ;;  %v3645_v17 = vmul.f32 %v6938_v60, %v3617_v26  ;;  %v3646_v46 = vmul.f32 %v6938_v60, %v3618_v4 }
 0x6f7   :  { %5222 = vpow2.f32 %v2769_v25  ;;  %v3683_v38 = vsub.f32 0.0, %v7009_v18  ;;  %v3621_v50 = vmul.f32 %v3610_v5, %v3585_v51  ;;  %v3622_v61 = vmul.f32 %v3610_v5, %v3586_v59 }
 0x6f8   :  { %v3684_v34 = vsub.f32 0.0, %v7012_v43  ;;  %v3651_v49 = vmul.f32 %v6944_v16, %v3623_v12  ;;  %v3671_v7 = vpop.permute.xlu0 %3670  ;;  %v7023_v22 = vadd.f32 %v6942_v9, %v3645_v17  ;;  %v7026_v60 = vadd.f32 %v6942_v9, %v3646_v46 }
 0x6f9   :  { %v3693_v55 = vmul.f32 1.442695, %v3683_v38  ;;  %v3652_v28 = vmul.f32 %v6944_v16, %v3624_v62  ;;  %v3649_v51 = vmul.f32 %v6946_v15, %v3621_v50  ;;  %v3650_v32 = vmul.f32 %v6946_v15, %v3622_v61  ;;  %v3666_v59 = vpop.permute.xlu1 %3665 }
 0x6fa   :  { %v5209_v1 = vpop.eup %5208  ;;  %v3695_v27 = vmul.f32 1.442695, %v3684_v34  ;;  %v7029_v31 = vadd.f32 %v3671_v7, %v3651_v49  ;;  %v3681_v9 = vsub.f32 0.0, %v7023_v22  ;;  %v3682_v29 = vsub.f32 0.0, %v7026_v60 }
 0x6fb   :  { %v5211_v13 = vpop.eup %5210  ;;  %v2777_v0 = vadd.f32 1.0, %v5209_v1  ;;  %5224 = vpow2.f32 %v3693_v55  ;;  %v7035_v57 = vadd.f32 %v3671_v7, %v3652_v28  ;;  %v7038_v24 = vadd.f32 %v3666_v59, %v3649_v51 }
 0x6fc   :  { %v5213_v3 = vpop.eup %5212  ;;  %v2778_v6 = vadd.f32 1.0, %v5211_v13  ;;  %5226 = vpow2.f32 %v3695_v27  ;;  %v3687_v63 = vsub.f32 0.0, %v7029_v31  ;;  %v7040_v11 = vadd.f32 %v3666_v59, %v3650_v32 }
 0x6fd   :  { %v5215_v30 = vpop.eup %5214  ;;  %5228 = vrcp.f32 %v2777_v0  ;;  %v2775_v52 = vadd.f32 1.0, %v5213_v3  ;;  %v3689_v33 = vmul.f32 1.442695, %v3681_v9  ;;  %v3691_v4 = vmul.f32 1.442695, %v3682_v29 }
 0x6fe   :  { %v5217_v39 = vpop.eup %5216  ;;  %5230 = vrcp.f32 %v2778_v6  ;;  %v2776_v16 = vadd.f32 1.0, %v5215_v30  ;;  %v3688_v10 = vsub.f32 0.0, %v7035_v57  ;;  %v3701_v12 = vmul.f32 1.442695, %v3687_v63 }
 0x6ff   :  { %v5219_v56 = vpop.eup %5218  ;;  %5232 = vrcp.f32 %v2775_v52  ;;  %v2781_v36 = vadd.f32 1.0, %v5217_v39  ;;  %v3685_v62 = vsub.f32 0.0, %v7038_v24  ;;  %v3686_v5 = vsub.f32 0.0, %v7040_v11 }
 0x700   :  { %v5221_v15 = vpop.eup %5220  ;;  %5234 = vrcp.f32 %v2776_v16  ;;  %v2782_v47 = vadd.f32 1.0, %v5219_v56  ;;  %v3703_v50 = vmul.f32 1.442695, %v3688_v10 }
 0x701   :  { %v5223_v25 = vpop.eup %5222  ;;  %5236 = vrcp.f32 %v2781_v36  ;;  %v2779_v35 = vadd.f32 1.0, %v5221_v15  ;;  %v3697_v49 = vmul.f32 1.442695, %v3685_v62  ;;  %v3699_v55 = vmul.f32 1.442695, %v3686_v5 }
 0x702   :  { %5238 = vrcp.f32 %v2782_v47  ;;  %v2780_v26 = vadd.f32 1.0, %v5223_v25 }
 0x703   :  { %5240 = vrcp.f32 %v2779_v35 }
 0x704   :  { %5242 = vrcp.f32 %v2780_v26 }
 0x705   :  { %v5225_v17 = vpop.eup %5224  ;;  %5244 = vpow2.f32 %v3689_v33 }
 0x706   :  { %v5227_v46 = vpop.eup %5226  ;;  %v3707_v38 = vadd.f32 1.0, %v5225_v17  ;;  %5246 = vpow2.f32 %v3691_v4 }
 0x707   :  { %v5229_v34 = vpop.eup %5228  ;;  %v3708_v61 = vadd.f32 1.0, %v5227_v46  ;;  %5248 = vpow2.f32 %v3701_v12 }
 0x708   :  { %v5231_v7 = vpop.eup %5230  ;;  %5250 = vrcp.f32 %v3707_v38  ;;  %v2793_v1 = vmul.f32 %v5229_v34, %v6978_v20 }
 0x709   :  { %v5233_v27 = vpop.eup %5232  ;;  %5252 = vrcp.f32 %v3708_v61  ;;  %v2794_v28 = vmul.f32 %v5231_v7, %v6980_v2 }
 0x70a   :  { %v5235_v13 = vpop.eup %5234  ;;  %5254 = vpow2.f32 %v3703_v50  ;;  %2811 = vrot.lane.b32.xlu1 %v2793_v1, %s5355_s14  ;;  %v2791_v3 = vmul.f32 %v5233_v27, %v6982_v45 }
 0x70b   :  { %v5237_v0 = vpop.eup %5236  ;;  %5256 = vpow2.f32 %v3697_v49  ;;  %2813 = vrot.lane.b32.xlu0 %v2794_v28, %s5355_s14  ;;  %v2792_v32 = vmul.f32 %v5235_v13, %v6984_v48 }
 0x70c   :  { %v5239_v51 = vpop.eup %5238  ;;  %5258 = vpow2.f32 %v3699_v55  ;;  %v2797_v52 = vmul.f32 %v5237_v0, %v6990_v8 }
 0x70d   :  { %v5241_v6 = vpop.eup %5240  ;;  %v2798_v16 = vmul.f32 %v5239_v51, %v6992_v58 }
 0x70e   :  { %v5243_v20 = vpop.eup %5242  ;;  %2807 = vrot.lane.b32.xlu1 %v2791_v3, %s5355_s14  ;;  %v2795_v36 = vmul.f32 %v5241_v6, %v6995_v37  ;;  %v8344_v6 = vld [vmem:[#allocation15_spill] sm:$0xff] }
 0x70f   :  { %v5245_v59 = vpop.eup %5244  ;;  %2809 = vrot.lane.b32.xlu0 %v2792_v32, %s5355_s14  ;;  %v2796_v8 = vmul.f32 %v5243_v20, %v6998_v42 }
 0x710   :  { %v5247_v2 = vpop.eup %5246  ;;  %v3705_v30 = vadd.f32 1.0, %v5245_v59 }
 0x711   :  { %v5249_v9 = vpop.eup %5248  ;;  %v3706_v39 = vadd.f32 1.0, %v5247_v2 }
 0x712   :  { %v5251_v29 = vpop.eup %5250  ;;  %5260 = vrcp.f32 %v3705_v30  ;;  %v3711_v45 = vadd.f32 1.0, %v5249_v9  ;;  %2819 = vrot.lane.b32.xlu1 %v2797_v52, %s5355_s14 }
 0x713   :  { %v5253_v48 = vpop.eup %5252  ;;  %5262 = vrcp.f32 %v3706_v39  ;;  %2821 = vrot.lane.b32.xlu0 %v2798_v16, %s5355_s14  ;;  %v3723_v35 = vmul.f32 %v5251_v29, %v7009_v18 }
 0x714   :  { %v5255_v56 = vpop.eup %5254  ;;  %5264 = vrcp.f32 %v3711_v45  ;;  %v3724_v33 = vmul.f32 %v5253_v48, %v7012_v43 }
 0x715   :  { %v5257_v63 = vpop.eup %5256  ;;  %v3712_v15 = vadd.f32 1.0, %v5255_v56 }
 0x716   :  { %v5259_v47 = vpop.eup %5258  ;;  %v3709_v25 = vadd.f32 1.0, %v5257_v63  ;;  %2815 = vrot.lane.b32.xlu1 %v2795_v36, %s5355_s14 }
 0x717   :  { %5266 = vrcp.f32 %v3712_v15  ;;  %v3710_v58 = vadd.f32 1.0, %v5259_v47  ;;  %2817 = vrot.lane.b32.xlu0 %v2796_v8, %s5355_s14 }
 0x718   :  { %5268 = vrcp.f32 %v3709_v25 }
 0x719   :  { %5270 = vrcp.f32 %v3710_v58  ;;  %v8347_v58 = vld [vmem:[#allocation22_spill] sm:$0xff] }
 0x71a   :  { %3741 = vrot.lane.b32.xlu1 %v3723_v35, %s5355_s14 }
 0x71b   :  { %3743 = vrot.lane.b32.xlu0 %v3724_v33, %s5355_s14 }
 0x71c   :  { %v5261_v37 = vpop.eup %5260 }
 0x71d   :  { %v5263_v42 = vpop.eup %5262  ;;  %v3721_v26 = vmul.f32 %v5261_v37, %v7023_v22 }
 0x71e   :  { %v5265_v4 = vpop.eup %5264  ;;  %v3722_v10 = vmul.f32 %v5263_v42, %v7026_v60 }
 0x71f   :  { %3737 = vrot.lane.b32.xlu1 %v3721_v26, %s5355_s14  ;;  %v3727_v18 = vmul.f32 %v5265_v4, %v7029_v31  ;;  %v8348_v26 = vld [vmem:[#allocation23_spill] sm:$0xff] }
 0x720   :  { %3739 = vrot.lane.b32.xlu0 %v3722_v10, %s5355_s14 }
 0x721   :  { %v5267_v12 = vpop.eup %5266 }
 0x722   :  { %v5269_v62 = vpop.eup %5268  ;;  %v3728_v43 = vmul.f32 %v5267_v12, %v7035_v57 }
 0x723   :  { %v5271_v5 = vpop.eup %5270  ;;  %3749 = vrot.lane.b32.xlu1 %v3727_v18, %s5355_s14  ;;  %v3725_v22 = vmul.f32 %v5269_v62, %v7038_v24 }
 0x724   :  { %3751 = vrot.lane.b32.xlu0 %v3728_v43, %s5355_s14  ;;  %v3726_v17 = vmul.f32 %v5271_v5, %v7040_v11  ;;  %v8342_v11 = vld [vmem:[#allocation14_spill] sm:$0xff]  ;;  %v8349_v43 = vld [vmem:[#allocation37_spill] sm:$0xff] }
 0x727   :  { %3745 = vrot.lane.b32.xlu1 %v3725_v22, %s5355_s14 }
 0x728   :  { %3747 = vrot.lane.b32.xlu0 %v3726_v17, %s5355_s14 }
 0x77c   :  { %v2812_v60 = vpop.permute.xlu1 %2811 }
 0x77d   :  { %v2814_v46 = vpop.permute.xlu0 %2813  ;;  %2842 = vst.msk [vmem:[#allocation2 + $0x18] sm:$0xff] %vm537_vm3, %v2812_v60 }
 0x77e   :  { %2844 = vst.msk [vmem:[#allocation2 + $0x28] sm:$0xff] %vm74_vm1, %v2814_v46  ;;  %v7080_v31 = vsel %vm74_vm1, %v2812_v60, %v2814_v46 }
 0x77f   :  { %v2862_v34 = vmul.f32 %v7080_v31, %v8342_v11  ;;  %v7156_v35 = vmul.f32 %v7080_v31, %v8347_v58  ;;  %v7163_v4 = vmul.f32 %v7080_v31, %v8348_v26  ;;  %v7167_v10 = vmul.f32 %v7080_v31, %v5963_v41 }
 0x780   :  { %v2808_v57 = vpop.permute.xlu1 %2807  ;;  %v7177_v62 = vmul.f32 %v7080_v31, %v6015_v54  ;;  %v7181_v5 = vmul.f32 %v7080_v31, %v8349_v43 }
 0x781   :  { %v2810_v38 = vpop.permute.xlu0 %2809  ;;  %2839 = vst.msk [vmem:[#allocation2] sm:$0xff] %vm537_vm3, %v2808_v57 }
 0x782   :  { %2841 = vst.msk [vmem:[#allocation2 + $0x10] sm:$0xff] %vm74_vm1, %v2810_v38  ;;  %v7085_v24 = vsel %vm74_vm1, %v2808_v57, %v2810_v38  ;;  %8350 = vst [vmem:[#allocation24_spill] sm:$0xff] %v7181_v5  ;;  %v8351_v38 = vld [vmem:[#allocation16_spill] sm:$0xff] }
 0x783   :  { %v2860_v50 = vmul.f32 %v7085_v24, %v8342_v11  ;;  %v7148_v8 = vpack.c.bf16 %v7080_v31, %v7085_v24  ;;  %v7192_v46 = vmul.f32 %v7085_v24, %v8347_v58 }
 0x784   :  { %v2820_v61 = vpop.permute.xlu1 %2819  ;;  %v7092_v55 = vld [vmem:[#allocation2 + $0x18] sm:$0xff] }
 0x785   :  { %v2822_v49 = vpop.permute.xlu0 %2821  ;;  %2848 = vst.msk [vmem:[#allocation2 + $0x48] sm:$0xff] %vm537_vm3, %v2820_v61  ;;  %v2868_v7 = vpack.c.bf16 %v2862_v34, %v2860_v50  ;;  %v7100_v13 = vld [vmem:[#allocation2 + $0x28] sm:$0xff]  ;;  %v2861_v20 = vmul.f32 %v7092_v55, %v8344_v6  ;;  %8346 = vst [vmem:[#allocation26_spill] sm:$0xff] %v7148_v8  ;;  %v7198_v50 = vmul.f32 %v7085_v24, %v8348_v26 }
 0x786   :  { %2850 = vst.msk [vmem:[#allocation2 + $0x58] sm:$0xff] %vm74_vm1, %v2822_v49  ;;  %v7098_v27 = vsel %vm74_vm1, %v2820_v61, %v2822_v49  ;;  %v2940_v63 = vmul.f32 %v7100_v13, %v5694_v19  ;;  %v3000_v22 = vmul.f32 %v7100_v13, %v5696_v21  ;;  %v7202_v34 = vmul.f32 %v7085_v24, %v5963_v41 }
 0x787   :  { %4389 = vmatprep.subr.bf16.mxu0 %v2868_v7  ;;  %v2866_v9 = vmul.f32 %v7098_v27, %v8342_v11  ;;  %v7206_v61 = vmul.f32 %v7085_v24, %v6015_v54 }
 0x788   :  { %v7095_v1 = vld [vmem:[#allocation2] sm:$0xff]  ;;  %v2816_v28 = vpop.permute.xlu1 %2815 }
 0x789   :  { %v7102_v0 = vld [vmem:[#allocation2 + $0x10] sm:$0xff]  ;;  %v2818_v51 = vpop.permute.xlu0 %2817  ;;  %2845 = vst.msk [vmem:[#allocation2 + $0x30] sm:$0xff] %vm537_vm3, %v2816_v28  ;;  %v7107_v3 = vpack.c.bf16 %v7092_v55, %v7095_v1  ;;  %v2859_v32 = vmul.f32 %v7095_v1, %v8344_v6  ;;  %v2935_v31 = vmul.f32 %v7095_v1, %v8351_v38 }
 0x78a   :  { %2847 = vst.msk [vmem:[#allocation2 + $0x40] sm:$0xff] %vm74_vm1, %v2818_v51  ;;  %v7115_v59 = vsel %vm74_vm1, %v2816_v28, %v2818_v51  ;;  %v7119_v2 = vpack.c.bf16 %v7100_v13, %v7102_v0  ;;  %v2937_v56 = vmul.f32 %v7102_v0, %v5694_v19  ;;  %v2997_v42 = vmul.f32 %v7102_v0, %v5696_v21  ;;  %v8352_v51 = vld [vmem:[#allocation18_spill] sm:$0xff] }
 0x78b   :  { %8343 = vst [vmem:[#allocation25_spill] sm:$0xff] %v7107_v3  ;;  %2899 = vrot.lane.b32.xlu1 %v7107_v3, %s5356_s15  ;;  %v2867_v30 = vpack.c.bf16 %v2861_v20, %v2859_v32  ;;  %v2864_v52 = vmul.f32 %v7115_v59, %v8342_v11  ;;  %v3105_v32 = vmul.f32 %v7102_v0, %v8352_v51 }
 0x78c   :  { %8345 = vst [vmem:[#allocation27_spill] sm:$0xff] %v7119_v2  ;;  %2903 = vrot.lane.b32.xlu0 %v7119_v2, %s5356_s15  ;;  %v3742_v39 = vpop.permute.xlu1 %3741  ;;  %v7130_v45 = vld [vmem:[#allocation2 + $0x48] sm:$0xff]  ;;  %v2949_v37 = vpack.c.bf16 %v2940_v63, %v2937_v56  ;;  %v3009_v28 = vpack.c.bf16 %v3000_v22, %v2997_v42 }
 0x78d   :  { %v3744_v16 = vpop.permute.xlu0 %3743  ;;  %4390 = vmatpush1.bf16.msra.mxu0 %v2867_v30  ;;  %v2870_v29 = vpack.c.bf16 %v2866_v9, %v2864_v52  ;;  %3772 = vst.msk [vmem:[#allocation2 + $0x18] sm:$0xff] %vm537_vm3, %v3742_v39  ;;  %v2865_v25 = vmul.f32 %v7130_v45, %v8344_v6  ;;  %v7208_v49 = vld [vmem:[#allocation2 + $0x58] sm:$0xff]  ;;  %v7215_v30 = vmul.f32 %v7085_v24, %v8349_v43 }
 0x78e   :  { %v7133_v48 = vsel %vm74_vm1, %v3742_v39, %v3744_v16  ;;  %3774 = vst.msk [vmem:[#allocation2 + $0x28] sm:$0xff] %vm74_vm1, %v3744_v16  ;;  %v3108_v9 = vmul.f32 %v7100_v13, %v8352_v51  ;;  %v2938_v39 = vmul.f32 %v7092_v55, %v8351_v38  ;;  %v8354_v16 = vld [vmem:[#allocation17_spill] sm:$0xff]  ;;  %v3168_v24 = vmul.f32 %v7100_v13, %v5830_v40 }
 0x78f   :  { %3067 = vrot.lane.b32.xlu1 %v7107_v3, %s5357_s3  ;;  %4391 = vmatprep.subr.bf16.mxu0 %v2870_v29  ;;  %v3792_v60 = vmul.f32 %v7133_v48, %v8342_v11  ;;  %8353 = vst [vmem:[#allocation29_spill] sm:$0xff] %v7215_v30  ;;  %v2998_v29 = vmul.f32 %v7092_v55, %v8354_v16 }
 0x790   :  { %v7140_v36 = vld [vmem:[#allocation2 + $0x30] sm:$0xff]  ;;  %3071 = vrot.lane.b32.xlu0 %v7119_v2, %s5357_s3  ;;  %v7337_v3 = vmul.f32 %v7115_v59, %v6015_v54  ;;  %v7559_v30 = vmul.f32 %v7133_v48, %v8349_v43 }
 0x791   :  { %v3738_v15 = vpop.permute.xlu1 %3737  ;;  %v2863_v47 = vmul.f32 %v7140_v36, %v8344_v6  ;;  %v7236_v63 = vmul.f32 %v7140_v36, %v5832_v14  ;;  %v7252_v22 = vld [vmem:[#allocation2 + $0x40] sm:$0xff] }
 0x792   :  { %v3740_v33 = vpop.permute.xlu0 %3739  ;;  %3769 = vst.msk [vmem:[#allocation2] sm:$0xff] %vm537_vm3, %v3738_v15  ;;  %8361 = vst [vmem:[#allocation35_spill] sm:$0xff] %v7337_v3  ;;  %v3006_v3 = vmul.f32 %v7208_v49, %v5696_v21 }
 0x793   :  { %v7170_v12 = vsel %vm74_vm1, %v3738_v15, %v3740_v33  ;;  %2901 = vrot.lane.b32.xlu1 %v7148_v8, %s5356_s15  ;;  %v2869_v18 = vpack.c.bf16 %v2865_v25, %v2863_v47  ;;  %3771 = vst.msk [vmem:[#allocation2 + $0x10] sm:$0xff] %vm74_vm1, %v3740_v33  ;;  %8355 = vst [vmem:[#allocation28_spill] sm:$0xff] %v7236_v63  ;;  %v7240_v15 = vmul.f32 %v7130_v45, %v5832_v14 }
 0x794   :  { %2963 = vrot.lane.b32.xlu0 %v2949_v37, %s5359_s16  ;;  %v3790_v17 = vmul.f32 %v7170_v12, %v8342_v11  ;;  %v7228_v56 = vld [vmem:[#allocation2 + $0x18] sm:$0xff]  ;;  %v2947_v25 = vpack.c.bf16 %v2938_v39, %v2935_v31  ;;  %v3165_v33 = vmul.f32 %v7102_v0, %v5830_v40  ;;  %v2995_v37 = vmul.f32 %v7095_v1, %v8354_v16 }
 0x795   :  { %v3750_v57 = vpop.permute.xlu1 %3749  ;;  %4392 = vmatpush1.bf16.msra.mxu0 %v2869_v18  ;;  %v7250_v18 = vmul.f32 %v7115_v59, %v8347_v58  ;;  %v3791_v31 = vmul.f32 %v7228_v56, %v8344_v6  ;;  %v7567_v5 = vmul.f32 %v7228_v56, %v8338_v53 }
 0x796   :  { %v3752_v7 = vpop.permute.xlu0 %3751  ;;  %3778 = vst.msk [vmem:[#allocation2 + $0x48] sm:$0xff] %vm537_vm3, %v3750_v57  ;;  %v3798_v20 = vpack.c.bf16 %v3792_v60, %v3790_v17  ;;  %v3117_v60 = vpack.c.bf16 %v3108_v9, %v3105_v32  ;;  %v3166_v32 = vmul.f32 %v7092_v55, %v5832_v14  ;;  %v7272_v9 = vmul.f32 %v7098_v27, %v8347_v58 }
 0x797   :  { %v7218_v52 = vsel %vm74_vm1, %v3750_v57, %v3752_v7  ;;  %3069 = vrot.lane.b32.xlu1 %v7148_v8, %s5357_s3  ;;  %3780 = vst.msk [vmem:[#allocation2 + $0x58] sm:$0xff] %vm74_vm1, %v3752_v7  ;;  %v3007_v2 = vpack.c.bf16 %v2998_v29, %v2995_v37  ;;  %v3163_v8 = vmul.f32 %v7095_v1, %v5832_v14  ;;  %8383 = vst [vmem:[#allocation43_spill] sm:$0xff] %v7567_v5 }
 0x798   :  { %3023 = vrot.lane.b32.xlu0 %v3009_v28, %s5360_s17  ;;  %4495 = vmatprep.subr.bf16.mxu1 %v3798_v20  ;;  %v8356_v20 = vld [vmem:[#allocation19_spill] sm:$0xff]  ;;  %v3796_v23 = vmul.f32 %v7218_v52, %v8342_v11  ;;  %v7296_v29 = vmul.f32 %v7115_v59, %v8348_v26  ;;  %v7300_v37 = vmul.f32 %v7098_v27, %v8348_v26 }
 0x799   :  { %v3746_v47 = vpop.permute.xlu1 %3745  ;;  %v7246_v42 = vld [vmem:[#allocation2] sm:$0xff]  ;;  %v3106_v39 = vmul.f32 %v7092_v55, %v8356_v20  ;;  %v7622_v5 = vmul.f32 %v7218_v52, %v8349_v43 }
 0x79a   :  { %v3748_v17 = vpop.permute.xlu0 %3747  ;;  %3775 = vst.msk [vmem:[#allocation2 + $0x30] sm:$0xff] %vm537_vm3, %v3746_v47  ;;  %v3789_v57 = vmul.f32 %v7246_v42, %v8344_v6 }
 0x79b   :  { %v7262_v28 = vsel %vm74_vm1, %v3746_v47, %v3748_v17  ;;  %2959 = vrot.lane.b32.xlu1 %v2947_v25, %s5359_s16  ;;  %3777 = vst.msk [vmem:[#allocation2 + $0x40] sm:$0xff] %vm74_vm1, %v3748_v17  ;;  %v3103_v47 = vmul.f32 %v7095_v1, %v8356_v20  ;;  %v7341_v17 = vmul.f32 %v7098_v27, %v6015_v54 }
 0x79c   :  { %3131 = vrot.lane.b32.xlu0 %v3117_v60, %s5361_s20  ;;  %v3797_v7 = vpack.c.bf16 %v3791_v31, %v3789_v57  ;;  %v3794_v25 = vmul.f32 %v7262_v28, %v8342_v11  ;;  %v3177_v57 = vpack.c.bf16 %v3168_v24, %v3165_v33  ;;  %v7308_v24 = vmul.f32 %v7228_v56, %v8356_v20 }
 0x79d   :  { %v7289_v63 = vld [vmem:[#allocation2 + $0x48] sm:$0xff]  ;;  %v3115_v33 = vpack.c.bf16 %v3106_v39, %v3103_v47  ;;  %8362 = vst [vmem:[#allocation34_spill] sm:$0xff] %v7341_v17  ;;  %v3175_v39 = vpack.c.bf16 %v3166_v32, %v3163_v8  ;;  %v2943_v47 = vmul.f32 %v7252_v22, %v5694_v19  ;;  %v7360_v8 = vpack.c.bf16 %v7133_v48, %v7170_v12 }
 0x79e   :  { %4496 = vmatpush1.bf16.msra.mxu1 %v3797_v7  ;;  %v3800_v31 = vpack.c.bf16 %v3796_v23, %v3794_v25  ;;  %v7304_v23 = vmul.f32 %v7246_v42, %v8356_v20  ;;  %v7317_v7 = vmul.f32 %v7098_v27, %v5963_v41  ;;  %v7321_v25 = vpack.c.bf16 %v7208_v49, %v7252_v22 }
 0x79f   :  { %3019 = vrot.lane.b32.xlu1 %v3007_v2, %s5360_s17  ;;  %v7313_v2 = vmul.f32 %v7115_v59, %v5963_v41  ;;  %v3795_v11 = vmul.f32 %v7289_v63, %v8344_v6  ;;  %8365 = vst [vmem:[#allocation38_spill] sm:$0xff] %v7360_v8  ;;  %v7392_v8 = vmul.f32 %v7133_v48, %v5963_v41 }
 0x7a0   :  { %8357 = vst [vmem:[#allocation31_spill] sm:$0xff] %v7304_v23  ;;  %3191 = vrot.lane.b32.xlu0 %v3177_v57, %s5362_s21  ;;  %4497 = vmatprep.subr.bf16.mxu1 %v3800_v31  ;;  %8359 = vst [vmem:[#allocation33_spill] sm:$0xff] %v7317_v7  ;;  %v7352_v31 = vmul.f32 %v7228_v56, %v5832_v14  ;;  %v7370_v23 = vmul.f32 %v7170_v12, %v8347_v58 }
 0x7a1   :  { %8358 = vst [vmem:[#allocation30_spill] sm:$0xff] %v7313_v2  ;;  %8360 = vst [vmem:[#allocation32_spill] sm:$0xff] %v7321_v25  ;;  %v7323_v60 = vld [vmem:[#allocation2 + $0x30] sm:$0xff]  ;;  %v3003_v17 = vmul.f32 %v7252_v22, %v5696_v21 }
 0x7a2   :  { %v3793_v57 = vmul.f32 %v7323_v60, %v8344_v6  ;;  %v7348_v6 = vmul.f32 %v7246_v42, %v5832_v14  ;;  %8364 = vst [vmem:[#allocation39_spill] sm:$0xff] %v7352_v31  ;;  %v7364_v32 = vpack.c.bf16 %v7289_v63, %v7323_v60  ;;  %8367 = vst [vmem:[#allocation40_spill] sm:$0xff] %v7370_v23 }
 0x7a3   :  { %3127 = vrot.lane.b32.xlu1 %v3115_v33, %s5361_s20  ;;  %v7388_v33 = vmul.f32 %v7170_v12, %v5963_v41  ;;  %8370 = vst [vmem:[#allocation14_spill] sm:$0xff] %v7392_v8  ;;  %v7405_v31 = vmul.f32 %v7133_v48, %v6015_v54  ;;  %v7415_v7 = vmul.f32 %v7323_v60, %v8351_v38 }
 0x7a4   :  { %8363 = vst [vmem:[#allocation36_spill] sm:$0xff] %v7348_v6  ;;  %2909 = vrot.lane.b32.xlu0 %v7321_v25, %s5356_s15  ;;  %v3799_v2 = vpack.c.bf16 %v3795_v11, %v3793_v57  ;;  %8366 = vst [vmem:[#allocation41_spill] sm:$0xff] %v7364_v32  ;;  %v7374_v11 = vmul.f32 %v7133_v48, %v8347_v58  ;;  %v7378_v57 = vmul.f32 %v7170_v12, %v8348_v26 }
 0x7a5   :  { %v7384_v32 = vmul.f32 %v7133_v48, %v8348_v26  ;;  %8369 = vst [vmem:[#allocation20_spill] sm:$0xff] %v7388_v33  ;;  %v7401_v6 = vmul.f32 %v7170_v12, %v6015_v54  ;;  %8372 = vst [vmem:[#allocation22_spill] sm:$0xff] %v7405_v31  ;;  %v7419_v23 = vmul.f32 %v7289_v63, %v8351_v38 }
 0x7a6   :  { %8368 = vst [vmem:[#allocation21_spill] sm:$0xff] %v7374_v11  ;;  %4498 = vmatpush1.bf16.msra.mxu1 %v3799_v2  ;;  %v2946_v2 = vmul.f32 %v7208_v49, %v5694_v19  ;;  %8373 = vst [vmem:[#allocation23_spill] sm:$0xff] %v7415_v7  ;;  %v7431_v33 = vpack.c.bf16 %v7218_v52, %v7262_v28  ;;  %v7435_v8 = vmul.f32 %v7323_v60, %v8354_v16 }
 0x7a7   :  { %3187 = vrot.lane.b32.xlu1 %v3175_v39, %s5362_s21  ;;  %8371 = vst [vmem:[#allocation15_spill] sm:$0xff] %v7401_v6  ;;  %8374 = vst [vmem:[#allocation37_spill] sm:$0xff] %v7419_v23  ;;  %v3114_v39 = vmul.f32 %v7208_v49, %v8352_v51  ;;  %v7453_v7 = vmul.f32 %v7262_v28, %v8347_v58  ;;  %v3012_v6 = vpack.c.bf16 %v3006_v3, %v3003_v17 }
 0x7a8   :  { %3077 = vrot.lane.b32.xlu0 %v7321_v25, %s5357_s3  ;;  %v2952_v11 = vpack.c.bf16 %v2946_v2, %v2943_v47  ;;  %v3111_v25 = vmul.f32 %v7252_v22, %v8352_v51  ;;  %8375 = vst [vmem:[#allocation16_spill] sm:$0xff] %v7431_v33  ;;  %8376 = vst [vmem:[#allocation18_spill] sm:$0xff] %v7435_v8  ;;  %v7439_v47 = vmul.f32 %v7289_v63, %v8354_v16 }
 0x7a9   :  { %v8378_v2 = vpack.c.bf16 %v7156_v35, %v7192_v46  ;;  %v3171_v33 = vmul.f32 %v7252_v22, %v5830_v40  ;;  %v7460_v35 = vmul.f32 %v7218_v52, %v8347_v58  ;;  %v7464_v46 = vmul.f32 %v7323_v60, %v8356_v20  ;;  %v7494_v58 = vld [vmem:[#allocation2 + $0x28] sm:$0xff] }
 0x7aa   :  { %8377 = vst [vmem:[#allocation17_spill] sm:$0xff] %v7439_v47  ;;  %v3120_v31 = vpack.c.bf16 %v3114_v39, %v3111_v25  ;;  %v7474_v23 = vmul.f32 %v7262_v28, %v8348_v26  ;;  %v7482_v47 = vmul.f32 %v7218_v52, %v8348_v26  ;;  %v7486_v3 = vmul.f32 %v7323_v60, %v5832_v14  ;;  %v7492_v39 = vld [vmem:[#allocation2 + $0x10] sm:$0xff] }
 0x7ab   :  { %2961 = vrot.lane.b32.xlu1 %v8378_v2, %s5359_s16  ;;  %8379 = vst [vmem:[#allocation19_spill] sm:$0xff] %v7464_v46  ;;  %v7468_v2 = vmul.f32 %v7289_v63, %v8356_v20  ;;  %v8380_v17 = vpack.c.bf16 %v7163_v4, %v7198_v50  ;;  %v7498_v8 = vmul.f32 %v7289_v63, %v5832_v14 }
 0x7ac   :  { %2969 = vrot.lane.b32.xlu0 %v2952_v11, %s5359_s16  ;;  %v3174_v11 = vmul.f32 %v7208_v49, %v5830_v40  ;;  %v7502_v26 = vmul.f32 %v7262_v28, %v5963_v41  ;;  %v7506_v46 = vmul.f32 %v7218_v52, %v5963_v41  ;;  %v7513_v50 = vmul.f32 %v7262_v28, %v6015_v54 }
 0x7ad   :  { %v7517_v14 = vmul.f32 %v7218_v52, %v6015_v54  ;;  %v7541_v41 = vmul.f32 %v7494_v58, %v8335_v44  ;;  %v7553_v54 = vld [vmem:[#allocation2 + $0x58] sm:$0xff]  ;;  %v7578_v48 = vmul.f32 %v7092_v55, %v8338_v53  ;;  %v7643_v52 = vpack.c.bf16 %v7130_v45, %v7140_v36 }
 0x7ae   :  { %v3180_v25 = vpack.c.bf16 %v3174_v11, %v3171_v33  ;;  %v7521_v33 = vmul.f32 %v7102_v0, %v8335_v44  ;;  %v7529_v11 = vmul.f32 %v7100_v13, %v8335_v44  ;;  %v7537_v0 = vmul.f32 %v7492_v39, %v8335_v44 }
 0x7af   :  { %3021 = vrot.lane.b32.xlu1 %v8380_v17, %s5360_s17  ;;  %v8381_v13 = vpack.c.bf16 %v7167_v10, %v7202_v34  ;;  %v7551_v17 = vld [vmem:[#allocation2 + $0x40] sm:$0xff]  ;;  %v7574_v34 = vmul.f32 %v7095_v1, %v8338_v53  ;;  %v7590_v10 = vmul.f32 %v7208_v49, %v8335_v44  ;;  %v7594_v1 = vmul.f32 %v7115_v59, %v8349_v43 }
 0x7b0   :  { %3029 = vrot.lane.b32.xlu0 %v3012_v6, %s5360_s17  ;;  %v7545_v6 = vmul.f32 %v7170_v12, %v8349_v43  ;;  %v7563_v12 = vmul.f32 %v7246_v42, %v8338_v53  ;;  %v7604_v4 = vmul.f32 %v7551_v17, %v8335_v44  ;;  %v8385_v49 = vpack.c.bf16 %v7177_v62, %v7206_v61 }
 0x7b1   :  { %v2941_v61 = vmul.f32 %v7140_v36, %v8351_v38  ;;  %v2944_v55 = vmul.f32 %v7130_v45, %v8351_v38  ;;  %v3001_v62 = vmul.f32 %v7140_v36, %v8354_v16 }
 0x7b2   :  { %8382 = vst [vmem:[#allocation42_spill] sm:$0xff] %v7563_v12  ;;  %8384 = vst [vmem:[#allocation44_spill] sm:$0xff] %v7604_v4  ;;  %v7618_v12 = vmul.f32 %v7262_v28, %v8349_v43  ;;  %v7635_v28 = vmul.f32 %v7289_v63, %v8338_v53  ;;  %v7673_v63 = vpack.c.bf16 %v7098_v27, %v7115_v59 }
 0x7b3   :  { %3129 = vrot.lane.b32.xlu1 %v8381_v13, %s5361_s20  ;;  %v7582_v13 = vmul.f32 %v7252_v22, %v8335_v44  ;;  %v7600_v22 = vmul.f32 %v7098_v27, %v8349_v43  ;;  %v7639_v43 = vmul.f32 %v7140_v36, %v8338_v53  ;;  %v3870_v27 = vmul.f32 %v7494_v58, %v5694_v19 }
 0x7b4   :  { %3137 = vrot.lane.b32.xlu0 %v3120_v31, %s5361_s20  ;;  %v7608_v31 = vmul.f32 %v7553_v54, %v8335_v44  ;;  %v7626_v44 = vmul.f32 %v7323_v60, %v8338_v53  ;;  %8387 = vst [vmem:[#allocation46_spill] sm:$0xff] %v7635_v28  ;;  %v3867_v60 = vmul.f32 %v7492_v39, %v5694_v19 }
 0x7b5   :  { %8388 = vst [vmem:[#allocation47_spill] sm:$0xff] %v7639_v43  ;;  %v2950_v59 = vpack.c.bf16 %v2944_v55, %v2941_v61  ;;  %v3865_v28 = vmul.f32 %v7246_v42, %v8351_v38  ;;  %v3004_v43 = vmul.f32 %v7130_v45, %v8354_v16  ;;  %v3109_v55 = vmul.f32 %v7140_v36, %v8356_v20 }
 0x7b6   :  { %8386 = vst [vmem:[#allocation45_spill] sm:$0xff] %v7626_v44  ;;  %v3879_v44 = vpack.c.bf16 %v3870_v27, %v3867_v60  ;;  %v3927_v60 = vmul.f32 %v7492_v39, %v5696_v21  ;;  %v3112_v27 = vmul.f32 %v7130_v45, %v8356_v20  ;;  %v3928_v36 = vmul.f32 %v7228_v56, %v8354_v16  ;;  %v8390_v20 = vld [vmem:[#allocation28_spill] sm:$0xff] }
 0x7b7   :  { %3189 = vrot.lane.b32.xlu1 %v8385_v49, %s5362_s21  ;;  %v7653_v49 = vpack.c.bf16 %v7494_v58, %v7492_v39  ;;  %v3010_v4 = vpack.c.bf16 %v3004_v43, %v3001_v62  ;;  %v3925_v62 = vmul.f32 %v7246_v42, %v8354_v16  ;;  %v4095_v16 = vmul.f32 %v7492_v39, %v5830_v40 }
 0x7b8   :  { %3197 = vrot.lane.b32.xlu0 %v3180_v25, %s5362_s21  ;;  %v7649_v25 = vmul.f32 %v7130_v45, %v8338_v53  ;;  %v7665_v53 = vpack.c.bf16 %v7228_v56, %v7246_v42  ;;  %v4035_v45 = vmul.f32 %v7492_v39, %v8352_v51  ;;  %v4038_v42 = vmul.f32 %v7494_v58, %v8352_v51  ;;  %v8399_v39 = vld [vmem:[#allocation34_spill] sm:$0xff] }
 0x7ba   :  { %8389 = vst [vmem:[#allocation48_spill] sm:$0xff] %v7649_v25  ;;  %v3868_v25 = vmul.f32 %v7228_v56, %v8351_v38  ;;  %v4047_v43 = vpack.c.bf16 %v4038_v42, %v4035_v45  ;;  %v8393_v56 = vpack.c.bf16 %v7300_v37, %v7296_v29  ;;  %v8400_v29 = vld [vmem:[#allocation35_spill] sm:$0xff]  ;;  %v3876_v42 = vmul.f32 %v7553_v54, %v5694_v19 }
 0x7bb   :  { %2905 = vrot.lane.b32.xlu1 %v7643_v52, %s5356_s15  ;;  %v8401_v37 = vpack.c.bf16 %v8399_v39, %v8400_v29 }
 0x7bc   :  { %3833 = vrot.lane.b32.xlu0 %v7653_v49, %s5356_s15  ;;  %v3877_v61 = vpack.c.bf16 %v3868_v25, %v3865_v28  ;;  %v8391_v28 = vpack.c.bf16 %v7240_v15, %v8390_v20  ;;  %v8392_v25 = vpack.c.bf16 %v7272_v9, %v7250_v18  ;;  %v8394_v15 = vld [vmem:[#allocation31_spill] sm:$0xff]  ;;  %v8396_v9 = vld [vmem:[#allocation33_spill] sm:$0xff]  ;;  %v3873_v20 = vmul.f32 %v7551_v17, %v5694_v19 }
 0x7bd   :  { %v8417_v19 = vld [vmem:[#allocation37_spill] sm:$0xff] }
 0x7bf   :  { %3073 = vrot.lane.b32.xlu1 %v7643_v52, %s5357_s3 }
 0x7c0   :  { %3829 = vrot.lane.b32.xlu0 %v7665_v53, %s5356_s15 }
 0x7c3   :  { %2907 = vrot.lane.b32.xlu1 %v7673_v63, %s5356_s15 }
 0x7c4   :  { %4001 = vrot.lane.b32.xlu0 %v7653_v49, %s5357_s3 }
 0x7c7   :  { %3075 = vrot.lane.b32.xlu1 %v7673_v63, %s5357_s3 }
 0x7c8   :  { %3997 = vrot.lane.b32.xlu0 %v7665_v53, %s5357_s3 }
 0x7cb   :  { %2965 = vrot.lane.b32.xlu1 %v2950_v59, %s5359_s16  ;;  %v3118_v59 = vpack.c.bf16 %v3112_v27, %v3109_v55  ;;  %v8395_v55 = vpack.c.bf16 %v7308_v24, %v8394_v15  ;;  %v8403_v24 = vld [vmem:[#allocation36_spill] sm:$0xff] }
 0x7cc   :  { %3893 = vrot.lane.b32.xlu0 %v3879_v44, %s5359_s16  ;;  %v3930_v44 = vmul.f32 %v7494_v58, %v5696_v21 }
 0x7ce   :  { %v3939_v38 = vpack.c.bf16 %v3930_v44, %v3927_v60  ;;  %v8397_v60 = vld [vmem:[#allocation30_spill] sm:$0xff]  ;;  %v8402_v44 = vld [vmem:[#allocation39_spill] sm:$0xff] }
 0x7cf   :  { %3025 = vrot.lane.b32.xlu1 %v3010_v4, %s5360_s17  ;;  %v3937_v4 = vpack.c.bf16 %v3928_v36, %v3925_v62  ;;  %v8398_v27 = vpack.c.bf16 %v8396_v9, %v8397_v60  ;;  %v8406_v62 = vld [vmem:[#allocation41_spill] sm:$0xff]  ;;  %v8418_v9 = vld [vmem:[#allocation23_spill] sm:$0xff] }
 0x7d0   :  { %3889 = vrot.lane.b32.xlu0 %v3877_v61, %s5359_s16  ;;  %v4098_v61 = vmul.f32 %v7494_v58, %v5830_v40  ;;  %v7758_v58 = vpack.c.bf16 %v7553_v54, %v7551_v17  ;;  %v8407_v36 = vld [vmem:[#allocation21_spill] sm:$0xff]  ;;  %v8419_v60 = vpack.c.bf16 %v8417_v19, %v8418_v9 }
 0x7d2   :  { %v4107_v18 = vpack.c.bf16 %v4098_v61, %v4095_v16  ;;  %v8412_v16 = vld [vmem:[#allocation20_spill] sm:$0xff]  ;;  %v8415_v61 = vld [vmem:[#allocation15_spill] sm:$0xff] }
 0x7d3   :  { %3133 = vrot.lane.b32.xlu1 %v3118_v59, %s5361_s20  ;;  %v8404_v59 = vpack.c.bf16 %v8402_v44, %v8403_v24  ;;  %v8420_v44 = vld [vmem:[#allocation16_spill] sm:$0xff] }
 0x7d4   :  { %3953 = vrot.lane.b32.xlu0 %v3939_v38, %s5360_s17  ;;  %v8405_v38 = vld [vmem:[#allocation38_spill] sm:$0xff] }
 0x7d7   :  { %3193 = vrot.lane.b32.xlu1 %v8391_v28, %s5362_s21  ;;  %v8410_v28 = vpack.c.bf16 %v7384_v32, %v7378_v57  ;;  %v3933_v32 = vmul.f32 %v7551_v17, %v5696_v21  ;;  %v8414_v57 = vld [vmem:[#allocation22_spill] sm:$0xff] }
 0x7d8   :  { %3949 = vrot.lane.b32.xlu0 %v3937_v4, %s5360_s17  ;;  %v8408_v4 = vld [vmem:[#allocation40_spill] sm:$0xff] }
 0x7d9   :  { %v8409_v45 = vpack.c.bf16 %v8407_v36, %v8408_v4 }
 0x7db   :  { %2967 = vrot.lane.b32.xlu1 %v8392_v25, %s5359_s16  ;;  %v8411_v25 = vld [vmem:[#allocation14_spill] sm:$0xff] }
 0x7dc   :  { %4061 = vrot.lane.b32.xlu0 %v4047_v43, %s5361_s20  ;;  %v3882_v43 = vpack.c.bf16 %v3876_v42, %v3873_v20  ;;  %v8422_v20 = vld [vmem:[#allocation18_spill] sm:$0xff]  ;;  %v4044_v42 = vmul.f32 %v7553_v54, %v8352_v51 }
 0x7df   :  { %3027 = vrot.lane.b32.xlu1 %v8393_v56, %s5360_s17  ;;  %v8413_v56 = vpack.c.bf16 %v8411_v25, %v8412_v16 }
 0x7e0   :  { %4057 = vrot.lane.b32.xlu0 %v8395_v55, %s5361_s20 }
 0x7e3   :  { %3135 = vrot.lane.b32.xlu1 %v8398_v27, %s5361_s20  ;;  %v3936_v27 = vmul.f32 %v7553_v54, %v5696_v21  ;;  %v8421_v21 = vld [vmem:[#allocation17_spill] sm:$0xff] }
 0x7e4   :  { %4121 = vrot.lane.b32.xlu0 %v4107_v18, %s5362_s21  ;;  %v8416_v18 = vpack.c.bf16 %v8414_v57, %v8415_v61  ;;  %v8425_v61 = vld [vmem:[#allocation26_spill] sm:$0xff] }
 0x7e7   :  { %3195 = vrot.lane.b32.xlu1 %v8401_v37, %s5362_s21  ;;  %v3942_v37 = vpack.c.bf16 %v3936_v27, %v3933_v32 }
 0x7e8   :  { %4117 = vrot.lane.b32.xlu0 %v8404_v59, %s5362_s21 }
 0x7eb   :  { %3831 = vrot.lane.b32.xlu1 %v8405_v38, %s5356_s15 }
 0x7ec   :  { %3839 = vrot.lane.b32.xlu0 %v7758_v58, %s5356_s15 }
 0x7ef   :  { %3999 = vrot.lane.b32.xlu1 %v8405_v38, %s5357_s3 }
 0x7f0   :  { %3835 = vrot.lane.b32.xlu0 %v8406_v62, %s5356_s15 }
 0x7f3   :  { %3891 = vrot.lane.b32.xlu1 %v8409_v45, %s5359_s16  ;;  %v4041_v45 = vmul.f32 %v7551_v17, %v8352_v51  ;;  %v4101_v51 = vmul.f32 %v7551_v17, %v5830_v40  ;;  %v8428_v17 = vpack.c.bf16 %v7482_v47, %v7474_v23  ;;  %v8431_v23 = vld [vmem:[#allocation27_spill] sm:$0xff] }
 0x7f4   :  { %4007 = vrot.lane.b32.xlu0 %v7758_v58, %s5357_s3 }
 0x7f7   :  { %3951 = vrot.lane.b32.xlu1 %v8410_v28, %s5360_s17  ;;  %v8423_v28 = vpack.c.bf16 %v8421_v21, %v8422_v20  ;;  %v8436_v21 = vld [vmem:[#allocation29_spill] sm:$0xff] }
 0x7f8   :  { %4003 = vrot.lane.b32.xlu0 %v8406_v62, %s5357_s3 }
 0x7fb   :  { %4059 = vrot.lane.b32.xlu1 %v8413_v56, %s5361_s20  ;;  %v4050_v56 = vpack.c.bf16 %v4044_v42, %v4041_v45 }
 0x7fc   :  { %3899 = vrot.lane.b32.xlu0 %v3882_v43, %s5359_s16 }
 0x7fd   :  { %v2900_v15 = vpop.permute.xlu1 %2899 }
 0x7fe   :  { %v2904_v55 = vpop.permute.xlu0 %2903 }
 0x7ff   :  { %4119 = vrot.lane.b32.xlu1 %v8416_v18, %s5362_s21  ;;  %v8426_v18 = vld [vmem:[#allocation19_spill] sm:$0xff] }
 0x800   :  { %3895 = vrot.lane.b32.xlu0 %v8419_v60, %s5359_s16  ;;  %v8427_v19 = vpack.c.bf16 %v7468_v2, %v8426_v18  ;;  %v8443_v18 = vld [vmem:[#allocation42_spill] sm:$0xff] }
 0x801   :  { %v3068_v39 = vpop.permute.xlu1 %3067 }
 0x802   :  { %v3072_v29 = vpop.permute.xlu0 %3071 }
 0x803   :  { %3837 = vrot.lane.b32.xlu1 %v8420_v44, %s5356_s15 }
 0x804   :  { %3959 = vrot.lane.b32.xlu0 %v3942_v37, %s5360_s17 }
 0x805   :  { %v2902_v24 = vpop.permute.xlu1 %2901 }
 0x806   :  { %v7804_v59 = vpop.permute.xlu0 %2963  ;;  %v2911_v36 = vsel %vm621_vm8, %v2900_v15, %v2902_v24  ;;  %v2912_v4 = vsel %vm621_vm8, %v2902_v24, %v2904_v55  ;;  %v8424_v55 = vpack.c.bf16 %v7460_v35, %v7453_v7  ;;  %v4104_v7 = vmul.f32 %v7553_v54, %v5830_v40 }
 0x807   :  { %4005 = vrot.lane.b32.xlu1 %v8420_v44, %s5357_s3  ;;  %4393 = vmatprep.subr.bf16.mxu0 %v2912_v4  ;;  %v8429_v40 = vpack.c.bf16 %v7498_v8, %v7486_v3 }
 0x808   :  { %3955 = vrot.lane.b32.xlu0 %v8423_v28, %s5360_s17  ;;  %4394 = vmatpush1.bf16.msra.mxu0 %v2911_v36  ;;  %v4110_v60 = vpack.c.bf16 %v4104_v7, %v4101_v51  ;;  %v8438_v28 = vpack.c.bf16 %v7529_v11, %v7521_v33  ;;  %v8447_v7 = vpack.c.bf16 %v7622_v5, %v7618_v12  ;;  %v4329_v5 = vld [vmem:[%s8189_s10] sm:$0xff] }
 0x809   :  { %v3070_v43 = vpop.permute.xlu1 %3069 }
 0x80a   :  { %v7818_v25 = vpop.permute.xlu0 %3023  ;;  %v7821_v16 = vsel %vm819_vm11, %v3068_v39, %v3070_v43  ;;  %v7824_v15 = vsel %vm819_vm11, %v3070_v43, %v3072_v29  ;;  %v8430_v29 = vld [vmem:[#allocation25_spill] sm:$0xff] }
 0x80b   :  { %3897 = vrot.lane.b32.xlu1 %v8424_v55, %s5359_s16  ;;  %v8440_v55 = vpack.c.bf16 %v7541_v41, %v7537_v0 }
 0x80c   :  { %4067 = vrot.lane.b32.xlu0 %v4050_v56, %s5361_s20  ;;  %v8439_v56 = vpack.c.bf16 %v7559_v30, %v7545_v6  ;;  %v8441_v30 = vpack.c.bf16 %v7578_v48, %v7574_v34  ;;  %v8442_v6 = vld [vmem:[#allocation43_spill] sm:$0xff] }
 0x80d   :  { %v2960_v32 = vpop.permute.xlu1 %2959  ;;  %v8444_v41 = vpack.c.bf16 %v8442_v6, %v8443_v18 }
 0x80e   :  { %v7831_v57 = vpop.permute.xlu0 %3131 }
 0x80f   :  { %3237 = vrot.lane.b32.xlu1 %v8425_v61, %s5358_s26 }
 0x810   :  { %4063 = vrot.lane.b32.xlu0 %v8427_v19, %s5361_s20 }
 0x811   :  { %v7843_v35 = vpop.permute.xlu1 %3019 }
 0x812   :  { %v7845_v9 = vpop.permute.xlu0 %3191 }
 0x813   :  { %3957 = vrot.lane.b32.xlu1 %v8428_v17, %s5360_s17 }
 0x814   :  { %4127 = vrot.lane.b32.xlu0 %v4110_v60, %s5362_s21  ;;  %v8448_v60 = vld [vmem:[#allocation44_spill] sm:$0xff] }
 0x815   :  { %v7852_v27 = vpop.permute.xlu1 %3127  ;;  %v8449_v17 = vpack.c.bf16 %v7608_v31, %v8448_v60  ;;  %v4330_v31 = vld [vmem:[%s8189_s10 + $0x8] sm:$0xff] }
 0x816   :  { %v2910_v39 = vpop.permute.xlu0 %2909 }
 0x817   :  { %4167 = vrot.lane.b32.xlu1 %v8405_v38, %s5358_s26  ;;  %v8432_v38 = vpack.c.bf16 %v7506_v46, %v7502_v26  ;;  %v8434_v26 = vpack.c.bf16 %v7517_v14, %v7513_v50 }
 0x818   :  { %4123 = vrot.lane.b32.xlu0 %v8429_v40, %s5362_s21  ;;  %v8453_v40 = vld [vmem:[#allocation46_spill] sm:$0xff] }
 0x819   :  { %v3188_v2 = vpop.permute.xlu1 %3187 }
 0x81a   :  { %v7860_v54 = vpop.permute.xlu0 %3077 }
 0x81b   :  { %3235 = vrot.lane.b32.xlu1 %v8430_v29, %s5358_s26 }
 0x81c   :  { %3239 = vrot.lane.b32.xlu0 %v8431_v23, %s5358_s26 }
 0x81d   :  { %v2962_v47 = vpop.permute.xlu1 %2961 }
 0x81e   :  { %v7866_v37 = vpop.permute.xlu0 %2969  ;;  %v2972_v33 = vsel %vm700_vm9, %v2962_v47, %v7804_v59  ;;  %v2971_v61 = vsel %vm700_vm9, %v2960_v32, %v2962_v47  ;;  %v8445_v59 = vpack.c.bf16 %v7600_v22, %v7594_v1  ;;  %v8446_v32 = vpack.c.bf16 %v7590_v10, %v7582_v13  ;;  %v8451_v10 = vld [vmem:[#allocation47_spill] sm:$0xff]  ;;  %v4331_v47 = vld [vmem:[%s8189_s10 + $0x10] sm:$0xff] }
 0x81f   :  { %3243 = vrot.lane.b32.xlu1 %v7673_v63, %s5358_s26 }
 0x820   :  { %4169 = vrot.lane.b32.xlu0 %v7653_v49, %s5358_s26  ;;  %v8433_v49 = vld [vmem:[#allocation32_spill] sm:$0xff] }
 0x821   :  { %v7872_v8 = vpop.permute.xlu1 %3021 }
 0x822   :  { %v7874_v3 = vpop.permute.xlu0 %3029 }
 0x823   :  { %4065 = vrot.lane.b32.xlu1 %v8432_v38, %s5361_s20 }
 0x824   :  { %4165 = vrot.lane.b32.xlu0 %v7665_v53, %s5358_s26  ;;  %v5106_v53 = vld [vmem:[%s8188_s9 + $0x4] ss:$12 sps:$4 sm:$0xff]  }
 0x825   :  { %v7882_v24 = vpop.permute.xlu1 %3129  ;;  %4421 = vmatprep.mubr.bf16.mxu0 %v5106_v53  ;;  %4527 = vmatprep.mubr.bf16.mxu1 %v5106_v53 }
 0x826   :  { %v7884_v36 = vpop.permute.xlu0 %3137 }
 0x827   :  { %4173 = vrot.lane.b32.xlu1 %v8420_v44, %s5358_s26 }
 0x828   :  { %3245 = vrot.lane.b32.xlu0 %v8433_v49, %s5358_s26  ;;  %v4332_v49 = vld [vmem:[%s8189_s10 + $0x18] sm:$0xff] }
 0x829   :  { %v7890_v63 = vpop.permute.xlu1 %3189 }
 0x82a   :  { %v7892_v4 = vpop.permute.xlu0 %3197  ;;  %v7896_v46 = vsel %vm958_vm13, %v3188_v2, %v7890_v63  ;;  %v8454_v2 = vld [vmem:[#allocation45_spill] sm:$0xff] }
 0x82b   :  { %4125 = vrot.lane.b32.xlu1 %v8434_v26, %s5362_s21  ;;  %v8455_v29 = vpack.c.bf16 %v8453_v40, %v8454_v2 }
 0x82c   :  { %4175 = vrot.lane.b32.xlu0 %v7758_v58, %s5358_s26  ;;  %v8435_v58 = vld [vmem:[#allocation24_spill] sm:$0xff] }
 0x82d   :  { %v2906_v44 = vpop.permute.xlu1 %2905  ;;  %v8437_v20 = vpack.c.bf16 %v8435_v58, %v8436_v21  ;;  %v3032_v58 = vsel %vm770_vm10, %v7872_v8, %v7818_v25 }
 0x82e   :  { %v7907_v45 = vpop.permute.xlu0 %3833 }
 0x82f   :  { %3241 = vrot.lane.b32.xlu1 %v7643_v52, %s5358_s26 }
 0x830   :  { %4171 = vrot.lane.b32.xlu0 %v8406_v62, %s5358_s26 }
 0x831   :  { %v7913_v50 = vpop.permute.xlu1 %3073 }
 0x832   :  { %v7915_v14 = vpop.permute.xlu0 %3829 }
 0x833   :  { %3297 = vrot.lane.b32.xlu1 %v8437_v20, %s5363_s8 }
 0x834   :  { %3299 = vrot.lane.b32.xlu0 %v8438_v28, %s5363_s8  ;;  %v3031_v28 = vsel %vm770_vm10, %v7843_v35, %v7872_v8 }
 0x835   :  { %v2908_v42 = vpop.permute.xlu1 %2907 }
 0x836   :  { %v7925_v43 = vpop.permute.xlu0 %4001  ;;  %v2913_v52 = vsel %vm621_vm8, %v2906_v44, %v2908_v42  ;;  %v2914_v62 = vsel %vm621_vm8, %v2908_v42, %v2910_v39  ;;  %v8450_v39 = vld [vmem:[#allocation48_spill] sm:$0xff] }
 0x837   :  { %4227 = vrot.lane.b32.xlu1 %v8439_v56, %s5363_s8  ;;  %4395 = vmatprep.subr.bf16.mxu0 %v2914_v62  ;;  %v8452_v13 = vpack.c.bf16 %v8450_v39, %v8451_v10 }
 0x838   :  { %4229 = vrot.lane.b32.xlu0 %v8440_v55, %s5363_s8  ;;  %4396 = vmatpush1.bf16.msra.mxu0 %v2913_v52 }
 0x839   :  { %4397 = vmatprep.subr.bf16.mxu0 %v2972_v33  ;;  %v3076_v11 = vpop.permute.xlu1 %3075 }
 0x83a   :  { %v7939_v51 = vpop.permute.xlu0 %3997  ;;  %v3082_v35 = vsel %vm819_vm11, %v3076_v11, %v7860_v54 }
 0x83b   :  { %3295 = vrot.lane.b32.xlu1 %v8441_v30, %s5363_s8 }
 0x83c   :  { %4225 = vrot.lane.b32.xlu0 %v8444_v41, %s5363_s8  ;;  %4398 = vmatpush1.bf16.msra.mxu0 %v2971_v61 }
 0x83d   :  { %v2966_v0 = vpop.permute.xlu1 %2965 }
 0x83e   :  { %v7950_v19 = vpop.permute.xlu0 %3893 }
 0x83f   :  { %3303 = vrot.lane.b32.xlu1 %v8445_v59, %s5363_s8 }
 0x840   :  { %3305 = vrot.lane.b32.xlu0 %v8446_v32, %s5363_s8 }
 0x841   :  { %v3026_v34 = vpop.permute.xlu1 %3025 }
 0x842   :  { %v7960_v48 = vpop.permute.xlu0 %3889 }
 0x843   :  { %4233 = vrot.lane.b32.xlu1 %v8447_v7, %s5363_s8 }
 0x844   :  { %4235 = vrot.lane.b32.xlu0 %v8449_v17, %s5363_s8 }
 0x845   :  { %v3134_v1 = vpop.permute.xlu1 %3133 }
 0x846   :  { %v7970_v22 = vpop.permute.xlu0 %3953 }
 0x847   :  { %3301 = vrot.lane.b32.xlu1 %v8452_v13, %s5363_s8 }
 0x848   :  { %4231 = vrot.lane.b32.xlu0 %v8455_v29, %s5363_s8 }
 0x849   :  { %v7983_v12 = vpop.permute.xlu1 %3193 }
 0x84a   :  { %v7988_v23 = vpop.permute.xlu0 %3949 }
 0x84b   :  { %4335 = vperm.xlu1 %5094, %v4329_v5  }
 0x84c   :  { %4340 = vperm.xlu0 %5095, %v4330_v31  }
 0x84d   :  { %v2968_v38 = vpop.permute.xlu1 %2967 }
 0x84e   :  { %v7996_v26 = vpop.permute.xlu0 %4061  ;;  %v2973_v53 = vsel %vm700_vm9, %v2966_v0, %v2968_v38  ;;  %v2974_v44 = vsel %vm700_vm9, %v2968_v38, %v7866_v37 }
 0x84f   :  { %4345 = vperm.xlu1 %5094, %v4331_v47   ;;  %4399 = vmatprep.subr.bf16.mxu0 %v2974_v44 }
 0x850   :  { %4350 = vperm.xlu0 %5095, %v4332_v49   ;;  %4400 = vmatpush1.bf16.msra.mxu0 %v2973_v53 }
 0x851   :  { %4401 = vmatprep.subr.bf16.mxu0 %v3032_v58  ;;  %v3028_v21 = vpop.permute.xlu1 %3027 }
 0x852   :  { %v8004_v20 = vpop.permute.xlu0 %4057  ;;  %v3034_v37 = vsel %vm770_vm10, %v3028_v21, %v7874_v3  ;;  %v3033_v62 = vsel %vm770_vm10, %v3026_v34, %v3028_v21 }
 0x854   :  { %4402 = vmatpush1.bf16.msra.mxu0 %v3031_v28 }
 0x855   :  { %4403 = vmatprep.subr.bf16.mxu0 %v3034_v37  ;;  %v3136_v42 = vpop.permute.xlu1 %3135 }
 0x856   :  { %v8011_v52 = vpop.permute.xlu0 %4121  ;;  %v3141_v30 = vsel %vm889_vm12, %v3134_v1, %v3136_v42 }
 0x858   :  { %4404 = vmatpush1.bf16.msra.mxu0 %v3033_v62 }
 0x859   :  { %4405 = vmatprep.subr.bf16.mxu0 %v7824_v15  ;;  %v3196_v25 = vpop.permute.xlu1 %3195  ;;  %v3081_v15 = vsel %vm819_vm11, %v7913_v50, %v3076_v11 }
 0x85a   :  { %v8015_v56 = vpop.permute.xlu0 %4117  ;;  %v3201_v41 = vsel %vm958_vm13, %v7983_v12, %v3196_v25 }
 0x85c   :  { %4406 = vmatpush1.bf16.msra.mxu0 %v7821_v16  ;;  %v3140_v16 = vsel %vm889_vm12, %v7882_v24, %v7831_v57  ;;  %v3200_v57 = vsel %vm958_vm13, %v7890_v63, %v7845_v9 }
 0x85d   :  { %4407 = vmatprep.subr.bf16.mxu0 %v3082_v35  ;;  %v3832_v8 = vpop.permute.xlu1 %3831 }
 0x85e   :  { %v3840_v3 = vpop.permute.xlu0 %3839  ;;  %v3841_v55 = vsel %vm621_vm8, %v7915_v14, %v3832_v8  ;;  %v3842_v33 = vsel %vm621_vm8, %v3832_v8, %v7907_v45  ;;  %v3139_v14 = vsel %vm889_vm12, %v7852_v27, %v7882_v24  ;;  %v3142_v45 = vsel %vm889_vm12, %v3136_v42, %v7884_v36 }
 0x85f   :  { %4499 = vmatprep.subr.bf16.mxu1 %v3842_v33  ;;  %v3202_v27 = vsel %vm958_vm13, %v3196_v25, %v7892_v4 }
 0x860   :  { %4408 = vmatpush1.bf16.msra.mxu0 %v3081_v15  ;;  %4500 = vmatpush1.bf16.msra.mxu1 %v3841_v55 }
 0x861   :  { %4409 = vmatprep.subr.bf16.mxu0 %v3140_v16  ;;  %v4000_v54 = vpop.permute.xlu1 %3999 }
 0x862   :  { %v3836_v61 = vpop.permute.xlu0 %3835  ;;  %v4010_v31 = vsel %vm819_vm11, %v4000_v54, %v7925_v43  ;;  %v4009_v38 = vsel %vm819_vm11, %v7939_v51, %v4000_v54 }
 0x864   :  { %4410 = vmatpush1.bf16.msra.mxu0 %v3139_v14 }
 0x865   :  { %4411 = vmatprep.subr.bf16.mxu0 %v3142_v45  ;;  %v3892_v50 = vpop.permute.xlu1 %3891 }
 0x866   :  { %v4008_v11 = vpop.permute.xlu0 %4007  ;;  %v3902_v4 = vsel %vm700_vm9, %v3892_v50, %v7950_v19  ;;  %v3901_v60 = vsel %vm700_vm9, %v7960_v48, %v3892_v50 }
 0x868   :  { %4412 = vmatpush1.bf16.msra.mxu0 %v3141_v30 }
 0x869   :  { %4413 = vmatprep.subr.bf16.mxu0 %v3200_v57  ;;  %v3952_v6 = vpop.permute.xlu1 %3951 }
 0x86a   :  { %v4004_v18 = vpop.permute.xlu0 %4003  ;;  %v3962_v13 = vsel %vm770_vm10, %v3952_v6, %v7970_v22  ;;  %v3961_v2 = vsel %vm770_vm10, %v7988_v23, %v3952_v6 }
 0x86c   :  { %4414 = vmatpush1.bf16.msra.mxu0 %v7896_v46 }
 0x86d   :  { %4415 = vmatprep.subr.bf16.mxu0 %v3202_v27  ;;  %v4060_v24 = vpop.permute.xlu1 %4059 }
 0x86e   :  { %v3900_v36 = vpop.permute.xlu0 %3899  ;;  %v4070_v43 = vsel %vm889_vm12, %v4060_v24, %v7996_v26  ;;  %v4069_v37 = vsel %vm889_vm12, %v8004_v20, %v4060_v24 }
 0x870   :  { %4416 = vmatpush1.bf16.msra.mxu0 %v3201_v41  ;;  %v5109_v41 = vld [vmem:[%s8188_s9 + $0x18] ss:$12 sps:$4 sm:$0xff]  }
 0x871   :  { %v8043_v0 = vpop.permute.xlu1 %4119 }
 0x872   :  { %v3896_v59 = vpop.permute.xlu0 %3895  ;;  %v4130_v26 = vsel %vm958_vm13, %v8043_v0, %v8011_v52  ;;  %v4129_v20 = vsel %vm958_vm13, %v8015_v56, %v8043_v0  ;;  %v5104_v56 = vld [vmem:[%s8188_s9] ss:$12 sps:$4 sm:$0xff]  }
 0x875   :  { %v3838_v32 = vpop.permute.xlu1 %3837 }
 0x876   :  { %v3960_v9 = vpop.permute.xlu0 %3959  ;;  %v3843_v63 = vsel %vm621_vm8, %v3836_v61, %v3838_v32  ;;  %v3844_v34 = vsel %vm621_vm8, %v3838_v32, %v3840_v3 }
 0x877   :  { %4501 = vmatprep.subr.bf16.mxu1 %v3844_v34  ;;  %v8456_v34 = vmov 0  }
 0x878   :  { %4502 = vmatpush1.bf16.msra.mxu1 %v3843_v63 }
 0x879   :  { %4503 = vmatprep.subr.bf16.mxu1 %v3902_v4  ;;  %v4006_v46 = vpop.permute.xlu1 %4005 }
 0x87a   :  { %v3956_v7 = vpop.permute.xlu0 %3955  ;;  %v4012_v23 = vsel %vm819_vm11, %v4006_v46, %v4008_v11  ;;  %v4011_v58 = vsel %vm819_vm11, %v4004_v18, %v4006_v46  ;;  %v5107_v11 = vld [vmem:[%s8188_s9 + $0x1c] ss:$12 sps:$4 sm:$0xff]  }
 0x87c   :  { %4504 = vmatpush1.bf16.msra.mxu1 %v3901_v60 }
 0x87d   :  { %v3898_v17 = vpop.permute.xlu1 %3897 }
 0x87e   :  { %v4068_v1 = vpop.permute.xlu0 %4067  ;;  %v3903_v39 = vsel %vm700_vm9, %v3896_v59, %v3898_v17  ;;  %v3904_v10 = vsel %vm700_vm9, %v3898_v17, %v3900_v36 }
 0x87f   :  { %4505 = vmatprep.subr.bf16.mxu1 %v3904_v10 }
 0x880   :  { %4506 = vmatpush1.bf16.msra.mxu1 %v3903_v39 }
 0x881   :  { %4507 = vmatprep.subr.bf16.mxu1 %v3962_v13  ;;  %v3238_v19 = vpop.permute.xlu1 %3237 }
 0x882   :  { %v4064_v40 = vpop.permute.xlu0 %4063 }
 0x884   :  { %4508 = vmatpush1.bf16.msra.mxu1 %v3961_v2  ;;  %v5111_v2 = vld [vmem:[%s8188_s9 + $0x20] ss:$12 sps:$4 sm:$0xff]  }
 0x885   :  { %v3958_v48 = vpop.permute.xlu1 %3957 }
 0x886   :  { %v4128_v29 = vpop.permute.xlu0 %4127  ;;  %v3963_v5 = vsel %vm770_vm10, %v3956_v7, %v3958_v48  ;;  %v3964_v12 = vsel %vm770_vm10, %v3958_v48, %v3960_v9 }
 0x887   :  { %4509 = vmatprep.subr.bf16.mxu1 %v3964_v12  ;;  %v4625_v12 = vld [vmem:[%s8179_s0] sm:$0xff] }
 0x888   :  { %4510 = vmatpush1.bf16.msra.mxu1 %v3963_v5 }
 0x889   :  { %4511 = vmatprep.subr.bf16.mxu1 %v4010_v31  ;;  %v4168_v22 = vpop.permute.xlu1 %4167 }
 0x88a   :  { %v4124_v47 = vpop.permute.xlu0 %4123 }
 0x88c   :  { %4512 = vmatpush1.bf16.msra.mxu1 %v4009_v38 }
 0x88d   :  { %4513 = vmatprep.subr.bf16.mxu1 %v4012_v23  ;;  %v3236_v49 = vpop.permute.xlu1 %3235  ;;  %v4626_v23 = vld [vmem:[%s8179_s0 + $0x8] sm:$0xff] }
 0x88e   :  { %v3240_v53 = vpop.permute.xlu0 %3239  ;;  %v3247_v44 = vsel %vm1007_vm14, %v3236_v49, %v3238_v19 }
 0x88f   :  { %v3248_v21 = vsel %vm1007_vm14, %v3238_v19, %v3240_v53  ;;  %v5110_v19 = vld [vmem:[%s8188_s9 + $0x8] ss:$12 sps:$4 sm:$0xff]   ;;  %s4687_s9 = sshll.u32 %s5364_s23, 4  ;;  %s4688_s9 = int_to_ptr.vmem [resolvable:$true] %s4687_s9 }
 0x890   :  { %4417 = vmatprep.subr.bf16.mxu0 %v3248_v21  ;;  %4514 = vmatpush1.bf16.msra.mxu1 %v4011_v58  ;;  %v4761_v58 = vld [vmem:[%s8179_s0 + $0x48] sm:$0xff]  ;;  %s5316_s25 = scalar_lea.vmem %s4688_s9, 2048  ;;  %p5321_p3 = scmp.lt.s32.totalorder %s4688_s9, %s4688_s9 }
 0x891   :  { %4418 = vmatpush1.bf16.msra.mxu0 %v3247_v44  ;;  %4515 = vmatprep.subr.bf16.mxu1 %v4070_v43  ;;  %v3244_v51 = vpop.permute.xlu1 %3243  ;;  %v4627_v43 = vld [vmem:[%s8179_s0 + $0x10] sm:$0xff]  ;;  %p5317_p2 = scmp.ne.s32.totalorder %s4688_s9, %s5316_s25  ;;  %p5322_p4 = scmp.lt.s32.totalorder %s5316_s25, %s5316_s25 }
 0x892   :  { %v4170_v28 = vpop.permute.xlu0 %4169 }
 0x893   :  { %v4178_v52 = vsel %vm1007_vm14, %v4168_v22, %v4170_v28  ;;  %p5323_p5 = por %p5322_p4, %p5321_p3 }
 0x894   :  { %4516 = vmatpush1.bf16.msra.mxu1 %v4069_v37 }
 0x895   :  { %v4066_v42 = vpop.permute.xlu1 %4065  ;;  %p5324_p6 = pnand %p5323_p5, %p5317_p2 }
 0x896   :  { %v4166_v62 = vpop.permute.xlu0 %4165  ;;  %v4071_v25 = vsel %vm889_vm12, %v4064_v40, %v4066_v42  ;;  %v4072_v35 = vsel %vm889_vm12, %v4066_v42, %v4068_v1 }
 0x897   :  { %4517 = vmatprep.subr.bf16.mxu1 %v4072_v35  ;;  %v4177_v50 = vsel %vm1007_vm14, %v4166_v62, %v4168_v22  ;;  %v4762_v62 = vld [vmem:[%s8179_s0 + $0x50] sm:$0xff]  ;;  %v4628_v35 = vld [vmem:[%s8179_s0 + $0x18] sm:$0xff] }
 0x898   :  { %4518 = vmatpush1.bf16.msra.mxu1 %v4071_v25 }
 0x899   :  { %4519 = vmatprep.subr.bf16.mxu1 %v4130_v26  ;;  %v4174_v8 = vpop.permute.xlu1 %4173 }
 0x89a   :  { %v3246_v3 = vpop.permute.xlu0 %3245 }
 0x89b   :  { %v3250_v55 = vsel %vm1007_vm14, %v3244_v51, %v3246_v3 }
 0x89c   :  { %4419 = vmatprep.subr.bf16.mxu0 %v3250_v55  ;;  %4520 = vmatpush1.bf16.msra.mxu1 %v4129_v20 }
 0x89d   :  { %v4126_v33 = vpop.permute.xlu1 %4125 }
 0x89e   :  { %v4176_v15 = vpop.permute.xlu0 %4175  ;;  %v4131_v16 = vsel %vm958_vm13, %v4124_v47, %v4126_v33  ;;  %v4132_v54 = vsel %vm958_vm13, %v4126_v33, %v4128_v29  ;;  %v4760_v47 = vld [vmem:[%s8179_s0 + $0x40] sm:$0xff]  ;;  %v4763_v33 = vld [vmem:[%s8179_s0 + $0x58] sm:$0xff] }
 0x89f   :  { %4521 = vmatprep.subr.bf16.mxu1 %v4132_v54  ;;  %v4180_v30 = vsel %vm1007_vm14, %v4174_v8, %v4176_v15 }
 0x8a0   :  { %4522 = vmatpush1.bf16.msra.mxu1 %v4131_v16 }
 0x8a1   :  { %4523 = vmatprep.subr.bf16.mxu1 %v4178_v52  ;;  %v3242_v61 = vpop.permute.xlu1 %3241 }
 0x8a2   :  { %v4172_v14 = vpop.permute.xlu0 %4171  ;;  %v3249_v45 = vsel %vm1007_vm14, %v3242_v61, %v3244_v51 }
 0x8a3   :  { %4420 = vmatpush1.bf16.msra.mxu0 %v3249_v45  ;;  %v4179_v18 = vsel %vm1007_vm14, %v4172_v14, %v4174_v8 }
 0x8a4   :  { %4524 = vmatpush1.bf16.msra.mxu1 %v4177_v50 }
 0x8a5   :  { %4525 = vmatprep.subr.bf16.mxu1 %v4180_v30  ;;  %v3298_v57 = vpop.permute.xlu1 %3297 }
 0x8a6   :  { %v3300_v6 = vpop.permute.xlu0 %3299  ;;  %4422 = vmatmul.mubr.bf16.vlgmr.msra.gmra.mrb[24].mxu0 %v5104_v56 }
 0x8a7   :  { %v3308_v27 = vsel %vm1077_vm15, %v3298_v57, %v3300_v6  ;;  %4431 = vmatprep.mubr.bf16.mxu0 %v5107_v11  ;;  %v4764_v6 = vld [vmem:[%s8179_s0 + $0x60] sm:$0xff] }
 0x8a8   :  { %4442 = vmatprep.subr.bf16.mxu0 %v3308_v27  ;;  %4526 = vmatpush1.bf16.msra.mxu1 %v4179_v18  ;;  %v4630_v27 = vld [vmem:[%s8179_s0 + $0x28] sm:$0xff] }
 0x8a9   :  { %v4228_v24 = vpop.permute.xlu1 %4227 }
 0x8aa   :  { %v4230_v36 = vpop.permute.xlu0 %4229 }
 0x8ab   :  { %v4238_v0 = vsel %vm1077_vm15, %v4228_v24, %v4230_v36  ;;  %4528 = vmatmul.mubr.bf16.vlgmr.msra.gmra.mrb[24].mxu1 %v5104_v56 }
 0x8ac   :  { %4548 = vmatprep.subr.bf16.mxu1 %v4238_v0  ;;  %4537 = vmatprep.mubr.bf16.mxu1 %v5107_v11  ;;  %v4629_v11 = vld [vmem:[%s8179_s0 + $0x20] sm:$0xff]  ;;  %v4765_v0 = vld [vmem:[%s8179_s0 + $0x68] sm:$0xff] }
 0x8ad   :  { %v3296_v59 = vpop.permute.xlu1 %3295 }
 0x8ae   :  { %v4226_v32 = vpop.permute.xlu0 %4225  ;;  %v3307_v9 = vsel %vm1077_vm15, %v3296_v59, %v3298_v57  ;;  %4432 = vmatmul.mubr.bf16.gmra.mrb[28].mxu0 %v5109_v41 }
 0x8af   :  { %v4237_v63 = vsel %vm1077_vm15, %v4226_v32, %v4228_v24  ;;  %4443 = vmatpush1.bf16.msra.mxu0 %v3307_v9  ;;  %4474 = vmatprep.mubr.bf16.mxu0 %v8456_v34  ;;  %v4631_v32 = vld [vmem:[%s8179_s0 + $0x30] sm:$0xff] }
 0x8b0   :  { %4549 = vmatpush1.bf16.msra.mxu1 %v4237_v63 }
 0x8b1   :  { %v3304_v4 = vpop.permute.xlu1 %3303 }
 0x8b2   :  { %v3306_v46 = vpop.permute.xlu0 %3305 }
 0x8b3   :  { %v3310_v7 = vsel %vm1077_vm15, %v3304_v4, %v3306_v46  ;;  %4538 = vmatmul.mubr.bf16.gmra.mrb[28].mxu1 %v5109_v41  ;;  %v4766_v46 = vld [vmem:[%s8179_s0 + $0x70] sm:$0xff] }
 0x8b4   :  { %4444 = vmatprep.subr.bf16.mxu0 %v3310_v7  ;;  %4580 = vmatprep.mubr.bf16.mxu1 %v8456_v34 }
 0x8b5   :  { %v4234_v60 = vpop.permute.xlu1 %4233 }
 0x8b6   :  { %v4236_v17 = vpop.permute.xlu0 %4235 }
 0x8b7   :  { %v4240_v1 = vsel %vm1077_vm15, %v4234_v60, %v4236_v17 }
 0x8b8   :  { %4550 = vmatprep.subr.bf16.mxu1 %v4240_v1 }
 0x8b9   :  { %v3302_v39 = vpop.permute.xlu1 %3301 }
 0x8ba   :  { %v4232_v10 = vpop.permute.xlu0 %4231  ;;  %v3309_v13 = vsel %vm1077_vm15, %v3302_v39, %v3304_v4 }
 0x8bb   :  { %v4239_v40 = vsel %vm1077_vm15, %v4232_v10, %v4234_v60  ;;  %4445 = vmatpush1.bf16.msra.mxu0 %v3309_v13  ;;  %v4632_v60 = vld [vmem:[%s8179_s0 + $0x38] sm:$0xff] }
 0x8bc   :  { %4551 = vmatpush1.bf16.msra.mxu1 %v4239_v40 }
 0x8be   :  { %4756 = vmatmul.mubr.msk.bf16.vlgmr.msra.gmra.mrb[24].mxu0 %vm138_vm0, %v5110_v19 }
 0x8bf   :  { %4758 = vmatmul.mubr.msk.bf16.vlgmr.msra.gmra.mrb[24].mxu1 %vm138_vm0, %v5110_v19  ;;  %4484 = vmatprep.mubr.bf16.mxu0 %v8456_v34  ;;  %v4767_v19 = vld [vmem:[%s8179_s0 + $0x78] sm:$0xff] }
 0x8c0   :  { %4590 = vmatprep.mubr.bf16.mxu1 %v8456_v34 }
 0x8c6   :  { %4757 = vmatmul.mubr.msk.bf16.gmra.mrb[28].mxu0 %vm138_vm0, %v5111_v2 }
 0x8c7   :  { %4759 = vmatmul.mubr.msk.bf16.gmra.mrb[28].mxu1 %vm138_vm0, %v5111_v2 }
 0x8ca   :  { %v4336_v48 = vpop.permute.xlu1 %4335 }
 0x8cb   :  { %v4341_v29 = vpop.permute.xlu0 %4340 }
 0x8ce   :  { %v4346_v14 = vpop.permute.xlu1 %4345 }
 0x8cf   :  { %v4351_v56 = vpop.permute.xlu0 %4350 }
 0x991   :  { %v4476_v5 = vpop.f32.mrb[24].mxu0 }
 0x992   :  { %v5024_v31 = vadd.f32 %v4476_v5, %v4336_v48  ;;  %v4582_v22 = vpop.f32.mrb[24].mxu1  ;;  %v4478_v38 = vpop.f32.mrb[25].mxu0 }
 0x993   :  { %v5032_v49 = vadd.f32 %v4582_v22, %v4336_v48  ;;  %v5025_v53 = vadd.f32 %v4478_v38, %v4336_v48  ;;  %v4584_v44 = vpop.f32.mrb[25].mxu1  ;;  %v4480_v21 = vpop.f32.mrb[26].mxu0 }
 0x994   :  { %v4633_v51 = vadd.f32 %v5024_v31, %v4625_v12  ;;  %v5033_v28 = vadd.f32 %v4584_v44, %v4336_v48  ;;  %v5026_v37 = vadd.f32 %v4480_v21, %v4341_v29  ;;  %v4586_v42 = vpop.f32.mrb[26].mxu1  ;;  %v4482_v25 = vpop.f32.mrb[27].mxu0 }
 0x995   :  { %v4665_v26 = vadd.f32 %v5032_v49, %v4760_v47  ;;  %v4634_v8 = vadd.f32 %v5025_v53, %v4626_v23  ;;  %v5034_v3 = vadd.f32 %v4586_v42, %v4341_v29  ;;  %v5027_v20 = vadd.f32 %v4482_v25, %v4341_v29  ;;  %v4588_v55 = vpop.f32.mrb[27].mxu1 }
 0x996   :  { %4641 = vst [vmem:[#allocation10] sm:$0xff] %v4633_v51  ;;  %v4666_v15 = vadd.f32 %v5033_v28, %v4761_v58  ;;  %v4635_v16 = vadd.f32 %v5026_v37, %v4627_v43  ;;  %v5035_v54 = vadd.f32 %v4588_v55, %v4341_v29 }
 0x997   :  { %4674 = vst [vmem:[#allocation10 + $0x40] sm:$0xff] %v4665_v26  ;;  %4642 = vst [vmem:[#allocation10 + $0x8] sm:$0xff] %v4634_v8  ;;  %v4667_v52 = vadd.f32 %v5034_v3, %v4762_v62  ;;  %v4636_v61 = vadd.f32 %v5027_v20, %v4628_v35 }
 0x998   :  { %4675 = vst [vmem:[#allocation10 + $0x48] sm:$0xff] %v4666_v15  ;;  %4643 = vst [vmem:[#allocation10 + $0x10] sm:$0xff] %v4635_v16  ;;  %v4668_v45 = vadd.f32 %v5035_v54, %v4763_v33 }
 0x999   :  { %4676 = vst [vmem:[#allocation10 + $0x50] sm:$0xff] %v4667_v52  ;;  %4644 = vst [vmem:[#allocation10 + $0x18] sm:$0xff] %v4636_v61  ;;  %v4486_v50 = vpop.f32.mrb[28].mxu0 }
 0x99a   :  { %4677 = vst [vmem:[#allocation10 + $0x58] sm:$0xff] %v4668_v45  ;;  %v5028_v30 = vadd.f32 %v4486_v50, %v4346_v14  ;;  %v4592_v57 = vpop.f32.mrb[28].mxu1  ;;  %v4488_v18 = vpop.f32.mrb[29].mxu0 }
 0x99b   :  { %v5036_v24 = vadd.f32 %v4592_v57, %v4346_v14  ;;  %v5029_v36 = vadd.f32 %v4488_v18, %v4346_v14  ;;  %v4594_v41 = vpop.f32.mrb[29].mxu1  ;;  %v4490_v59 = vpop.f32.mrb[30].mxu0 }
 0x99c   :  { %v4637_v9 = vadd.f32 %v5028_v30, %v4629_v11  ;;  %v5037_v63 = vadd.f32 %v4594_v41, %v4346_v14  ;;  %v5030_v34 = vadd.f32 %v4490_v59, %v4351_v56  ;;  %v4596_v4 = vpop.f32.mrb[30].mxu1  ;;  %v4492_v7 = vpop.f32.mrb[31].mxu0 }
 0x99d   :  { %v4669_v17 = vadd.f32 %v5036_v24, %v4764_v6  ;;  %v4638_v1 = vadd.f32 %v5029_v36, %v4630_v27  ;;  %v5038_v39 = vadd.f32 %v4596_v4, %v4351_v56  ;;  %v5031_v10 = vadd.f32 %v4492_v7, %v4351_v56  ;;  %v4598_v13 = vpop.f32.mrb[31].mxu1 }
 0x99e   :  { %4645 = vst [vmem:[#allocation10 + $0x20] sm:$0xff] %v4637_v9  ;;  %v4670_v40 = vadd.f32 %v5037_v63, %v4765_v0  ;;  %v4639_v2 = vadd.f32 %v5030_v34, %v4631_v32  ;;  %v5039_v48 = vadd.f32 %v4598_v13, %v4351_v56 }
 0x99f   :  { %4678 = vst [vmem:[#allocation10 + $0x60] sm:$0xff] %v4669_v17  ;;  %4646 = vst [vmem:[#allocation10 + $0x28] sm:$0xff] %v4638_v1  ;;  %v4671_v29 = vadd.f32 %v5038_v39, %v4766_v46  ;;  %v4640_v5 = vadd.f32 %v5031_v10, %v4632_v60 }
 0x9a0   :  { %4679 = vst [vmem:[#allocation10 + $0x68] sm:$0xff] %v4670_v40  ;;  %4647 = vst [vmem:[#allocation10 + $0x30] sm:$0xff] %v4639_v2  ;;  %v4672_v12 = vadd.f32 %v5039_v48, %v4767_v19 }
 0x9a1   :  { %4680 = vst [vmem:[#allocation10 + $0x70] sm:$0xff] %v4671_v29  ;;  %4648 = vst [vmem:[#allocation10 + $0x38] sm:$0xff] %v4640_v5 }
 0x9a2   :  { %4681 = vst [vmem:[#allocation10 + $0x78] sm:$0xff] %v4672_v12 }
 0x9a3   :  { %5327 = shalt.err (!%p5324_p6)
}
 0x9a4   :  { %s5328_s6 = scalar_lea.hbm %s8192_s13, 2048 }
 0x9a5   :  { %p5329_p7 = scmp.ne.s32.totalorder %s8192_s13, %s5328_s6  ;;  %p5332_p8 = scmp.lt.u32.totalorder %s5328_s6, %s8192_s13 }
 0x9a7   :  { %p5334_p9 = pnand %p5332_p8, %p5329_p7 }
 0x9a9   :  { %5337 = shalt.err (!%p5334_p9)
}
 0x9aa   :  { %s5365_s26 = smov 256  }
 0x9ab   :  { %4693 = dma.vmem_to_hbm [thread:$0]  %s4688_s9, 2048, %s8192_s13, [#allocation7], %s5365_s26, %s5365_s26, %s5350_s29  }
 0x9ac   :  { %5342 = dma.done.wait [#allocation7], 2048  }
 0x9ad   :  { %5343 = vsyncadd [#allocation7], 4294965248 }
 0x9ae   :  { %4697 = vsyncpa [#allocation6], 1 }
 0x9af   :  { %4698 = vsyncpa [#allocation9], 1 }
 0x9b0   :  { %4699 = vsyncpa [#allocation7], 1 }

</bundles_post_ra>
